<compile_context>
chip_gen: v5e
topology: v5e:2x2
jax: 0.10.0
libtpu: 0.0.40
codegen_flags: <defaults>
</compile_context>

<pallas_src>
import functools
import numpy as np
import jax
import jax.numpy as jnp
from jax import lax
from jax.experimental import pallas as pl
from jax.experimental.pallas import tpu as pltpu

TINY_NUMBER = 1e-6


def _render_kernel(gbuf_ref, samp_ref, campos_ref,
                   w1_ref, b1_ref, w2_ref, b2_ref, out_ref, *, S):
    # G-buffer rows (packed (16, TN) f32):
    #   0-2 normal, 3-5 albedo, 6 roughness, 7-9 points, 10-15 pad.
    nx, ny, nz = gbuf_ref[0:1, :], gbuf_ref[1:2, :], gbuf_ref[2:3, :]
    ar, ag, ab = gbuf_ref[3:4, :], gbuf_ref[4:5, :], gbuf_ref[5:6, :]
    rough = gbuf_ref[6:7, :]
    px, py, pz = gbuf_ref[7:8, :], gbuf_ref[8:9, :], gbuf_ref[9:10, :]

    # Half-vector channels: slice the bf16 ref, upcast the slice only
    # (bf16 is a storage/DMA format; no bf16 VPU/EUP datapath on v5e).
    hx = samp_ref[0 * S:1 * S, :].astype(jnp.float32)      # (S, TN)
    hy = samp_ref[1 * S:2 * S, :].astype(jnp.float32)
    hz = samp_ref[2 * S:3 * S, :].astype(jnp.float32)

    # view = F.normalize(cam_position - points, eps=1e-4)
    #   v / max(||v||, eps) == v * rsqrt(max(||v||^2, eps^2))
    vx = campos_ref[0] - px
    vy = campos_ref[1] - py
    vz = campos_ref[2] - pz
    inv_norm = lax.rsqrt(jnp.maximum(vx * vx + vy * vy + vz * vz, 1e-8))
    vx, vy, vz = vx * inv_norm, vy * inv_norm, vz * inv_norm

    # irr = hdr_recover(ir_radiance_network(points))
    # TODO(synk): exact MatNetwork architecture / hdr_recover come from the
    # conf file; placeholder 3->H->3 ReLU MLP with hdr_recover(x) = exp(x)-1.
    # Layer 1 (K=3) as broadcast FMAs on the VPU; layer 2 (K=H) on the MXU in bf16.
    hid = jnp.maximum(
        w1_ref[:, 0:1] * px + w1_ref[:, 1:2] * py + w1_ref[:, 2:3] * pz
        + b1_ref[...], 0.0)                                 # (H, TN)
    irr_raw = jnp.dot(w2_ref[...], hid.astype(jnp.bfloat16),
                      preferred_element_type=jnp.float32) + b2_ref[...]
    irr = jnp.exp(irr_raw) - 1.0                            # (3, TN)

    # --- specular (matches MaterialModel.specular_reflectance) ---
    # Reference clamps v.h to [0,1] BEFORE building the reflected direction.
    vdh = jnp.clip(hx * vx + hy * vy + hz * vz, 0.0, 1.0)   # (S, TN)
    lx = 2.0 * vdh * hx - vx                                 # light_dir_spec
    ly = 2.0 * vdh * hy - vy
    lz = 2.0 * vdh * hz - vz
    ndl = jnp.clip(nx * lx + ny * ly + nz * lz, 0.0, 1.0)    # (S, TN)
    ndh = jnp.clip(nx * hx + ny * hy + nz * hz, 0.0, 1.0)    # (S, TN)
    ndv = jnp.clip(nx * vx + ny * vy + nz * vz, 0.0, 1.0)    # (1, TN)

    f = 0.04 + 0.96 * jnp.exp2((-5.55472 * vdh - 6.98316) * vdh)
    k = (rough + 1.0) * (rough + 1.0) * 0.125                # (1, TN)
    one_mk = 1.0 - k
    # Folded GGX weight: one EUP reciprocal instead of 3-4 per-(S,TN) streams.
    # (4*ndl*ndv cancels against g1 numerators; ndl stays in the numerator so
    # the result still -> 0 when the dropped clamp would have fired.)
    denom = ((ndl * one_mk + k) * (ndv * one_mk + k)
             * jnp.maximum(ndh, TINY_NUMBER) * np.float32(S))
    wgt = f * ndl * vdh * pl.reciprocal(
        jnp.maximum(denom, TINY_NUMBER), approx=True)        # (S, TN)

    inv_pi = np.float32(1.0 / np.pi)
    # rgb rows 0-2: diffuse + per-channel spec sum (lighting cast per slice).
    lr = samp_ref[3 * S:4 * S, :].astype(jnp.float32)
    out_ref[0:1, :] = irr[0:1, :] * ar * inv_pi + jnp.sum(lr * wgt, axis=0,
                                                          keepdims=True)
    lg = samp_ref[4 * S:5 * S, :].astype(jnp.float32)
    out_ref[1:2, :] = irr[1:2, :] * ag * inv_pi + jnp.sum(lg * wgt, axis=0,
                                                          keepdims=True)
    lb = samp_ref[5 * S:6 * S, :].astype(jnp.float32)
    out_ref[2:3, :] = irr[2:3, :] * ab * inv_pi + jnp.sum(lb * wgt, axis=0,
                                                          keepdims=True)
    # position rows 3-5: points + 0.02 * normal
    out_ref[3:4, :] = px + 0.02 * nx
    out_ref[4:5, :] = py + 0.02 * ny
    out_ref[5:6, :] = pz + 0.02 * nz


def _round_up(x, m):
    return (x + m - 1) // m * m


def material_render(normal, albedo, roughness, points, cam_position,
                    h_dir, spec_lighting, w1, b1, w2, b2, *, tile_n=16384):
    """Per-pixel inputs in PyTorch convention [6, h, w, C]; sampled quantities
    as [6, h, w, S, 3].  tile_n: pixels per grid step (sweepable; auto-clamped
    so double-buffered blocks + f32 temporaries stay well inside VMEM)."""
    face, hh, ww, _ = normal.shape
    N = face * hh * ww
    S = h_dir.shape[3]
    H = w1.shape[0]

    R = 6 * S                           # h_dir(3S) + lighting(3S) rows
    R_pad = _round_up(R, 16)            # bf16 HBM tile is (16, 128)

    assert tile_n % 128 == 0
    # Rough per-pixel VMEM: 2x double-buffered blocks + f32 per-sample temps.
    per_px = 2 * (16 * 4 + R_pad * 2 + 6 * 4) + 8 * S * 4
    max_tile = max(128, ((40 << 20) // per_px) // 128 * 128)
    tile_n = min(tile_n, max_tile, _round_up(N, 128))
    Np = _round_up(N, tile_n)
    grid = (Np // tile_n,)

    # --- glue: flatten + transpose into the kernel layout ---
    # TODO(synk): these transposes are extra XLA HBM passes; produce
    # channel-major buffers upstream for best end-to-end perf.
    def to_cn(x):                    # [6,h,w,C] -> [C, N]
        return jnp.transpose(x.reshape(N, x.shape[-1]), (1, 0))

    def to_scn(x):                   # [6,h,w,S,3] -> [3*S, N] channel-major
        return jnp.transpose(x.reshape(N, S, 3), (2, 1, 0)).reshape(3 * S, N)

    def pad_n(x):
        pad = Np - x.shape[-1]
        return x if pad == 0 else jnp.pad(x, ((0, 0), (0, pad)))

    # Packed G-buffer: one sublane-aligned (16, Np) f32 array.
    gbuf = jnp.concatenate(
        [to_cn(normal).astype(jnp.float32),
         to_cn(albedo).astype(jnp.float32),
         to_cn(roughness).astype(jnp.float32),
         to_cn(points).astype(jnp.float32),
         jnp.zeros((6, N), jnp.float32)], axis=0)            # (16, N)
    gbuf = pad_n(gbuf)

    # Packed sample stream: h_dir + spec_lighting, channel-major, bf16 storage
    # (halves the dominant HBM stream; cast before transposing so the
    # transpose pass also moves half the bytes).
    samp = jnp.concatenate(
        [to_scn(h_dir.astype(jnp.bfloat16)),
         to_scn(spec_lighting.astype(jnp.bfloat16))], axis=0)  # (6S, N)
    if R_pad != R:
        samp = jnp.concatenate(
            [samp, jnp.zeros((R_pad - R, N), jnp.bfloat16)], axis=0)
    samp = pad_n(samp)

    campos = cam_position.reshape(3).astype(jnp.float32)

    gspec = pl.BlockSpec((16, tile_n), lambda i: (0, i))
    sspec = pl.BlockSpec((R_pad, tile_n), lambda i: (0, i))
    ospec = pl.BlockSpec((6, tile_n), lambda i: (0, i))
    const = lambda shape: pl.BlockSpec(shape, lambda i: (0, 0))

    out = pl.pallas_call(
        functools.partial(_render_kernel, S=S),
        out_shape=jax.ShapeDtypeStruct((6, Np), jnp.float32),
        grid_spec=pltpu.PrefetchScalarGridSpec(
            num_scalar_prefetch=0,
            grid=grid,
            in_specs=[gspec, sspec,
                      pl.BlockSpec(memory_space=pltpu.MemorySpace.SMEM),
                      const((H, 3)), const((H, 1)),
                      const((3, H)), const((3, 1))],
            out_specs=ospec,
        ),
        compiler_params=pltpu.CompilerParams(
            dimension_semantics=("parallel",),
            # Sized to need, not the full 64 MiB of a v7x TensorCore; can be
            # raised when sweeping tile_n on v5e/v6e (128 MiB physical VMEM).
            vmem_limit_bytes=48 * 1024 * 1024),
    )(gbuf, samp, campos,
      w1.astype(jnp.float32), b1.astype(jnp.float32),
      w2.astype(jnp.bfloat16), b2.astype(jnp.float32))

    rgb = jnp.transpose(out[0:3, :N], (1, 0)).reshape(face, hh, ww, 3)
    pos = jnp.transpose(out[3:6, :N], (1, 0)).reshape(face, hh, ww, 3)
    return {'rgb': rgb, 'albedo': albedo, 'normal': normal, 'position': pos}


if __name__ == "__main__":
    key = jax.random.PRNGKey(0)
    face, cube, S, H = 6, 16, 8, 32          # 6 cube faces, 16x16, 8 spec samples
    N = face * cube * cube                   # 1536 pixels (multiple of 128)

    keys = jax.random.split(key, 10)

    # G-buffers (PyTorch layout [6, h, w, C]).
    normal = jax.random.normal(keys[0], (face, cube, cube, 3), jnp.float32)
    normal = normal / jnp.linalg.norm(normal, axis=-1, keepdims=True)
    albedo = jax.random.uniform(keys[1], (face, cube, cube, 3), jnp.float32)
    roughness = jax.random.uniform(keys[2], (face, cube, cube, 1), jnp.float32)
    points = jax.random.normal(keys[3], (face, cube, cube, 3), jnp.float32)
    cam_position = jax.random.normal(keys[4], (3,), jnp.float32)

    # Half-vector samples on the normal hemisphere.
    # TODO(synk): generate_dir()'s GGX importance sampling not reproduced;
    # deterministic uniform hemisphere directions used instead.
    d = jax.random.normal(keys[5], (face, cube, cube, S, 3), jnp.float32)
    d = d / jnp.linalg.norm(d, axis=-1, keepdims=True)
    sgn = jnp.sign(jnp.sum(d * normal[..., None, :], axis=-1, keepdims=True))
    h_dir = d * jnp.where(sgn == 0, 1.0, sgn)

    # Incoming radiance per specular sample.
    # TODO(synk): query_irf() requires an Open3D ray-casting scene + HDR
    # texture grid_sample; synthetic positive radiance is used instead.
    spec_lighting = jax.random.uniform(keys[6], (face, cube, cube, S, 3),
                                       jnp.float32)

    # Deterministic MatNetwork (irradiance MLP) parameters.
    w1 = 0.1 * jax.random.normal(keys[7], (H, 3), jnp.float32)
    b1 = jnp.zeros((H, 1), jnp.float32)
    w2 = 0.1 * jax.random.normal(keys[8], (3, H), jnp.float32)
    b2 = jnp.zeros((3, 1), jnp.float32)

    res = material_render(normal, albedo, roughness, points, cam_position,
                          h_dir, spec_lighting, w1, b1, w2, b2)
    jax.block_until_ready(res['rgb'])
    jax.block_until_ready(res['position'])
    assert res['rgb'].shape == (face, cube, cube, 3)
    assert res['position'].shape == (face, cube, cube, 3)
    assert bool(jnp.all(jnp.isfinite(res['rgb'])))
    assert bool(jnp.all(jnp.isfinite(res['position'])))
    print("KERNEL_OK")
</pallas_src>

<mosaic_0001>
module attributes {stable_mosaic.version = 11 : i64} {
  func.func @_render_kernel(%arg0: i32, %arg1: memref<16x1536xf32, #tpu.memory_space<vmem>>, %arg2: memref<48x1536xbf16, #tpu.memory_space<vmem>>, %arg3: memref<3xf32, #tpu.memory_space<smem>>, %arg4: memref<32x3xf32, #tpu.memory_space<vmem>>, %arg5: memref<32x1xf32, #tpu.memory_space<vmem>>, %arg6: memref<3x32xbf16, #tpu.memory_space<vmem>>, %arg7: memref<3x1xf32, #tpu.memory_space<vmem>>, %arg8: memref<6x1536xf32, #tpu.memory_space<vmem>>) attributes {dimension_semantics = [#tpu.dimension_semantics<parallel>], iteration_bounds = array<i64: 1>, scalar_prefetch = 0 : i64, scratch_operands = 0 : i64, tpu.core_type = #tpu.core_type<tc>, window_params = [{transform_indices = @transform_0, window_bounds = array<i64: 16, 1536>}, {transform_indices = @transform_1, window_bounds = array<i64: 48, 1536>}, {transform_indices = @transform_2, window_bounds = array<i64: 3>}, {pipeline_mode = #tpu.pipeline_mode<synchronous>, transform_indices = @transform_3, window_bounds = array<i64: 32, 3>}, {pipeline_mode = #tpu.pipeline_mode<synchronous>, transform_indices = @transform_4, window_bounds = array<i64: 32, 1>}, {pipeline_mode = #tpu.pipeline_mode<synchronous>, transform_indices = @transform_5, window_bounds = array<i64: 3, 32>}, {pipeline_mode = #tpu.pipeline_mode<synchronous>, transform_indices = @transform_6, window_bounds = array<i64: 3, 1>}, {transform_indices = @transform_7, window_bounds = array<i64: 6, 1536>}]} {
    %c0 = arith.constant 0 : index
    %c0_0 = arith.constant 0 : index
    %0 = vector.load %arg1[%c0, %c0_0] : memref<16x1536xf32, #tpu.memory_space<vmem>>, vector<1x1536xf32>
    %c1 = arith.constant 1 : index
    %c0_1 = arith.constant 0 : index
    %1 = vector.load %arg1[%c1, %c0_1] : memref<16x1536xf32, #tpu.memory_space<vmem>>, vector<1x1536xf32>
    %c2 = arith.constant 2 : index
    %c0_2 = arith.constant 0 : index
    %2 = vector.load %arg1[%c2, %c0_2] : memref<16x1536xf32, #tpu.memory_space<vmem>>, vector<1x1536xf32>
    %c3 = arith.constant 3 : index
    %c0_3 = arith.constant 0 : index
    %3 = vector.load %arg1[%c3, %c0_3] : memref<16x1536xf32, #tpu.memory_space<vmem>>, vector<1x1536xf32>
    %c4 = arith.constant 4 : index
    %c0_4 = arith.constant 0 : index
    %4 = vector.load %arg1[%c4, %c0_4] : memref<16x1536xf32, #tpu.memory_space<vmem>>, vector<1x1536xf32>
    %c5 = arith.constant 5 : index
    %c0_5 = arith.constant 0 : index
    %5 = vector.load %arg1[%c5, %c0_5] : memref<16x1536xf32, #tpu.memory_space<vmem>>, vector<1x1536xf32>
    %c6 = arith.constant 6 : index
    %c0_6 = arith.constant 0 : index
    %6 = vector.load %arg1[%c6, %c0_6] : memref<16x1536xf32, #tpu.memory_space<vmem>>, vector<1x1536xf32>
    %c7 = arith.constant 7 : index
    %c0_7 = arith.constant 0 : index
    %7 = vector.load %arg1[%c7, %c0_7] : memref<16x1536xf32, #tpu.memory_space<vmem>>, vector<1x1536xf32>
    %c8 = arith.constant 8 : index
    %c0_8 = arith.constant 0 : index
    %8 = vector.load %arg1[%c8, %c0_8] : memref<16x1536xf32, #tpu.memory_space<vmem>>, vector<1x1536xf32>
    %c9 = arith.constant 9 : index
    %c0_9 = arith.constant 0 : index
    %9 = vector.load %arg1[%c9, %c0_9] : memref<16x1536xf32, #tpu.memory_space<vmem>>, vector<1x1536xf32>
    %c0_10 = arith.constant 0 : index
    %c0_11 = arith.constant 0 : index
    %10 = vector.load %arg2[%c0_10, %c0_11] : memref<48x1536xbf16, #tpu.memory_space<vmem>>, vector<8x1536xbf16>
    %11 = arith.extf %10 : vector<8x1536xbf16> to vector<8x1536xf32>
    %c8_12 = arith.constant 8 : index
    %c0_13 = arith.constant 0 : index
    %12 = vector.load %arg2[%c8_12, %c0_13] : memref<48x1536xbf16, #tpu.memory_space<vmem>>, vector<8x1536xbf16>
    %13 = arith.extf %12 : vector<8x1536xbf16> to vector<8x1536xf32>
    %c16 = arith.constant 16 : index
    %c0_14 = arith.constant 0 : index
    %14 = vector.load %arg2[%c16, %c0_14] : memref<48x1536xbf16, #tpu.memory_space<vmem>>, vector<8x1536xbf16>
    %15 = arith.extf %14 : vector<8x1536xbf16> to vector<8x1536xf32>
    %c0_15 = arith.constant 0 : index
    %16 = memref.load %arg3[%c0_15] : memref<3xf32, #tpu.memory_space<smem>>
    %17 = vector.broadcast %16 : f32 to vector<1x1536xf32>
    %18 = arith.subf %17, %7 : vector<1x1536xf32>
    %c1_16 = arith.constant 1 : index
    %19 = memref.load %arg3[%c1_16] : memref<3xf32, #tpu.memory_space<smem>>
    %20 = vector.broadcast %19 : f32 to vector<1x1536xf32>
    %21 = arith.subf %20, %8 : vector<1x1536xf32>
    %c2_17 = arith.constant 2 : index
    %22 = memref.load %arg3[%c2_17] : memref<3xf32, #tpu.memory_space<smem>>
    %23 = vector.broadcast %22 : f32 to vector<1x1536xf32>
    %24 = arith.subf %23, %9 : vector<1x1536xf32>
    %25 = arith.mulf %18, %18 : vector<1x1536xf32>
    %26 = arith.mulf %21, %21 : vector<1x1536xf32>
    %27 = arith.addf %25, %26 : vector<1x1536xf32>
    %28 = arith.mulf %24, %24 : vector<1x1536xf32>
    %29 = arith.addf %27, %28 : vector<1x1536xf32>
    %cst = arith.constant 9.99999993E-9 : f32
    %30 = vector.broadcast %cst : f32 to vector<1x1536xf32>
    %31 = arith.maximumf %29, %30 : vector<1x1536xf32>
    %32 = math.rsqrt %31 : vector<1x1536xf32>
    %33 = arith.mulf %18, %32 : vector<1x1536xf32>
    %34 = arith.mulf %21, %32 : vector<1x1536xf32>
    %35 = arith.mulf %24, %32 : vector<1x1536xf32>
    %c0_18 = arith.constant 0 : index
    %c0_19 = arith.constant 0 : index
    %36 = vector.load %arg4[%c0_18, %c0_19] : memref<32x3xf32, #tpu.memory_space<vmem>>, vector<32x1xf32>
    %37 = vector.broadcast %36 : vector<32x1xf32> to vector<32x1536xf32>
    %38 = vector.broadcast %7 : vector<1x1536xf32> to vector<32x1536xf32>
    %39 = arith.mulf %37, %38 : vector<32x1536xf32>
    %c0_20 = arith.constant 0 : index
    %c1_21 = arith.constant 1 : index
    %40 = vector.load %arg4[%c0_20, %c1_21] : memref<32x3xf32, #tpu.memory_space<vmem>>, vector<32x1xf32>
    %41 = vector.broadcast %40 : vector<32x1xf32> to vector<32x1536xf32>
    %42 = vector.broadcast %8 : vector<1x1536xf32> to vector<32x1536xf32>
    %43 = arith.mulf %41, %42 : vector<32x1536xf32>
    %44 = arith.addf %39, %43 : vector<32x1536xf32>
    %c0_22 = arith.constant 0 : index
    %c2_23 = arith.constant 2 : index
    %45 = vector.load %arg4[%c0_22, %c2_23] : memref<32x3xf32, #tpu.memory_space<vmem>>, vector<32x1xf32>
    %46 = vector.broadcast %45 : vector<32x1xf32> to vector<32x1536xf32>
    %47 = vector.broadcast %9 : vector<1x1536xf32> to vector<32x1536xf32>
    %48 = arith.mulf %46, %47 : vector<32x1536xf32>
    %49 = arith.addf %44, %48 : vector<32x1536xf32>
    %c0_24 = arith.constant 0 : index
    %c0_25 = arith.constant 0 : index
    %50 = vector.load %arg5[%c0_24, %c0_25] : memref<32x1xf32, #tpu.memory_space<vmem>>, vector<32x1xf32>
    %51 = vector.broadcast %50 : vector<32x1xf32> to vector<32x1536xf32>
    %52 = arith.addf %49, %51 : vector<32x1536xf32>
    %cst_26 = arith.constant 0.000000e+00 : f32
    %53 = vector.broadcast %cst_26 : f32 to vector<32x1536xf32>
    %54 = arith.maximumf %52, %53 : vector<32x1536xf32>
    %c0_27 = arith.constant 0 : index
    %c0_28 = arith.constant 0 : index
    %55 = vector.load %arg6[%c0_27, %c0_28] : memref<3x32xbf16, #tpu.memory_space<vmem>>, vector<3x32xbf16>
    %56 = arith.truncf %54 : vector<32x1536xf32> to vector<32x1536xbf16>
    %cst_29 = arith.constant dense<0.000000e+00> : vector<3x1536xf32>
    %57 = tpu.matmul %55, %56, %cst_29 {dimension_numbers = #tpu.dot_dimension_numbers<[1], [0], [0], [1], [0, 0, 1, 1], [], []>} : vector<3x32xbf16>, vector<32x1536xbf16>, vector<3x1536xf32> -> vector<3x1536xf32>
    %c0_30 = arith.constant 0 : index
    %c0_31 = arith.constant 0 : index
    %58 = vector.load %arg7[%c0_30, %c0_31] : memref<3x1xf32, #tpu.memory_space<vmem>>, vector<3x1xf32>
    %59 = vector.broadcast %58 : vector<3x1xf32> to vector<3x1536xf32>
    %60 = arith.addf %57, %59 : vector<3x1536xf32>
    %61 = math.exp %60 : vector<3x1536xf32>
    %cst_32 = arith.constant 1.000000e+00 : f32
    %62 = vector.broadcast %cst_32 : f32 to vector<3x1536xf32>
    %63 = arith.subf %61, %62 : vector<3x1536xf32>
    %64 = vector.broadcast %33 : vector<1x1536xf32> to vector<8x1536xf32>
    %65 = arith.mulf %11, %64 : vector<8x1536xf32>
    %66 = vector.broadcast %34 : vector<1x1536xf32> to vector<8x1536xf32>
    %67 = arith.mulf %13, %66 : vector<8x1536xf32>
    %68 = arith.addf %65, %67 : vector<8x1536xf32>
    %69 = vector.broadcast %35 : vector<1x1536xf32> to vector<8x1536xf32>
    %70 = arith.mulf %15, %69 : vector<8x1536xf32>
    %71 = arith.addf %68, %70 : vector<8x1536xf32>
    %cst_33 = arith.constant 0.000000e+00 : f32
    %cst_34 = arith.constant 1.000000e+00 : f32
    %72 = vector.broadcast %cst_33 : f32 to vector<8x1536xf32>
    %73 = arith.maximumf %72, %71 : vector<8x1536xf32>
    %74 = vector.broadcast %cst_34 : f32 to vector<8x1536xf32>
    %75 = arith.minimumf %74, %73 : vector<8x1536xf32>
    %cst_35 = arith.constant 2.000000e+00 : f32
    %76 = vector.broadcast %cst_35 : f32 to vector<8x1536xf32>
    %77 = arith.mulf %76, %75 : vector<8x1536xf32>
    %78 = arith.mulf %77, %11 : vector<8x1536xf32>
    %79 = vector.broadcast %33 : vector<1x1536xf32> to vector<8x1536xf32>
    %80 = arith.subf %78, %79 : vector<8x1536xf32>
    %cst_36 = arith.constant 2.000000e+00 : f32
    %81 = vector.broadcast %cst_36 : f32 to vector<8x1536xf32>
    %82 = arith.mulf %81, %75 : vector<8x1536xf32>
    %83 = arith.mulf %82, %13 : vector<8x1536xf32>
    %84 = vector.broadcast %34 : vector<1x1536xf32> to vector<8x1536xf32>
    %85 = arith.subf %83, %84 : vector<8x1536xf32>
    %cst_37 = arith.constant 2.000000e+00 : f32
    %86 = vector.broadcast %cst_37 : f32 to vector<8x1536xf32>
    %87 = arith.mulf %86, %75 : vector<8x1536xf32>
    %88 = arith.mulf %87, %15 : vector<8x1536xf32>
    %89 = vector.broadcast %35 : vector<1x1536xf32> to vector<8x1536xf32>
    %90 = arith.subf %88, %89 : vector<8x1536xf32>
    %91 = vector.broadcast %0 : vector<1x1536xf32> to vector<8x1536xf32>
    %92 = arith.mulf %91, %80 : vector<8x1536xf32>
    %93 = vector.broadcast %1 : vector<1x1536xf32> to vector<8x1536xf32>
    %94 = arith.mulf %93, %85 : vector<8x1536xf32>
    %95 = arith.addf %92, %94 : vector<8x1536xf32>
    %96 = vector.broadcast %2 : vector<1x1536xf32> to vector<8x1536xf32>
    %97 = arith.mulf %96, %90 : vector<8x1536xf32>
    %98 = arith.addf %95, %97 : vector<8x1536xf32>
    %cst_38 = arith.constant 0.000000e+00 : f32
    %cst_39 = arith.constant 1.000000e+00 : f32
    %99 = vector.broadcast %cst_38 : f32 to vector<8x1536xf32>
    %100 = arith.maximumf %99, %98 : vector<8x1536xf32>
    %101 = vector.broadcast %cst_39 : f32 to vector<8x1536xf32>
    %102 = arith.minimumf %101, %100 : vector<8x1536xf32>
    %103 = vector.broadcast %0 : vector<1x1536xf32> to vector<8x1536xf32>
    %104 = arith.mulf %103, %11 : vector<8x1536xf32>
    %105 = vector.broadcast %1 : vector<1x1536xf32> to vector<8x1536xf32>
    %106 = arith.mulf %105, %13 : vector<8x1536xf32>
    %107 = arith.addf %104, %106 : vector<8x1536xf32>
    %108 = vector.broadcast %2 : vector<1x1536xf32> to vector<8x1536xf32>
    %109 = arith.mulf %108, %15 : vector<8x1536xf32>
    %110 = arith.addf %107, %109 : vector<8x1536xf32>
    %cst_40 = arith.constant 0.000000e+00 : f32
    %cst_41 = arith.constant 1.000000e+00 : f32
    %111 = vector.broadcast %cst_40 : f32 to vector<8x1536xf32>
    %112 = arith.maximumf %111, %110 : vector<8x1536xf32>
    %113 = vector.broadcast %cst_41 : f32 to vector<8x1536xf32>
    %114 = arith.minimumf %113, %112 : vector<8x1536xf32>
    %115 = arith.mulf %0, %33 : vector<1x1536xf32>
    %116 = arith.mulf %1, %34 : vector<1x1536xf32>
    %117 = arith.addf %115, %116 : vector<1x1536xf32>
    %118 = arith.mulf %2, %35 : vector<1x1536xf32>
    %119 = arith.addf %117, %118 : vector<1x1536xf32>
    %cst_42 = arith.constant 0.000000e+00 : f32
    %cst_43 = arith.constant 1.000000e+00 : f32
    %120 = vector.broadcast %cst_42 : f32 to vector<1x1536xf32>
    %121 = arith.maximumf %120, %119 : vector<1x1536xf32>
    %122 = vector.broadcast %cst_43 : f32 to vector<1x1536xf32>
    %123 = arith.minimumf %122, %121 : vector<1x1536xf32>
    %cst_44 = arith.constant -5.554720e+00 : f32
    %124 = vector.broadcast %cst_44 : f32 to vector<8x1536xf32>
    %125 = arith.mulf %124, %75 : vector<8x1536xf32>
    %cst_45 = arith.constant 6.983160e+00 : f32
    %126 = vector.broadcast %cst_45 : f32 to vector<8x1536xf32>
    %127 = arith.subf %125, %126 : vector<8x1536xf32>
    %128 = arith.mulf %127, %75 : vector<8x1536xf32>
    %129 = math.exp2 %128 : vector<8x1536xf32>
    %cst_46 = arith.constant 0.959999978 : f32
    %130 = vector.broadcast %cst_46 : f32 to vector<8x1536xf32>
    %131 = arith.mulf %130, %129 : vector<8x1536xf32>
    %cst_47 = arith.constant 4.000000e-02 : f32
    %132 = vector.broadcast %cst_47 : f32 to vector<8x1536xf32>
    %133 = arith.addf %132, %131 : vector<8x1536xf32>
    %cst_48 = arith.constant 1.000000e+00 : f32
    %134 = vector.broadcast %cst_48 : f32 to vector<1x1536xf32>
    %135 = arith.addf %6, %134 : vector<1x1536xf32>
    %cst_49 = arith.constant 1.000000e+00 : f32
    %136 = vector.broadcast %cst_49 : f32 to vector<1x1536xf32>
    %137 = arith.addf %6, %136 : vector<1x1536xf32>
    %138 = arith.mulf %135, %137 : vector<1x1536xf32>
    %cst_50 = arith.constant 1.250000e-01 : f32
    %139 = vector.broadcast %cst_50 : f32 to vector<1x1536xf32>
    %140 = arith.mulf %138, %139 : vector<1x1536xf32>
    %cst_51 = arith.constant 1.000000e+00 : f32
    %141 = vector.broadcast %cst_51 : f32 to vector<1x1536xf32>
    %142 = arith.subf %141, %140 : vector<1x1536xf32>
    %143 = vector.broadcast %142 : vector<1x1536xf32> to vector<8x1536xf32>
    %144 = arith.mulf %102, %143 : vector<8x1536xf32>
    %145 = vector.broadcast %140 : vector<1x1536xf32> to vector<8x1536xf32>
    %146 = arith.addf %144, %145 : vector<8x1536xf32>
    %147 = arith.mulf %123, %142 : vector<1x1536xf32>
    %148 = arith.addf %147, %140 : vector<1x1536xf32>
    %149 = vector.broadcast %148 : vector<1x1536xf32> to vector<8x1536xf32>
    %150 = arith.mulf %146, %149 : vector<8x1536xf32>
    %cst_52 = arith.constant 9.99999997E-7 : f32
    %151 = vector.broadcast %cst_52 : f32 to vector<8x1536xf32>
    %152 = arith.maximumf %114, %151 : vector<8x1536xf32>
    %153 = arith.mulf %150, %152 : vector<8x1536xf32>
    %cst_53 = arith.constant 8.000000e+00 : f32
    %154 = vector.broadcast %cst_53 : f32 to vector<8x1536xf32>
    %155 = arith.mulf %153, %154 : vector<8x1536xf32>
    %156 = arith.mulf %133, %102 : vector<8x1536xf32>
    %157 = arith.mulf %156, %75 : vector<8x1536xf32>
    %cst_54 = arith.constant 9.99999997E-7 : f32
    %158 = vector.broadcast %cst_54 : f32 to vector<8x1536xf32>
    %159 = arith.maximumf %155, %158 : vector<8x1536xf32>
    %160 = tpu.reciprocal %159 {approx = true} : vector<8x1536xf32> -> vector<8x1536xf32>
    %161 = arith.mulf %157, %160 : vector<8x1536xf32>
    %c24 = arith.constant 24 : index
    %c0_55 = arith.constant 0 : index
    %162 = vector.load %arg2[%c24, %c0_55] : memref<48x1536xbf16, #tpu.memory_space<vmem>>, vector<8x1536xbf16>
    %163 = arith.extf %162 : vector<8x1536xbf16> to vector<8x1536xf32>
    %164 = vector.extract_strided_slice %63 {offsets = [0, 0], sizes = [1, 1536], strides = [1, 1]} : vector<3x1536xf32> to vector<1x1536xf32>
    %165 = arith.mulf %164, %3 : vector<1x1536xf32>
    %cst_56 = arith.constant 0.318309873 : f32
    %166 = vector.broadcast %cst_56 : f32 to vector<1x1536xf32>
    %167 = arith.mulf %165, %166 : vector<1x1536xf32>
    %168 = arith.mulf %163, %161 : vector<8x1536xf32>
    %cst_57 = arith.constant dense<0.000000e+00> : vector<1536xf32>
    %169 = vector.multi_reduction <add>, %168, %cst_57 [0] : vector<8x1536xf32> to vector<1536xf32>
    %170 = vector.shape_cast %169 : vector<1536xf32> to vector<1x1536xf32>
    %171 = arith.addf %167, %170 : vector<1x1536xf32>
    %c0_58 = arith.constant 0 : index
    %c0_59 = arith.constant 0 : index
    %172 = vector.load %arg8[%c0_58, %c0_59] : memref<6x1536xf32, #tpu.memory_space<vmem>>, vector<1x1536xf32>
    tpu.vector_store %arg8[%c0_58, %c0_59], %171 {strides = array<i32>} : memref<6x1536xf32, #tpu.memory_space<vmem>>, vector<1x1536xf32>,
    %c32 = arith.constant 32 : index
    %c0_60 = arith.constant 0 : index
    %173 = vector.load %arg2[%c32, %c0_60] : memref<48x1536xbf16, #tpu.memory_space<vmem>>, vector<8x1536xbf16>
    %174 = arith.extf %173 : vector<8x1536xbf16> to vector<8x1536xf32>
    %175 = vector.extract_strided_slice %63 {offsets = [1, 0], sizes = [1, 1536], strides = [1, 1]} : vector<3x1536xf32> to vector<1x1536xf32>
    %176 = arith.mulf %175, %4 : vector<1x1536xf32>
    %cst_61 = arith.constant 0.318309873 : f32
    %177 = vector.broadcast %cst_61 : f32 to vector<1x1536xf32>
    %178 = arith.mulf %176, %177 : vector<1x1536xf32>
    %179 = arith.mulf %174, %161 : vector<8x1536xf32>
    %cst_62 = arith.constant dense<0.000000e+00> : vector<1536xf32>
    %180 = vector.multi_reduction <add>, %179, %cst_62 [0] : vector<8x1536xf32> to vector<1536xf32>
    %181 = vector.shape_cast %180 : vector<1536xf32> to vector<1x1536xf32>
    %182 = arith.addf %178, %181 : vector<1x1536xf32>
    %c1_63 = arith.constant 1 : index
    %c0_64 = arith.constant 0 : index
    %183 = vector.load %arg8[%c1_63, %c0_64] : memref<6x1536xf32, #tpu.memory_space<vmem>>, vector<1x1536xf32>
    tpu.vector_store %arg8[%c1_63, %c0_64], %182 {strides = array<i32>} : memref<6x1536xf32, #tpu.memory_space<vmem>>, vector<1x1536xf32>,
    %c40 = arith.constant 40 : index
    %c0_65 = arith.constant 0 : index
    %184 = vector.load %arg2[%c40, %c0_65] : memref<48x1536xbf16, #tpu.memory_space<vmem>>, vector<8x1536xbf16>
    %185 = arith.extf %184 : vector<8x1536xbf16> to vector<8x1536xf32>
    %186 = vector.extract_strided_slice %63 {offsets = [2, 0], sizes = [1, 1536], strides = [1, 1]} : vector<3x1536xf32> to vector<1x1536xf32>
    %187 = arith.mulf %186, %5 : vector<1x1536xf32>
    %cst_66 = arith.constant 0.318309873 : f32
    %188 = vector.broadcast %cst_66 : f32 to vector<1x1536xf32>
    %189 = arith.mulf %187, %188 : vector<1x1536xf32>
    %190 = arith.mulf %185, %161 : vector<8x1536xf32>
    %cst_67 = arith.constant dense<0.000000e+00> : vector<1536xf32>
    %191 = vector.multi_reduction <add>, %190, %cst_67 [0] : vector<8x1536xf32> to vector<1536xf32>
    %192 = vector.shape_cast %191 : vector<1536xf32> to vector<1x1536xf32>
    %193 = arith.addf %189, %192 : vector<1x1536xf32>
    %c2_68 = arith.constant 2 : index
    %c0_69 = arith.constant 0 : index
    %194 = vector.load %arg8[%c2_68, %c0_69] : memref<6x1536xf32, #tpu.memory_space<vmem>>, vector<1x1536xf32>
    tpu.vector_store %arg8[%c2_68, %c0_69], %193 {strides = array<i32>} : memref<6x1536xf32, #tpu.memory_space<vmem>>, vector<1x1536xf32>,
    %cst_70 = arith.constant 2.000000e-02 : f32
    %195 = vector.broadcast %cst_70 : f32 to vector<1x1536xf32>
    %196 = arith.mulf %195, %0 : vector<1x1536xf32>
    %197 = arith.addf %7, %196 : vector<1x1536xf32>
    %c3_71 = arith.constant 3 : index
    %c0_72 = arith.constant 0 : index
    %198 = vector.load %arg8[%c3_71, %c0_72] : memref<6x1536xf32, #tpu.memory_space<vmem>>, vector<1x1536xf32>
    tpu.vector_store %arg8[%c3_71, %c0_72], %197 {strides = array<i32>} : memref<6x1536xf32, #tpu.memory_space<vmem>>, vector<1x1536xf32>,
    %cst_73 = arith.constant 2.000000e-02 : f32
    %199 = vector.broadcast %cst_73 : f32 to vector<1x1536xf32>
    %200 = arith.mulf %199, %1 : vector<1x1536xf32>
    %201 = arith.addf %8, %200 : vector<1x1536xf32>
    %c4_74 = arith.constant 4 : index
    %c0_75 = arith.constant 0 : index
    %202 = vector.load %arg8[%c4_74, %c0_75] : memref<6x1536xf32, #tpu.memory_space<vmem>>, vector<1x1536xf32>
    tpu.vector_store %arg8[%c4_74, %c0_75], %201 {strides = array<i32>} : memref<6x1536xf32, #tpu.memory_space<vmem>>, vector<1x1536xf32>,
    %cst_76 = arith.constant 2.000000e-02 : f32
    %203 = vector.broadcast %cst_76 : f32 to vector<1x1536xf32>
    %204 = arith.mulf %203, %2 : vector<1x1536xf32>
    %205 = arith.addf %9, %204 : vector<1x1536xf32>
    %c5_77 = arith.constant 5 : index
    %c0_78 = arith.constant 0 : index
    %206 = vector.load %arg8[%c5_77, %c0_78] : memref<6x1536xf32, #tpu.memory_space<vmem>>, vector<1x1536xf32>
    tpu.vector_store %arg8[%c5_77, %c0_78], %205 {strides = array<i32>} : memref<6x1536xf32, #tpu.memory_space<vmem>>, vector<1x1536xf32>,
    return
  }
  func.func @transform_0(%arg0: i32) -> (i32, i32) {
    %c0_i32 = arith.constant 0 : i32
    %c0_i32_0 = arith.constant 0 : i32
    return %c0_i32, %arg0 : i32, i32
  }
  func.func @transform_1(%arg0: i32) -> (i32, i32) {
    %c0_i32 = arith.constant 0 : i32
    %c0_i32_0 = arith.constant 0 : i32
    return %c0_i32, %arg0 : i32, i32
  }
  func.func @transform_2(%arg0: i32) -> i32 {
    %c0_i32 = arith.constant 0 : i32
    %c0_i32_0 = arith.constant 0 : i32
    return %c0_i32 : i32
  }
  func.func @transform_3(%arg0: i32) -> (i32, i32) {
    %c0_i32 = arith.constant 0 : i32
    %c0_i32_0 = arith.constant 0 : i32
    %c0_i32_1 = arith.constant 0 : i32
    return %c0_i32, %c0_i32_0 : i32, i32
  }
  func.func @transform_4(%arg0: i32) -> (i32, i32) {
    %c0_i32 = arith.constant 0 : i32
    %c0_i32_0 = arith.constant 0 : i32
    %c0_i32_1 = arith.constant 0 : i32
    return %c0_i32, %c0_i32_0 : i32, i32
  }
  func.func @transform_5(%arg0: i32) -> (i32, i32) {
    %c0_i32 = arith.constant 0 : i32
    %c0_i32_0 = arith.constant 0 : i32
    %c0_i32_1 = arith.constant 0 : i32
    return %c0_i32, %c0_i32_0 : i32, i32
  }
  func.func @transform_6(%arg0: i32) -> (i32, i32) {
    %c0_i32 = arith.constant 0 : i32
    %c0_i32_0 = arith.constant 0 : i32
    %c0_i32_1 = arith.constant 0 : i32
    return %c0_i32, %c0_i32_0 : i32, i32
  }
  func.func @transform_7(%arg0: i32) -> (i32, i32) {
    %c0_i32 = arith.constant 0 : i32
    %c0_i32_0 = arith.constant 0 : i32
    return %c0_i32, %arg0 : i32, i32
  }
}

</mosaic_0001>

<bundles_post_ra>
// kernel: tpu_custom_call.1
= control target key start
LH: loop header
LB: loop body
LE: loop exit
PB: predicated region body
PF: predicated region fallthrough
CT: control target
= control target key end

     0   :  { %12 = vsyncpa [#allocation3], 0  ;;  %s4371_s0 = inlined_call_operand.hbm [shape: f32[16,1536], index: 0, kind: input, shape index: {}]   ;;  %s4372_s1 = inlined_call_operand.hbm [shape: bf16[48,1536], index: 1, kind: input, shape index: {}]   ;;  %s4373_s2 = inlined_call_operand.vmem [shape: f32[3], index: 2, kind: input, shape index: {}]   ;;  %s4374_s3 = inlined_call_operand.vmem [shape: f32[32,3], index: 3, kind: input, shape index: {}]   ;;  %s4375_s4 = inlined_call_operand.vmem [shape: f32[32,1], index: 4, kind: input, shape index: {}]   ;;  %s4376_s5 = inlined_call_operand.vmem [shape: bf16[3,32], index: 5, kind: input, shape index: {}]   ;;  %s4377_s6 = inlined_call_operand.vmem [shape: f32[3,1], index: 6, kind: input, shape index: {}]   ;;  %s4378_s7 = inlined_call_operand.hbm [shape: f32[6,1536], index: 7, kind: output, shape index: {}]  }
   0x1   :  { %13 = vsyncpa [#allocation7], 0 }
   0x2   :  { %14 = vsyncpa [#allocation5], 0 }
   0x3   :  { %15 = vsyncpa [#allocation4], 0  ;;  %s20_s26 = sshll.u32 %s4371_s0, 4  ;;  %s2648_s27 = smov [#allocation2]   ;;  %s21_s26 = int_to_ptr.hbm [resolvable:$true] %s20_s26 }
   0x4   :  { %s22_s28 = sshll.u32 %s2648_s27, 4  ;;  %s33_s8 = sshll.u32 %s4372_s1, 4  ;;  %s23_s28 = int_to_ptr.vmem [resolvable:$true] %s22_s28  ;;  %s34_s8 = int_to_ptr.hbm [resolvable:$true] %s33_s8 }
   0x5   :  { %s2649_s9 = smov 1536   ;;  %s2650_s10 = smov 96  }
   0x6   :  { %28 = dma.hbm_to_vmem [thread:$0]  %s21_s26, 3072, %s23_s28, [#allocation3], %s2649_s9, %s2649_s9, %s2650_s10  }
   0x7   :  { %s2651_s11 = smov [#allocation6]   ;;  %s2652_s13 = smov 768  }
   0x8   :  { %s35_s12 = sshll.u32 %s2651_s11, 4  ;;  %s2653_s14 = smov 48   ;;  %s36_s12 = int_to_ptr.vmem [resolvable:$true] %s35_s12 }
   0x9   :  { %41 = dma.hbm_to_vmem [thread:$0]  %s34_s8, 4608, %s36_s12, [#allocation7], %s2652_s13, %s2652_s13, %s2653_s14  }
   0xa   :  { %s47_s16 = sshll.u32 %s4373_s2, 4  ;;  %s2654_s17 = smov [#allocation8]   ;;  %s48_s16 = int_to_ptr.vmem [resolvable:$true] %s47_s16 }
   0xb   :  { %50 = dma.vmem_to_smem %s48_s16, 16, %s2654_s17, [#allocation5]  }
   0xc   :  { %2640 = dma.done.wait [#allocation3], 3072  }
   0xd   :  { %2641 = vsyncadd [#allocation3], 4294964224 }
   0xe   :  { %2642 = dma.done.wait [#allocation7], 4608  }
   0xf   :  { %2643 = vsyncadd [#allocation7], 4294962688 }
  0x10   :  { %2644 = dma.done.wait [#allocation5], 16  }
  0x11   :  { %2645 = vsyncadd [#allocation5], 4294967280 }
  0x12   :  { %71 = sfence }
  0x13   :  { %v238_v0 = vld [vmem:[%s4374_s3 + $0x10] sm:$0xff]  ;;  %v237_v1 = vld [vmem:[%s4374_s3 + $0x8] sm:$0xff]  ;;  %v2655_v2 = vmov 1   ;;  %v2656_v3 = vmov 2   ;;  %v239_v4 = vld [vmem:[%s4374_s3 + $0x18] sm:$0xff]  ;;  %v2657_v5 = vmov 0  }
  0x14   :  { %2471 = vset.pattern.permute.xlu0 %v2655_v2  ;;  %2467 = vset.pattern.permute.xlu1 %v2655_v2  ;;  %v236_v6 = vld [vmem:[%s4374_s3] sm:$0xff]  ;;  %v612_v8 = vld [vmem:[%s4375_s4 + $0x10] sm:$0xff]  ;;  %v613_v9 = vld [vmem:[%s4375_s4 + $0x18] sm:$0xff]  ;;  %vm761_vm0 = vcmask 261120   ;;  %s3225_s10 = sld [smem:[#allocation8 + $0x2]]  ;;  %vm1943_vm7 = vcmask 1040384  }
  0x15   :  { %343 = vperm.xlu1 %2467, %v238_v0   ;;  %339 = vperm.xlu0 %2471, %v237_v1   ;;  %v610_v7 = vld [vmem:[%s4375_s4] sm:$0xff]  ;;  %v611_v10 = vld [vmem:[%s4375_s4 + $0x8] sm:$0xff]  ;;  %s3207_s4 = sld [smem:[#allocation8]]  ;;  %vm1945_vm8 = vcmask 1042434   ;;  %vm1947_vm9 = vcmask 1041408   ;;  %vm1949_vm10 = vcmask 1044484  }
  0x16   :  { %2468 = vset.pattern.permute.xlu2 %v2656_v3  ;;  %v755_v11 = vld [vmem:[%s4377_s6] sm:$0x7]  ;;  %v115_v18 = vld [vmem:[#allocation2 + $0x7] ss:$8 sm:$0xf]  ;;  %s3217_s6 = sld [smem:[#allocation8 + $0x1]] }
  0x17   :  { %481 = vperm.xlu2 %2468, %v238_v0   ;;  %v121_v13 = vld [vmem:[#allocation2 + $0x60] ss:$8 sm:$0xf]  ;;  %v127_v16 = vld [vmem:[#allocation2 + $0x61] ss:$8 sm:$0xf] }
  0x18   :  { %v122_v14 = vld [vmem:[#allocation2 + $0x60] ss:$8 sm:$0xf0]  ;;  %v128_v17 = vld [vmem:[#allocation2 + $0x61] ss:$8 sm:$0xf0] }
  0x19   :  { %v116_v19 = vld [vmem:[#allocation2 + $0x7] ss:$8 sm:$0xf0]  ;;  %v2739_v20 = vor.u32 %v122_v14, %v121_v13  ;;  %v2741_v21 = vor.u32 %v128_v17, %v127_v16  ;;  %vm1951_vm11 = vcmask 1046534   ;;  %vm1953_vm12 = vcmask 1045508   ;;  %s2406_s0 = sshll.u32 %s4378_s7, 4  ;;  %s2407_s0 = int_to_ptr.hbm [resolvable:$true] %s2406_s0 }
  0x1a   :  { %v2743_v22 = vor.u32 %v116_v19, %v115_v18  ;;  %vm1955_vm13 = vcmask 1043456  }
  0x1b   :  { %4431 = vst [vmem:[#allocation16_spill] sm:$0xff] %v2739_v20  ;;  %v2746_v23 = vperm.slane %v2739_v20, 0  ;;  %v2749_v24 = vperm.slane %v2741_v21, 0  ;;  %v2752_v25 = vperm.slane %v2739_v20, 1  ;;  %v2755_v26 = vperm.slane %v2739_v20, 2 }
  0x1c   :  { %4432 = vst [vmem:[#allocation17_spill] sm:$0xff] %v2741_v21  ;;  %v2758_v27 = vperm.slane %v2739_v20, 3  ;;  %v2761_v28 = vperm.slane %v2741_v21, 1  ;;  %v2764_v29 = vperm.slane %v2741_v21, 2  ;;  %v2767_v30 = vperm.slane %v2741_v21, 3 }
  0x1d   :  { %347 = vperm.xlu1 %2467, %v239_v4   ;;  %2472 = vset.pattern.permute.xlu0 %v2657_v5  ;;  %4433 = vst [vmem:[#allocation18_spill] sm:$0xff] %v2743_v22  ;;  %v2770_v31 = vperm.slane %v2739_v20, 4  ;;  %v2773_v32 = vperm.slane %v2743_v22, 0  ;;  %v2776_v33 = vperm.slane %v2741_v21, 4  ;;  %v2779_v34 = vperm.slane %v2741_v21, 5 }
  0x1e   :  { %252 = vperm.xlu0 %2472, %v238_v0   ;;  %4434 = vst [vmem:[#allocation19_spill] sm:$0xff] %v2749_v24  ;;  %v2782_v35 = vperm.slane %v2741_v21, 6  ;;  %v2787_v37 = vperm.slane %v2743_v22, 1  ;;  %v2790_v38 = vperm.slane %v2743_v22, 2  ;;  %v2793_v39 = vperm.slane %v2739_v20, 5 }
  0x1f   :  { %485 = vperm.xlu2 %2468, %v239_v4   ;;  %4435 = vst [vmem:[#allocation20_spill] sm:$0xff] %v2761_v28  ;;  %v2796_v40 = vperm.slane %v2741_v21, 7  ;;  %v2803_v42 = vperm.slane %v2743_v22, 3  ;;  %v2806_v43 = vperm.slane %v2743_v22, 4  ;;  %v2809_v44 = vperm.slane %v2739_v20, 6 }
  0x20   :  { %4436 = vst [vmem:[#allocation21_spill] sm:$0xff] %v2764_v29  ;;  %v2824_v48 = vperm.slane %v2739_v20, 7  ;;  %v2835_v52 = vperm.slane %v2743_v22, 5  ;;  %v2854_v57 = vperm.slane %v2743_v22, 6 }
  0x21   :  { %4437 = vst [vmem:[#allocation22_spill] sm:$0xff] %v2767_v30 }
  0x22   :  { %4438 = vst [vmem:[#allocation23_spill] sm:$0xff] %v2782_v35 }
  0x23   :  { %4439 = vst [vmem:[#allocation24_spill] sm:$0xff] %v2796_v40 }
  0x24   :  { %4440 = vst [vmem:[#allocation25_spill] sm:$0xff] %v2806_v43 }
  0x25   :  { %2469 = vset.pattern.permute.xlu1 %v2657_v5  ;;  %4441 = vst [vmem:[#allocation26_spill] sm:$0xff] %v2809_v44 }
  0x26   :  { %257 = vperm.xlu0 %2472, %v239_v4   ;;  %247 = vperm.xlu1 %2469, %v237_v1  }
  0x27   :  { %2470 = vset.pattern.permute.xlu2 %v2655_v2 }
  0x28   :  { %335 = vperm.xlu2 %2470, %v236_v6  }
  0x2e   :  { %2473 = vset.pattern.permute.xlu1 %v2656_v3  ;;  %242 = vperm.xlu0 %2472, %v236_v6  }
  0x2f   :  { %473 = vperm.xlu1 %2473, %v236_v6  }
  0x30   :  { %2474 = vset.pattern.permute.xlu2 %v2656_v3 }
  0x31   :  { %477 = vperm.xlu2 %2474, %v237_v1   ;;  %v2885_v1 = vperm.slane %v2743_v22, 7 }
  0x36   :  { %616 = vperm.xlu0 %2472, %v610_v7  }
  0x37   :  { %2475 = vset.pattern.permute.xlu1 %v2657_v5 }
  0x38   :  { %626 = vperm.xlu1 %2475, %v612_v8  }
  0x39   :  { %2476 = vset.pattern.permute.xlu2 %v2657_v5 }
  0x3a   :  { %631 = vperm.xlu2 %2476, %v613_v9  }
  0x40   :  { %621 = vperm.xlu1 %2475, %v611_v10  }
  0x42   :  { %758 = vperm.xlu2 %2476, %v755_v11  }
  0x71   :  { %v2735_v12 = vpop.permute.xlu2 %481 }
  0x72   :  { %4429 = vst [vmem:[#allocation14_spill] sm:$0xff] %v2735_v12  ;;  %v2800_v41 = vmul.f32 %v2749_v24, %v2735_v12  ;;  %v2813_v45 = vmul.f32 %v2761_v28, %v2735_v12  ;;  %v2817_v46 = vmul.f32 %v2764_v29, %v2735_v12  ;;  %v2821_v47 = vmul.f32 %v2767_v30, %v2735_v12 }
  0x73   :  { %v2832_v51 = vmul.f32 %v2776_v33, %v2735_v12  ;;  %v2839_v53 = vmul.f32 %v2779_v34, %v2735_v12  ;;  %v2843_v54 = vmul.f32 %v2782_v35, %v2735_v12  ;;  %v2858_v58 = vmul.f32 %v2796_v40, %v2735_v12 }
  0x75   :  { %4444 = vst [vmem:[#allocation29_spill] sm:$0xff] %v2858_v58 }
  0x79   :  { %v2737_v15 = vpop.permute.xlu2 %485 }
  0x7a   :  { %4430 = vst [vmem:[#allocation15_spill] sm:$0xff] %v2737_v15  ;;  %v2847_v55 = vmul.f32 %v2749_v24, %v2737_v15  ;;  %v2851_v56 = vmul.f32 %v2761_v28, %v2737_v15  ;;  %v2862_v59 = vmul.f32 %v2764_v29, %v2737_v15  ;;  %v2866_v60 = vmul.f32 %v2767_v30, %v2737_v15 }
  0x7b   :  { %v2870_v61 = vmul.f32 %v2776_v33, %v2737_v15  ;;  %v2874_v62 = vmul.f32 %v2779_v34, %v2737_v15  ;;  %v2882_v0 = vmul.f32 %v2782_v35, %v2737_v15  ;;  %v2889_v2 = vmul.f32 %v2796_v40, %v2737_v15 }
  0x7d   :  { %4445 = vst [vmem:[#allocation30_spill] sm:$0xff] %v2870_v61 }
  0x7e   :  { %4446 = vst [vmem:[#allocation31_spill] sm:$0xff] %v2874_v62 }
  0x7f   :  { %4448 = vst [vmem:[#allocation33_spill] sm:$0xff] %v2882_v0 }
  0x80   :  { %4449 = vst [vmem:[#allocation34_spill] sm:$0xff] %v2889_v2 }
  0x82   :  { %v2784_v36 = vpop.permute.xlu2 %335 }
  0x83   :  { %v2878_v63 = vmul.f32 %v2746_v23, %v2784_v36  ;;  %v2895_v4 = vmul.f32 %v2752_v25, %v2784_v36  ;;  %v2899_v5 = vmul.f32 %v2755_v26, %v2784_v36  ;;  %v2903_v6 = vmul.f32 %v2758_v27, %v2784_v36 }
  0x85   :  { %4447 = vst [vmem:[#allocation32_spill] sm:$0xff] %v2878_v63 }
  0x86   :  { %4450 = vst [vmem:[#allocation35_spill] sm:$0xff] %v2895_v4 }
  0x87   :  { %v2826_v49 = vpop.permute.xlu1 %343  ;;  %v2828_v50 = vpop.permute.xlu0 %339  ;;  %4451 = vst [vmem:[#allocation36_spill] sm:$0xff] %v2899_v5 }
  0x88   :  { %4442 = vst [vmem:[#allocation27_spill] sm:$0xff] %v2826_v49  ;;  %v400_v3 = vmul.f32 %v2746_v23, %v2826_v49  ;;  %v401_v7 = vmul.f32 %v2752_v25, %v2826_v49  ;;  %v402_v8 = vmul.f32 %v2755_v26, %v2826_v49  ;;  %v403_v9 = vmul.f32 %v2758_v27, %v2826_v49 }
  0x89   :  { %4443 = vst [vmem:[#allocation28_spill] sm:$0xff] %v2828_v50  ;;  %v2913_v10 = vmul.f32 %v2746_v23, %v2828_v50  ;;  %v2917_v11 = vmul.f32 %v2752_v25, %v2828_v50  ;;  %v2921_v13 = vmul.f32 %v2755_v26, %v2828_v50  ;;  %v2925_v14 = vmul.f32 %v2758_v27, %v2828_v50 }
  0x8a   :  { %4452 = vst [vmem:[#allocation37_spill] sm:$0xff] %v2903_v6  ;;  %v404_v16 = vmul.f32 %v2770_v31, %v2826_v49  ;;  %v405_v18 = vmul.f32 %v2793_v39, %v2826_v49  ;;  %v406_v19 = vmul.f32 %v2809_v44, %v2826_v49  ;;  %v407_v21 = vmul.f32 %v2824_v48, %v2826_v49 }
  0x8b   :  { %v2929_v17 = vpop.permute.xlu2 %477  ;;  %v2939_v20 = vmul.f32 %v2770_v31, %v2828_v50  ;;  %v2969_v0 = vmul.f32 %v2793_v39, %v2828_v50 }
  0x8c   :  { %4453 = vst [vmem:[#allocation38_spill] sm:$0xff] %v2929_v17  ;;  %v2945_v15 = vmul.f32 %v2749_v24, %v2929_v17  ;;  %v2949_v12 = vmul.f32 %v2761_v28, %v2929_v17  ;;  %v2953_v40 = vmul.f32 %v2764_v29, %v2929_v17  ;;  %v2957_v49 = vmul.f32 %v2767_v30, %v2929_v17 }
  0x8d   :  { %4454 = vst [vmem:[#allocation39_spill] sm:$0xff] %v2939_v20 }
  0x8e   :  { %4456 = vst [vmem:[#allocation41_spill] sm:$0xff] %v2957_v49 }
  0x8f   :  { %v2941_v22 = vpop.permute.xlu1 %347  ;;  %4458 = vst [vmem:[#allocation43_spill] sm:$0xff] %v2969_v0 }
  0x90   :  { %4455 = vst [vmem:[#allocation40_spill] sm:$0xff] %v2941_v22  ;;  %v2959_v35 = vpop.permute.xlu0 %252  ;;  %v412_v20 = vmul.f32 %v2746_v23, %v2941_v22  ;;  %v413_v2 = vmul.f32 %v2752_v25, %v2941_v22  ;;  %v414_v58 = vmul.f32 %v2755_v26, %v2941_v22  ;;  %v415_v25 = vmul.f32 %v2758_v27, %v2941_v22 }
  0x91   :  { %4457 = vst [vmem:[#allocation42_spill] sm:$0xff] %v2959_v35  ;;  %v310_v62 = vmul.f32 %v2773_v32, %v2959_v35  ;;  %v311_v61 = vmul.f32 %v2787_v37, %v2959_v35  ;;  %v312_v6 = vmul.f32 %v2790_v38, %v2959_v35  ;;  %v313_v23 = vmul.f32 %v2803_v42, %v2959_v35 }
  0x92   :  { %v314_v26 = vmul.f32 %v2806_v43, %v2959_v35  ;;  %v2985_v0 = vmul.f32 %v2770_v31, %v2941_v22  ;;  %v315_v5 = vmul.f32 %v2835_v52, %v2959_v35  ;;  %v2991_v24 = vmul.f32 %v2793_v39, %v2941_v22 }
  0x93   :  { %v448_v4 = vadd.f32 %v400_v3, %v310_v62  ;;  %v449_v63 = vadd.f32 %v401_v7, %v311_v61  ;;  %v450_v30 = vadd.f32 %v402_v8, %v312_v6  ;;  %v451_v29 = vadd.f32 %v403_v9, %v313_v23 }
  0x94   :  { %4459 = vst [vmem:[#allocation44_spill] sm:$0xff] %v2985_v0  ;;  %v452_v28 = vadd.f32 %v404_v16, %v314_v26  ;;  %v453_v27 = vadd.f32 %v405_v18, %v315_v5  ;;  %v316_v43 = vmul.f32 %v2854_v57, %v2959_v35  ;;  %v3006_v61 = vmul.f32 %v2809_v44, %v2941_v22 }
  0x95   :  { %v2996_v49 = vadd.f32 %v2800_v41, %v448_v4  ;;  %v2999_v0 = vadd.f32 %v2813_v45, %v449_v63  ;;  %v3002_v62 = vadd.f32 %v2817_v46, %v450_v30  ;;  %v3009_v3 = vadd.f32 %v2821_v47, %v451_v29 }
  0x96   :  { %v3012_v5 = vadd.f32 %v2832_v51, %v452_v28  ;;  %v454_v6 = vadd.f32 %v406_v19, %v316_v43  ;;  %v317_v41 = vmul.f32 %v2885_v1, %v2959_v35  ;;  %v3017_v45 = vadd.f32 %v2839_v53, %v453_v27  ;;  %v3064_v27 = vpop.permute.xlu2 %631 }
  0x97   :  { %v3021_v30 = vmul.f32 %v2824_v48, %v2941_v22  ;;  %v3025_v46 = vmul.f32 %v2770_v31, %v2784_v36  ;;  %v3029_v29 = vmul.f32 %v2776_v33, %v2929_v17  ;;  %v3042_v53 = vmul.f32 %v2779_v34, %v2929_v17 }
  0x98   :  { %v3031_v28 = vpop.permute.xlu0 %257  ;;  %v3033_v43 = vpop.permute.xlu1 %247  ;;  %v3036_v47 = vadd.f32 %v2843_v54, %v454_v6  ;;  %v3038_v51 = vadd.f32 %v407_v21, %v317_v41  ;;  %v3046_v31 = vmul.f32 %v2809_v44, %v2828_v50 }
  0x99   :  { %4460 = vst [vmem:[#allocation45_spill] sm:$0xff] %v3031_v28  ;;  %v322_v63 = vmul.f32 %v2773_v32, %v3031_v28  ;;  %v323_v4 = vmul.f32 %v2787_v37, %v3031_v28  ;;  %v324_v54 = vmul.f32 %v2790_v38, %v3031_v28  ;;  %v325_v21 = vmul.f32 %v2803_v42, %v3031_v28 }
  0x9a   :  { %4461 = vst [vmem:[#allocation46_spill] sm:$0xff] %v3046_v31  ;;  %v298_v7 = vmul.f32 %v2773_v32, %v3033_v43  ;;  %v299_v8 = vmul.f32 %v2787_v37, %v3033_v43  ;;  %v300_v9 = vmul.f32 %v2790_v38, %v3033_v43  ;;  %v301_v16 = vmul.f32 %v2803_v42, %v3033_v43 }
  0x9b   :  { %v460_v18 = vadd.f32 %v412_v20, %v322_v63  ;;  %v461_v19 = vadd.f32 %v413_v2, %v323_v4  ;;  %v462_v23 = vadd.f32 %v414_v58, %v324_v54  ;;  %v463_v26 = vadd.f32 %v415_v25, %v325_v21  ;;  %v4465_v54 = vld [vmem:[#allocation19_spill] sm:$0xff] }
  0x9c   :  { %v436_v6 = vadd.f32 %v2913_v10, %v298_v7  ;;  %v437_v41 = vadd.f32 %v2917_v11, %v299_v8  ;;  %v438_v22 = vadd.f32 %v2921_v13, %v300_v9  ;;  %v439_v35 = vadd.f32 %v2925_v14, %v301_v16  ;;  %v4466_v8 = vld [vmem:[#allocation20_spill] sm:$0xff] }
  0x9d   :  { %v598_v17 = vadd.f32 %v2847_v55, %v460_v18  ;;  %v599_v31 = vadd.f32 %v2851_v56, %v461_v19  ;;  %v600_v44 = vadd.f32 %v2862_v59, %v462_v23  ;;  %v601_v20 = vadd.f32 %v2866_v60, %v463_v26  ;;  %v4467_v18 = vld [vmem:[#allocation21_spill] sm:$0xff] }
  0x9e   :  { %v3075_v58 = vadd.f32 %v2945_v15, %v436_v6  ;;  %v3078_v2 = vadd.f32 %v2949_v12, %v437_v41  ;;  %v3081_v10 = vadd.f32 %v2953_v40, %v438_v22  ;;  %v3085_v11 = vmul.f32 %v2824_v48, %v2828_v50  ;;  %v4463_v15 = vld [vmem:[#allocation41_spill] sm:$0xff]  ;;  %v4469_v6 = vld [vmem:[#allocation32_spill] sm:$0xff] }
  0x9f   :  { %v3088_v55 = vadd.f32 %v3064_v27, %v598_v17  ;;  %v3091_v56 = vadd.f32 %v3064_v27, %v599_v31  ;;  %v3094_v59 = vadd.f32 %v3064_v27, %v600_v44  ;;  %v3097_v60 = vadd.f32 %v4463_v15, %v439_v35  ;;  %v4464_v40 = vld [vmem:[#allocation25_spill] sm:$0xff]  ;;  %v4472_v15 = vld [vmem:[#allocation36_spill] sm:$0xff] }
  0xa0   :  { %4462 = vst [vmem:[#allocation47_spill] sm:$0xff] %v3085_v11  ;;  %v3099_v12 = vpop.permute.xlu0 %242  ;;  %v3102_v22 = vadd.f32 %v3064_v27, %v601_v20  ;;  %v326_v13 = vmul.f32 %v4464_v40, %v3031_v28  ;;  %v327_v14 = vmul.f32 %v2835_v52, %v3031_v28  ;;  %v328_v17 = vmul.f32 %v2854_v57, %v3031_v28  ;;  %v4470_v20 = vld [vmem:[#allocation35_spill] sm:$0xff] }
  0xa1   :  { %v3110_v25 = vpop.permute.xlu1 %473  ;;  %v718_v44 = vmax.f32 %v3088_v55, 0.0  ;;  %v719_v35 = vmax.f32 %v3091_v56, 0.0  ;;  %v720_v31 = vmax.f32 %v3094_v59, 0.0  ;;  %v329_v63 = vmul.f32 %v2885_v1, %v3031_v28 }
  0xa2   :  { %v286_v4 = vmul.f32 %v2773_v32, %v3099_v12  ;;  %v514_v21 = vmul.f32 %v4465_v54, %v3110_v25  ;;  %v287_v7 = vmul.f32 %v2787_v37, %v3099_v12  ;;  %v515_v9 = vmul.f32 %v4466_v8, %v3110_v25  ;;  %v4468_v32 = vld [vmem:[#allocation22_spill] sm:$0xff]  ;;  %v4471_v37 = vld [vmem:[#allocation44_spill] sm:$0xff] }
  0xa3   :  { %v288_v16 = vmul.f32 %v2790_v38, %v3099_v12  ;;  %v516_v19 = vmul.f32 %v4467_v18, %v3110_v25  ;;  %v289_v23 = vmul.f32 %v2803_v42, %v3099_v12  ;;  %v517_v26 = vmul.f32 %v4468_v32, %v3110_v25  ;;  %v4473_v38 = vld [vmem:[#allocation37_spill] sm:$0xff]  ;;  %v4474_v32 = vld [vmem:[#allocation30_spill] sm:$0xff] }
  0xa4   :  { %v424_v41 = vadd.f32 %v4469_v6, %v286_v4  ;;  %v425_v55 = vadd.f32 %v4470_v20, %v287_v7  ;;  %v464_v56 = vadd.f32 %v4471_v37, %v326_v13  ;;  %v465_v59 = vadd.f32 %v2991_v24, %v327_v14  ;;  %v4475_v4 = vld [vmem:[#allocation31_spill] sm:$0xff]  ;;  %v4476_v37 = vld [vmem:[#allocation33_spill] sm:$0xff] }
  0xa5   :  { %v426_v54 = vadd.f32 %v4472_v15, %v288_v16  ;;  %v427_v8 = vadd.f32 %v4473_v38, %v289_v23  ;;  %v466_v18 = vadd.f32 %v3006_v61, %v328_v17  ;;  %v467_v50 = vadd.f32 %v3021_v30, %v329_v63  ;;  %v4477_v30 = vld [vmem:[#allocation29_spill] sm:$0xff] }
  0xa6   :  { %v721_v42 = vmax.f32 %v3102_v22, 0.0  ;;  %v562_v28 = vadd.f32 %v514_v21, %v424_v41  ;;  %v602_v11 = vadd.f32 %v4474_v32, %v464_v56  ;;  %v603_v6 = vadd.f32 %v4475_v4, %v465_v59  ;;  %v4478_v22 = vld [vmem:[#allocation34_spill] sm:$0xff] }
  0xa7   :  { %v563_v7 = vadd.f32 %v515_v9, %v425_v55  ;;  %v564_v20 = vadd.f32 %v516_v19, %v426_v54  ;;  %v565_v13 = vadd.f32 %v517_v26, %v427_v8  ;;  %v604_v24 = vadd.f32 %v4476_v37, %v466_v18 }
  0xa8   :  { %v3145_v14 = vpop.permute.xlu0 %616  ;;  %v674_v16 = vadd.f32 %v3064_v27, %v602_v11  ;;  %v675_v61 = vadd.f32 %v3064_v27, %v603_v6  ;;  %v593_v17 = vadd.f32 %v4477_v30, %v3038_v51  ;;  %v605_v63 = vadd.f32 %v4478_v22, %v467_v50 }
  0xa9   :  { %v3153_v21 = vadd.f32 %v3145_v14, %v562_v28  ;;  %v3156_v9 = vadd.f32 %v3145_v14, %v563_v7  ;;  %v3159_v19 = vadd.f32 %v3145_v14, %v564_v20  ;;  %v3162_v23 = vadd.f32 %v3145_v14, %v565_v13 }
  0xaa   :  { %v3164_v11 = vpop.permute.xlu1 %626  ;;  %v722_v26 = vmax.f32 %v674_v16, 0.0  ;;  %v723_v41 = vmax.f32 %v675_v61, 0.0  ;;  %v676_v51 = vadd.f32 %v3064_v27, %v604_v24  ;;  %v677_v50 = vadd.f32 %v3064_v27, %v605_v63 }
  0xab   :  { %v658_v28 = vadd.f32 %v3164_v11, %v2996_v49  ;;  %v659_v55 = vadd.f32 %v3164_v11, %v2999_v0  ;;  %v660_v56 = vadd.f32 %v3164_v11, %v3002_v62  ;;  %v661_v59 = vadd.f32 %v3164_v11, %v3009_v3 }
  0xac   :  { %v682_v15 = vmax.f32 %v3153_v21, 0.0  ;;  %v683_v54 = vmax.f32 %v3156_v9, 0.0  ;;  %v684_v38 = vmax.f32 %v3159_v19, 0.0  ;;  %v685_v8 = vmax.f32 %v3162_v23, 0.0  ;;  %v4479_v23 = vld [vmem:[#allocation39_spill] sm:$0xff] }
  0xad   :  { %v706_v18 = vmax.f32 %v658_v28, 0.0  ;;  %v707_v32 = vmax.f32 %v659_v55, 0.0  ;;  %v708_v49 = vmax.f32 %v660_v56, 0.0  ;;  %v709_v4 = vmax.f32 %v661_v59, 0.0 }
  0xae   :  { %v662_v0 = vadd.f32 %v3164_v11, %v3012_v5  ;;  %v663_v62 = vadd.f32 %v3164_v11, %v3017_v45  ;;  %v664_v3 = vadd.f32 %v3164_v11, %v3036_v47  ;;  %v724_v6 = vmax.f32 %v676_v51, 0.0 }
  0xaf   :  { %v743_v7 = vpack.c.bf16 %v718_v44, %v706_v18  ;;  %v744_v20 = vpack.c.bf16 %v719_v35, %v707_v32  ;;  %v745_v13 = vpack.c.bf16 %v720_v31, %v708_v49  ;;  %v746_v37 = vpack.c.bf16 %v721_v42, %v709_v4 }
  0xb0   :  { %v710_v24 = vmax.f32 %v662_v0, 0.0  ;;  %v711_v16 = vmax.f32 %v663_v62, 0.0  ;;  %v712_v61 = vmax.f32 %v664_v3, 0.0  ;;  %v665_v30 = vadd.f32 %v3164_v11, %v593_v17  ;;  %v4480_v0 = vld [vmem:[#allocation43_spill] sm:$0xff] }
  0xb1   :  { %771 = vmatpush.bf16.msra.mxu0 %v743_v7  ;;  %784 = vmatpush.bf16.msra.mxu1 %v744_v20  ;;  %v725_v22 = vmax.f32 %v677_v50, 0.0  ;;  %v290_v5 = vmul.f32 %v4464_v40, %v3099_v12  ;;  %v302_v45 = vmul.f32 %v4464_v40, %v3033_v43  ;;  %v518_v47 = vmul.f32 %v2776_v33, %v3110_v25  ;;  %v4483_v20 = vld [vmem:[#allocation23_spill] sm:$0xff] }
  0xb2   :  { %797 = vmatpush.bf16.msra.mxu2 %v745_v13  ;;  %810 = vmatpush.bf16.msra.mxu3 %v746_v37  ;;  %v3193_v44 = vpop.permute.xlu1 %621  ;;  %v747_v35 = vpack.c.bf16 %v722_v26, %v710_v24  ;;  %v748_v31 = vpack.c.bf16 %v723_v41, %v711_v16  ;;  %v749_v42 = vpack.c.bf16 %v724_v6, %v712_v61  ;;  %v713_v17 = vmax.f32 %v665_v30, 0.0  ;;  %v4482_v6 = vld [vmem:[#allocation46_spill] sm:$0xff] }
  0xb3   :  { %v646_v63 = vadd.f32 %v3193_v44, %v3075_v58  ;;  %v647_v21 = vadd.f32 %v3193_v44, %v3078_v2  ;;  %v648_v40 = vadd.f32 %v3193_v44, %v3081_v10  ;;  %v649_v33 = vadd.f32 %v3193_v44, %v3097_v60  ;;  %v4484_v61 = vld [vmem:[#allocation38_spill] sm:$0xff] }
  0xb4   :  { %v750_v9 = vpack.c.bf16 %v725_v22, %v713_v17  ;;  %v428_v19 = vadd.f32 %v3025_v46, %v290_v5  ;;  %v440_v26 = vadd.f32 %v4479_v23, %v302_v45  ;;  %v291_v41 = vmul.f32 %v2835_v52, %v3099_v12 }
  0xb5   :  { %v694_v51 = vmax.f32 %v646_v63, 0.0  ;;  %v695_v50 = vmax.f32 %v647_v21, 0.0  ;;  %v696_v58 = vmax.f32 %v648_v40, 0.0  ;;  %v697_v28 = vmax.f32 %v649_v33, 0.0  ;;  %v4485_v63 = vld [vmem:[#allocation24_spill] sm:$0xff] }
  0xb6   :  { %v566_v2 = vadd.f32 %v518_v47, %v428_v19  ;;  %v578_v10 = vadd.f32 %v3029_v29, %v440_v26  ;;  %v303_v60 = vmul.f32 %v2835_v52, %v3033_v43  ;;  %v381_v46 = vmul.f32 %v2793_v39, %v2784_v36  ;;  %v3261_v33 = vld [vmem:[#allocation2 + $0x47] ss:$8 sm:$0xf] }
  0xb7   :  { %v731_v55 = vpack.c.bf16 %v694_v51, %v682_v15  ;;  %v732_v56 = vpack.c.bf16 %v695_v50, %v683_v54  ;;  %v733_v59 = vpack.c.bf16 %v696_v58, %v684_v38  ;;  %v734_v18 = vpack.c.bf16 %v697_v28, %v685_v8  ;;  %v3230_v15 = vld [vmem:[%s4376_s5] sm:$0x3]  ;;  %s2658_s5 = smov [#allocation9]  }
  0xb8   :  { %v638_v32 = vadd.f32 %v3145_v14, %v566_v2  ;;  %v650_v49 = vadd.f32 %v3193_v44, %v578_v10  ;;  %v429_v4 = vadd.f32 %v381_v46, %v291_v41  ;;  %v441_v62 = vadd.f32 %v4480_v0, %v303_v60  ;;  %v3267_v51 = vld [vmem:[#allocation2 + $0xa0] ss:$8 sm:$0xf]  ;;  %v3275_v10 = vld [vmem:[#allocation2 + $0xa1] ss:$8 sm:$0xf] }
  0xb9   :  { %772 = vmatpush.bf16.msra.mxu0 %v731_v55  ;;  %785 = vmatpush.bf16.msra.mxu1 %v732_v56  ;;  %v519_v52 = vmul.f32 %v2779_v34, %v3110_v25  ;;  %v292_v39 = vmul.f32 %v2854_v57, %v3099_v12  ;;  %v304_v29 = vmul.f32 %v2854_v57, %v3033_v43  ;;  %v4481_v34 = vld [vmem:[#allocation26_spill] sm:$0xff]  ;;  %v187_v5 = vstv %s3207_s4  ;;  %s2404_s13 = sshll.u32 %s2658_s5, 4  ;;  %s2405_s13 = int_to_ptr.vmem [resolvable:$true] %s2404_s13 }
  0xba   :  { %798 = vmatpush.bf16.msra.mxu2 %v733_v59  ;;  %811 = vmatpush.bf16.msra.mxu3 %v734_v18  ;;  %v686_v54 = vmax.f32 %v638_v32, 0.0  ;;  %v698_v38 = vmax.f32 %v650_v49, 0.0  ;;  %v579_v8 = vadd.f32 %v3042_v53, %v441_v62  ;;  %v382_v3 = vmul.f32 %v4481_v34, %v2784_v36 }
  0xbb   :  { %v567_v57 = vadd.f32 %v519_v52, %v429_v4  ;;  %v442_v7 = vadd.f32 %v4482_v6, %v304_v29  ;;  %v520_v13 = vmul.f32 %v4483_v20, %v3110_v25  ;;  %v532_v30 = vmul.f32 %v4483_v20, %v4484_v61  ;;  %v4487_v29 = vld [vmem:[#allocation42_spill] sm:$0xff] }
  0xbc   :  { %v735_v37 = vpack.c.bf16 %v698_v38, %v686_v54  ;;  %v651_v24 = vadd.f32 %v3193_v44, %v579_v8  ;;  %v430_v16 = vadd.f32 %v382_v3, %v292_v39  ;;  %2420 = vmatmul.msk.bf16.vlgmr.msra.gmra.mxu0 %vm761_vm0, %v3230_v15  ;;  %2421 = vmatmul.msk.bf16.vlgmr.msra.gmra.mxu1 %vm761_vm0, %v3230_v15  ;;  %v191_v26 = vstv %s3217_s6  ;;  %v4488_v8 = vld [vmem:[#allocation45_spill] sm:$0xff] }
  0xbd   :  { %823 = vmatpush.bf16.msrb.mxu0 %v747_v35  ;;  %836 = vmatpush.bf16.msrb.mxu1 %v748_v31  ;;  %v639_v53 = vadd.f32 %v3145_v14, %v567_v57  ;;  %v293_v22 = vmul.f32 %v2885_v1, %v3099_v12  ;;  %v305_v35 = vmul.f32 %v2885_v1, %v3033_v43  ;;  %v4486_v1 = vld [vmem:[#allocation47_spill] sm:$0xff]  ;;  %v195_v58 = vstv %s3225_s10 }
  0xbe   :  { %849 = vmatpush.bf16.msrb.mxu2 %v749_v42  ;;  %862 = vmatpush.bf16.msrb.mxu3 %v750_v9  ;;  %v699_v45 = vmax.f32 %v651_v24, 0.0  ;;  %v568_v47 = vadd.f32 %v520_v13, %v430_v16  ;;  %v383_v31 = vmul.f32 %v2824_v48, %v2784_v36  ;;  %v580_v17 = vadd.f32 %v532_v30, %v442_v7  ;;  %v4490_v16 = vld [vmem:[#allocation40_spill] sm:$0xff]  ;;  %v4491_v30 = vld [vmem:[#allocation14_spill] sm:$0xff] }
  0xbf   :  { %2422 = vmatmul.msk.bf16.vlgmr.msra.gmra.mxu2 %vm761_vm0, %v3230_v15  ;;  %2423 = vmatmul.msk.bf16.vlgmr.msra.gmra.mxu3 %vm761_vm0, %v3230_v15  ;;  %v687_v42 = vmax.f32 %v639_v53, 0.0  ;;  %v521_v21 = vmul.f32 %v4485_v63, %v3110_v25  ;;  %v533_v40 = vmul.f32 %v4485_v63, %v4484_v61  ;;  %v443_v23 = vadd.f32 %v4486_v1, %v305_v35 }
  0xc0   :  { %v640_v9 = vadd.f32 %v3145_v14, %v568_v47  ;;  %v431_v19 = vadd.f32 %v383_v31, %v293_v22  ;;  %v652_v41 = vadd.f32 %v3193_v44, %v580_v17  ;;  %v3272_v50 = vsub.f32 %v187_v5, %v3261_v33  ;;  %v4492_v17 = vld [vmem:[#allocation15_spill] sm:$0xff] }
  0xc1   :  { %824 = vmatpush.bf16.msrb.mxu0 %v735_v37  ;;  %v736_v48 = vpack.c.bf16 %v699_v45, %v687_v42  ;;  %v581_v2 = vadd.f32 %v533_v40, %v443_v23  ;;  %v3280_v60 = vsub.f32 %v191_v26, %v3267_v51  ;;  %v3283_v46 = vperm.slane %v3261_v33, 0  ;;  %v4489_v37 = vld [vmem:[#allocation27_spill] sm:$0xff] }
  0xc2   :  { %v569_v28 = vadd.f32 %v521_v21, %v431_v19  ;;  %v688_v55 = vmax.f32 %v640_v9, 0.0  ;;  %v700_v56 = vmax.f32 %v652_v41, 0.0  ;;  %v3288_v59 = vsub.f32 %v195_v58, %v3275_v10 }
  0xc3   :  { %837 = vmatpush.bf16.msrb.mxu1 %v736_v48  ;;  %v653_v32 = vadd.f32 %v3193_v44, %v581_v2  ;;  %v199_v49 = vmul.f32 %v3272_v50, %v3272_v50  ;;  %v201_v0 = vmul.f32 %v3280_v60, %v3280_v60  ;;  %v318_v54 = vmul.f32 %v3283_v46, %v4487_v29 }
  0xc4   :  { %v641_v18 = vadd.f32 %v3145_v14, %v569_v28  ;;  %v737_v4 = vpack.c.bf16 %v700_v56, %v688_v55  ;;  %v205_v62 = vmul.f32 %v3288_v59, %v3288_v59  ;;  %v330_v34 = vmul.f32 %v3283_v46, %v4488_v8 }
  0xc5   :  { %v701_v39 = vmax.f32 %v653_v32, 0.0  ;;  %v203_v38 = vadd.f32 %v201_v0, %v199_v49  ;;  %v3303_v3 = vperm.slane %v3267_v51, 0  ;;  %v3306_v57 = vperm.slane %v3275_v10, 0 }
  0xc6   :  { %v689_v52 = vmax.f32 %v641_v18, 0.0  ;;  %850 = vmatpush.bf16.msrb.mxu2 %v737_v4  ;;  %v3309_v7 = vperm.slane %v3261_v33, 1  ;;  %v3312_v20 = vperm.slane %v3267_v51, 1  ;;  %v3331_v9 = vperm.slane %v3275_v10, 1 }
  0xc7   :  { %v207_v13 = vadd.f32 %v205_v62, %v203_v38  ;;  %v408_v24 = vmul.f32 %v3303_v3, %v4489_v37  ;;  %v420_v53 = vmul.f32 %v3303_v3, %v4490_v16  ;;  %v546_v22 = vmul.f32 %v3306_v57, %v4491_v30 }
  0xc8   :  { %v738_v6 = vpack.c.bf16 %v701_v39, %v689_v52  ;;  %v319_v45 = vmul.f32 %v3309_v7, %v4487_v29  ;;  %v331_v47 = vmul.f32 %v3309_v7, %v4488_v8  ;;  %v558_v63 = vmul.f32 %v3306_v57, %v4492_v17 }
  0xc9   :  { %v209_v35 = vmax.f32 %v207_v13, 1e-08  ;;  %v456_v31 = vadd.f32 %v408_v24, %v318_v54  ;;  %v468_v42 = vadd.f32 %v420_v53, %v330_v34  ;;  %v409_v21 = vmul.f32 %v3312_v20, %v4489_v37 }
  0xca   :  { %863 = vmatpush.bf16.msrb.mxu3 %v738_v6  ;;  %v421_v40 = vmul.f32 %v3312_v20, %v4490_v16  ;;  %v547_v41 = vmul.f32 %v3331_v9, %v4491_v30  ;;  %v559_v28 = vmul.f32 %v3331_v9, %v4492_v17  ;;  %v3346_v56 = vperm.slane %v3261_v33, 2 }
  0xcb   :  { %2477 = vrsqrt.f32 %v209_v35  ;;  %v594_v19 = vadd.f32 %v546_v22, %v456_v31  ;;  %v606_v1 = vadd.f32 %v558_v63, %v468_v42  ;;  %v457_v23 = vadd.f32 %v409_v21, %v319_v45 }
  0xcc   :  { %2424 = vmatmul.msk.bf16.vlgmr.msrb.gmra.mxu0 %vm761_vm0, %v3230_v15  ;;  %2425 = vmatmul.msk.bf16.vlgmr.msrb.gmra.mxu1 %vm761_vm0, %v3230_v15  ;;  %v469_v48 = vadd.f32 %v421_v40, %v331_v47  ;;  %v3349_v18 = vperm.slane %v3267_v51, 2  ;;  %v3354_v4 = vperm.slane %v3275_v10, 2  ;;  %v320_v52 = vmul.f32 %v3346_v56, %v4487_v29 }
  0xcd   :  { %v666_v2 = vadd.f32 %v3164_v11, %v594_v19  ;;  %v678_v55 = vadd.f32 %v3064_v27, %v606_v1  ;;  %v595_v32 = vadd.f32 %v547_v41, %v457_v23  ;;  %v332_v39 = vmul.f32 %v3346_v56, %v4488_v8 }
  0xce   :  { %v607_v49 = vadd.f32 %v559_v28, %v469_v48  ;;  %v410_v13 = vmul.f32 %v3349_v18, %v4489_v37  ;;  %v422_v24 = vmul.f32 %v3349_v18, %v4490_v16  ;;  %v3367_v53 = vperm.slane %v3261_v33, 3 }
  0xcf   :  { %2426 = vmatmul.msk.bf16.vlgmr.msrb.gmra.mxu2 %vm761_vm0, %v3230_v15  ;;  %2427 = vmatmul.msk.bf16.vlgmr.msrb.gmra.mxu3 %vm761_vm0, %v3230_v15  ;;  %v714_v0 = vmax.f32 %v666_v2, 0.0  ;;  %v726_v62 = vmax.f32 %v678_v55, 0.0  ;;  %v667_v54 = vadd.f32 %v3164_v11, %v595_v32  ;;  %v548_v63 = vmul.f32 %v3354_v4, %v4491_v30 }
  0xd0   :  { %v679_v38 = vadd.f32 %v3064_v27, %v607_v49  ;;  %v458_v31 = vadd.f32 %v410_v13, %v320_v52  ;;  %v470_v42 = vadd.f32 %v422_v24, %v332_v39  ;;  %v560_v21 = vmul.f32 %v3354_v4, %v4492_v17  ;;  %v4493_v24 = vld [vmem:[#allocation28_spill] sm:$0xff] }
  0xd1   :  { %v2478_v34 = vpop.eup %2477  ;;  %v751_v6 = vpack.c.bf16 %v726_v62, %v714_v0  ;;  %v715_v45 = vmax.f32 %v667_v54, 0.0  ;;  %vm226_vm1 = vweird.f32 %v209_v35  ;;  %v321_v33 = vmul.f32 %v3367_v53, %v4487_v29 }
  0xd2   :  { %v221_v22 = vmul.f32 %v2478_v34, %v209_v35  ;;  %v727_v47 = vmax.f32 %v679_v38, 0.0  ;;  %v596_v1 = vadd.f32 %v548_v63, %v458_v31  ;;  %v608_v23 = vadd.f32 %v560_v21, %v470_v42 }
  0xd3   :  { %875 = vmatpush.bf16.msra.mxu0 %v751_v6  ;;  %v3376_v48 = vperm.slane %v3267_v51, 3  ;;  %vm227_vm2 = vweird.f32 %v2478_v34  ;;  %v333_v28 = vmul.f32 %v3367_v53, %v4488_v8  ;;  %v3381_v2 = vperm.slane %v3275_v10, 3 }
  0xd4   :  { %v222_v40 = vmul.f32 %v2478_v34, %v221_v22  ;;  %v752_v19 = vpack.c.bf16 %v727_v47, %v715_v45  ;;  %v668_v55 = vadd.f32 %v3164_v11, %v596_v1  ;;  %v680_v32 = vadd.f32 %v3064_v27, %v608_v23  ;;  %vm228_vm3 = vmor %vm226_vm1, %vm227_vm2 }
  0xd5   :  { %v411_v49 = vmul.f32 %v3376_v48, %v4489_v37  ;;  %v423_v51 = vmul.f32 %v3376_v48, %v4490_v16  ;;  %v294_v10 = vmul.f32 %v3283_v46, %v3099_v12  ;;  %v549_v54 = vmul.f32 %v3381_v2, %v4491_v30 }
  0xd6   :  { %v223_v41 = vmul.f32 0.5, %v222_v40  ;;  %888 = vmatpush.bf16.msra.mxu1 %v752_v19  ;;  %v716_v0 = vmax.f32 %v668_v55, 0.0  ;;  %v728_v62 = vmax.f32 %v680_v32, 0.0  ;;  %v306_v37 = vmul.f32 %v3283_v46, %v3033_v43 }
  0xd7   :  { %v459_v52 = vadd.f32 %v411_v49, %v321_v33  ;;  %v471_v39 = vadd.f32 %v423_v51, %v333_v28  ;;  %v561_v16 = vmul.f32 %v3381_v2, %v4492_v17  ;;  %v384_v35 = vmul.f32 %v3303_v3, %v2784_v36 }
  0xd8   :  { %v224_v29 = vsub.f32 1.5, %v223_v41  ;;  %v753_v38 = vpack.c.bf16 %v728_v62, %v716_v0  ;;  %v396_v22 = vmul.f32 %v3303_v3, %v4493_v24  ;;  %v522_v45 = vmul.f32 %v3306_v57, %v3110_v25 }
  0xd9   :  { %v597_v13 = vadd.f32 %v549_v54, %v459_v52  ;;  %v609_v17 = vadd.f32 %v561_v16, %v471_v39  ;;  %v432_v31 = vadd.f32 %v384_v35, %v294_v10  ;;  %v534_v3 = vmul.f32 %v3306_v57, %v4484_v61 }
  0xda   :  { %v225_v8 = vmul.f32 %v2478_v34, %v224_v29  ;;  %901 = vmatpush.bf16.msra.mxu2 %v753_v38  ;;  %v444_v42 = vadd.f32 %v396_v22, %v306_v37  ;;  %v535_v57 = vmul.f32 %v3331_v9, %v4484_v61  ;;  %v296_v28 = vmul.f32 %v3346_v56, %v3099_v12 }
  0xdb   :  { %v681_v63 = vadd.f32 %v3064_v27, %v609_v17  ;;  %v570_v40 = vadd.f32 %v522_v45, %v432_v31  ;;  %v523_v27 = vmul.f32 %v3331_v9, %v3110_v25  ;;  %v386_v49 = vmul.f32 %v3349_v18, %v2784_v36 }
  0xdc   :  { %v229_v6 = vsel %vm228_vm3, %v2478_v34, %v225_v8  ;;  %v669_v34 = vadd.f32 %v3164_v11, %v597_v13  ;;  %v582_v19 = vadd.f32 %v534_v3, %v444_v42  ;;  %v397_v11 = vmul.f32 %v3312_v20, %v4493_v24 }
  0xdd   :  { %v3405_v30 = vmul.f32 %v229_v6, %v3272_v50  ;;  %v3408_v46 = vmul.f32 %v229_v6, %v3280_v60  ;;  %v3411_v47 = vmul.f32 %v229_v6, %v3288_v59  ;;  %v295_v50 = vmul.f32 %v3309_v7, %v3099_v12 }
  0xde   :  { %v307_v60 = vmul.f32 %v3309_v7, %v3033_v43  ;;  %v385_v59 = vmul.f32 %v3312_v20, %v2784_v36  ;;  %v717_v21 = vmax.f32 %v669_v34, 0.0  ;;  %v729_v1 = vmax.f32 %v681_v63, 0.0  ;;  %v4494_v34 = vld [vmem:[#allocation18_spill] sm:$0xff] }
  0xdf   :  { %v642_v33 = vadd.f32 %v3145_v14, %v570_v40  ;;  %v654_v7 = vadd.f32 %v3193_v44, %v582_v19  ;;  %v308_v20 = vmul.f32 %v3346_v56, %v3033_v43  ;;  %v398_v9 = vmul.f32 %v3349_v18, %v4493_v24 }
  0xe0   :  { %v433_v23 = vadd.f32 %v385_v59, %v295_v50  ;;  %v445_v41 = vadd.f32 %v397_v11, %v307_v60  ;;  %v754_v55 = vpack.c.bf16 %v729_v1, %v717_v21  ;;  %v434_v52 = vadd.f32 %v386_v49, %v296_v28  ;;  %v4496_v60 = vld [vmem:[#allocation17_spill] sm:$0xff]  ;;  %v3478_v49 = vld [vmem:[#allocation6] sm:$0xff] }
  0xe1   :  { %v690_v29 = vmax.f32 %v642_v33, 0.0  ;;  %v702_v51 = vmax.f32 %v654_v7, 0.0  ;;  %v524_v10 = vmul.f32 %v3354_v4, %v3110_v25  ;;  %v536_v8 = vmul.f32 %v3354_v4, %v4484_v61  ;;  %v73_v28 = vld [vmem:[#allocation2] ss:$8 sm:$0xf] }
  0xe2   :  { %v571_v32 = vadd.f32 %v523_v27, %v433_v23  ;;  %v583_v0 = vadd.f32 %v535_v57, %v445_v41  ;;  %914 = vmatpush.bf16.msra.mxu3 %v754_v55  ;;  %v446_v54 = vadd.f32 %v398_v9, %v308_v20  ;;  %v297_v37 = vmul.f32 %v3367_v53, %v3099_v12  ;;  %v74_v55 = vld [vmem:[#allocation2] ss:$8 sm:$0xf0]  ;;  %v80_v20 = vld [vmem:[#allocation2 + $0x1] ss:$8 sm:$0xf0] }
  0xe3   :  { %v739_v56 = vpack.c.bf16 %v702_v51, %v690_v29  ;;  %v572_v18 = vadd.f32 %v524_v10, %v434_v52  ;;  %v309_v16 = vmul.f32 %v3367_v53, %v3033_v43  ;;  %v387_v35 = vmul.f32 %v3376_v48, %v2784_v36  ;;  %v3482_v29 = vld [vmem:[#allocation6 + $0x60] sm:$0xff] }
  0xe4   :  { %v643_v62 = vadd.f32 %v3145_v14, %v571_v32  ;;  %v655_v39 = vadd.f32 %v3193_v44, %v583_v0  ;;  %v584_v4 = vadd.f32 %v536_v8, %v446_v54  ;;  %v399_v13 = vmul.f32 %v3376_v48, %v4493_v24  ;;  %v4495_v48 = vld [vmem:[#allocation16_spill] sm:$0xff] }
  0xe5   :  { %876 = vmatpush.bf16.msra.mxu0 %v739_v56  ;;  %v525_v22 = vmul.f32 %v3381_v2, %v3110_v25  ;;  %v644_v12 = vadd.f32 %v3145_v14, %v572_v18  ;;  %v435_v45 = vadd.f32 %v387_v35, %v297_v37  ;;  %v537_v43 = vmul.f32 %v3381_v2, %v4484_v61  ;;  %v79_v32 = vld [vmem:[#allocation2 + $0x1] ss:$8 sm:$0xf]  ;;  %v86_v52 = vld [vmem:[#allocation2 + $0x2] ss:$8 sm:$0xf0] }
  0xe6   :  { %v691_v38 = vmax.f32 %v643_v62, 0.0  ;;  %v703_v6 = vmax.f32 %v655_v39, 0.0  ;;  %v656_v17 = vadd.f32 %v3193_v44, %v584_v4  ;;  %v447_v36 = vadd.f32 %v399_v13, %v309_v16  ;;  %v85_v62 = vld [vmem:[#allocation2 + $0x2] ss:$8 sm:$0xf] }
  0xe7   :  { %v188_v31 = vsub.f32 %v187_v5, %v4494_v34  ;;  %v573_v42 = vadd.f32 %v525_v22, %v435_v45  ;;  %v192_v25 = vsub.f32 %v191_v26, %v4495_v48  ;;  %v692_v24 = vmax.f32 %v644_v12, 0.0  ;;  %v109_v56 = vld [vmem:[#allocation2 + $0x6] ss:$8 sm:$0xf] }
  0xe8   :  { %v740_v53 = vpack.c.bf16 %v703_v6, %v691_v38  ;;  %2428 = vmatmul.msk.bf16.vlgmr.msra.gmra.mxu0 %vm761_vm0, %v3230_v15  ;;  %v704_v3 = vmax.f32 %v656_v17, 0.0  ;;  %v585_v63 = vadd.f32 %v537_v43, %v447_v36  ;;  %v196_v59 = vsub.f32 %v195_v58, %v4496_v60  ;;  %v110_v39 = vld [vmem:[#allocation2 + $0x6] ss:$8 sm:$0xf0] }
  0xe9   :  { %v645_v61 = vadd.f32 %v3145_v14, %v573_v42  ;;  %v198_v5 = vmul.f32 %v188_v31, %v188_v31  ;;  %v200_v21 = vmul.f32 %v192_v25, %v192_v25  ;;  %v3490_v10 = vor.u32 %v74_v55, %v73_v28 }
  0xea   :  { %889 = vmatpush.bf16.msra.mxu1 %v740_v53  ;;  %v741_v2 = vpack.c.bf16 %v704_v3, %v692_v24  ;;  %v657_v50 = vadd.f32 %v3193_v44, %v585_v63  ;;  %v204_v14 = vmul.f32 %v196_v59, %v196_v59  ;;  %v3492_v8 = vor.u32 %v80_v20, %v79_v32 }
  0xeb   :  { %v693_v40 = vmax.f32 %v645_v61, 0.0  ;;  %v202_v11 = vadd.f32 %v200_v21, %v198_v5  ;;  %v138_v54 = vunpack.c.l.bf16 %v3478_v49  ;;  %v174_v38 = vunpack.c.l.bf16 %v3482_v29 }
  0xec   :  { %902 = vmatpush.bf16.msra.mxu2 %v741_v2  ;;  %v705_v26 = vmax.f32 %v657_v50, 0.0  ;;  %v3497_v18 = vor.u32 %v86_v52, %v85_v62  ;;  %v111_v16 = vor.u32 %v110_v39, %v109_v56  ;;  %v1243_v24 = vperm.slane %v3492_v8, 0  ;;  %v3521_v52 = vpop.permute.xlu2 %758 }
  0xed   :  { %2429 = vmatmul.msk.bf16.vlgmr.msra.gmra.mxu1 %vm761_vm0, %v3230_v15  ;;  %v206_v44 = vadd.f32 %v204_v14, %v202_v11 }
  0xee   :  { %v742_v19 = vpack.c.bf16 %v705_v26, %v693_v40  ;;  %4497 = vst [vmem:[#allocation41_spill] sm:$0xff] %v3497_v18  ;;  %v1293_v5 = vperm.slane %v3497_v18, 0 }
  0xef   :  { %2430 = vmatmul.msk.bf16.vlgmr.msra.gmra.mxu2 %vm761_vm0, %v3230_v15  ;;  %v208_v58 = vmax.f32 %v206_v44, 1e-08 }
  0xf0   :  { %915 = vmatpush.bf16.msra.mxu3 %v742_v19  ;;  %v1401_v14 = vmul.f32 %v1293_v5, %v174_v38 }
  0xf1   :  { %2479 = vrsqrt.f32 %v208_v58  ;;  %vm216_vm4 = vweird.f32 %v208_v58 }
  0xf3   :  { %2431 = vmatmul.msk.bf16.vlgmr.msra.gmra.mxu3 %vm761_vm0, %v3230_v15  ;;  %v3480_v15 = vld [vmem:[#allocation6 + $0x30] sm:$0xff] }
  0xf4   :  { %v156_v37 = vunpack.c.l.bf16 %v3480_v15 }
  0xf6   :  { %v1377_v50 = vmul.f32 %v1243_v24, %v156_v37 }
  0xf7   :  { %v2480_v1 = vpop.eup %2479 }
  0xf8   :  { %v211_v23 = vmul.f32 %v2480_v1, %v208_v58  ;;  %vm217_vm5 = vweird.f32 %v2480_v1 }
  0xf9   :  { %vm218_vm6 = vmor %vm216_vm4, %vm217_vm5 }
  0xfa   :  { %v212_v27 = vmul.f32 %v2480_v1, %v211_v23 }
  0xfc   :  { %v213_v57 = vmul.f32 0.5, %v212_v27 }
  0xfe   :  { %v214_v33 = vsub.f32 1.5, %v213_v57 }
 0x100   :  { %v215_v7 = vmul.f32 %v2480_v1, %v214_v33 }
 0x102   :  { %v219_v41 = vsel %vm218_vm6, %v2480_v1, %v215_v7 }
 0x103   :  { %v3484_v51 = vmul.f32 %v219_v41, %v188_v31  ;;  %v3486_v0 = vmul.f32 %v219_v41, %v192_v25  ;;  %v3488_v9 = vmul.f32 %v219_v41, %v196_v59  ;;  %v1535_v31 = vadd.f32 1.0, %v111_v16 }
 0x104   :  { %v1205_v25 = vperm.slane %v3490_v10, 0 }
 0x105   :  { %v959_v35 = vperm.slane %v3484_v51, 0  ;;  %v997_v6 = vperm.slane %v3486_v0, 0  ;;  %v1047_v4 = vperm.slane %v3488_v9, 0  ;;  %v1449_v13 = vmul.f32 %v3484_v51, %v3490_v10 }
 0x106   :  { %v1451_v22 = vmul.f32 %v3486_v0, %v3492_v8  ;;  %v1455_v17 = vmul.f32 %v3488_v9, %v3497_v18  ;;  %v1537_v63 = vmul.f32 %v1535_v31, %v1535_v31  ;;  %v1365_v2 = vmul.f32 %v1205_v25, %v138_v54 }
 0x107   :  { %v983_v12 = vmul.f32 %v959_v35, %v138_v54  ;;  %v1021_v45 = vmul.f32 %v997_v6, %v156_v37  ;;  %v1071_v43 = vmul.f32 %v1047_v4, %v174_v38 }
 0x108   :  { %v1453_v53 = vadd.f32 %v1451_v22, %v1449_v13  ;;  %v3513_v40 = vmul.f32 0.125, %v1537_v63  ;;  %v1389_v11 = vadd.f32 %v1377_v50, %v1365_v2  ;;  %v3532_v63 = vunpack.c.h.bf16 %v3478_v49 }
 0x109   :  { %v1033_v36 = vadd.f32 %v1021_v45, %v983_v12  ;;  %v960_v2 = vperm.slane %v3484_v51, 1 }
 0x10a   :  { %v1457_v3 = vadd.f32 %v1455_v17, %v1453_v53  ;;  %v3518_v57 = vsub.f32 1.0, %v3513_v40  ;;  %v1413_v55 = vadd.f32 %v1401_v14, %v1389_v11  ;;  %v98_v14 = vld [vmem:[#allocation2 + $0x4] ss:$8 sm:$0xf0] }
 0x10b   :  { %v1083_v42 = vadd.f32 %v1071_v43, %v1033_v36  ;;  %v1583_v43 = vperm.slane %v3513_v40, 0  ;;  %v984_v49 = vmul.f32 %v960_v2, %v3532_v63 }
 0x10c   :  { %v1459_v21 = vmax.f32 %v1457_v3, 0.0 }
 0x10d   :  { %v1095_v61 = vmax.f32 %v1083_v42, 0.0  ;;  %v91_v42 = vld [vmem:[#allocation2 + $0x3] ss:$8 sm:$0xf] }
 0x10e   :  { %v1461_v27 = vmin.f32 %v1459_v21, 1.0  ;;  %v97_v21 = vld [vmem:[#allocation2 + $0x4] ss:$8 sm:$0xf] }
 0x10f   :  { %v3510_v59 = vmin.f32 %v1095_v61, 1.0  ;;  %v3535_v61 = vunpack.c.h.bf16 %v3480_v15 }
 0x111   :  { %v1119_v26 = vmul.f32 2.0, %v3510_v59  ;;  %v1463_v19 = vmul.f32 -5.55472, %v3510_v59 }
 0x113   :  { %v1131_v44 = vmul.f32 %v1119_v26, %v138_v54  ;;  %v1155_v58 = vmul.f32 %v1119_v26, %v156_v37  ;;  %v1179_v1 = vmul.f32 %v1119_v26, %v174_v38  ;;  %v2444_v23 = vadd.f32 -6.98316, %v1463_v19 }
 0x114   :  { %v1619_v54 = vmul.f32 %v3518_v57, %v1461_v27  ;;  %v1425_v38 = vmax.f32 %v1413_v55, 0.0  ;;  %v175_v19 = vunpack.c.h.bf16 %v3482_v29 }
 0x115   :  { %v1143_v33 = vsub.f32 %v1131_v44, %v959_v35  ;;  %v1167_v7 = vsub.f32 %v1155_v58, %v997_v6  ;;  %v1191_v41 = vsub.f32 %v1179_v1, %v1047_v4  ;;  %v1487_v28 = vmul.f32 %v2444_v23, %v3510_v59  ;;  %v103_v1 = vld [vmem:[#allocation2 + $0x5] ss:$8 sm:$0xf] }
 0x116   :  { %v1545_v4 = vperm.slane %v3518_v57, 0  ;;  %v3527_v13 = vadd.f32 %v1619_v54, %v3513_v40  ;;  %v1437_v12 = vmin.f32 %v1425_v38, 1.0  ;;  %v1048_v58 = vperm.slane %v3488_v9, 1  ;;  %v104_v23 = vld [vmem:[#allocation2 + $0x5] ss:$8 sm:$0xf0] }
 0x117   :  { %v1229_v32 = vmul.f32 %v1205_v25, %v1143_v33  ;;  %v1267_v20 = vmul.f32 %v1243_v24, %v1167_v7  ;;  %v1317_v62 = vmul.f32 %v1293_v5, %v1191_v41  ;;  %2481 = vpow2.f32 %v1487_v28  ;;  %v92_v24 = vld [vmem:[#allocation2 + $0x3] ss:$8 sm:$0xf0] }
 0x118   :  { %v1625_v36 = vperm.slane %v3527_v13, 0  ;;  %v1661_v25 = vmax.f32 %v1437_v12, 1e-06  ;;  %v998_v5 = vperm.slane %v3486_v0, 1  ;;  %v3540_v11 = vor.u32 %v92_v24, %v91_v42  ;;  %v3573_v42 = vld [vmem:[#allocation6 + $0x68] sm:$0xff] }
 0x119   :  { %v1279_v39 = vadd.f32 %v1267_v20, %v1229_v32  ;;  %v1072_v41 = vmul.f32 %v1048_v58, %v175_v19  ;;  %v3549_v28 = vor.u32 %v98_v14, %v97_v21  ;;  %v3551_v32 = vld [vmem:[#allocation6 + $0x90] sm:$0xff]  ;;  %v1206_v20 = vperm.slane %v3490_v10, 1 }
 0x11a   :  { %v1022_v15 = vmul.f32 %v998_v5, %v3535_v61  ;;  %v1244_v54 = vperm.slane %v3492_v8, 1 }
 0x11b   :  { %v1329_v16 = vadd.f32 %v1317_v62, %v1279_v39  ;;  %v3554_v62 = vor.u32 %v104_v23, %v103_v1 }
 0x11c   :  { %v1034_v29 = vadd.f32 %v1022_v15, %v984_v49  ;;  %v4412_v49 = vperm.slane %v3484_v51, 2  ;;  %v4413_v15 = vperm.slane %v3486_v0, 2 }
 0x11d   :  { %v2482_v35 = vpop.eup %2481  ;;  %v1341_v6 = vmax.f32 %v1329_v16, 0.0  ;;  %v2190_v14 = vperm.slane %v3554_v62, 0 }
 0x11e   :  { %v1511_v53 = vmul.f32 0.96, %v2482_v35  ;;  %v1084_v39 = vadd.f32 %v1072_v41, %v1034_v29  ;;  %v3560_v35 = vld [vmem:[#allocation6 + $0xc0] sm:$0xff] }
 0x11f   :  { %v1353_v45 = vmin.f32 %v1341_v6, 1.0  ;;  %v1294_v6 = vperm.slane %v3497_v18, 1 }
 0x120   :  { %v1523_v50 = vadd.f32 0.04, %v1511_v53  ;;  %v1378_v53 = vmul.f32 %v1244_v54, %v3535_v61 }
 0x121   :  { %v1569_v17 = vmul.f32 %v1545_v4, %v1353_v45  ;;  %v1366_v4 = vmul.f32 %v1206_v20, %v3532_v63 }
 0x122   :  { %v1697_v7 = vmul.f32 %v1523_v50, %v1353_v45  ;;  %v1763_v45 = vunpack.c.l.bf16 %v3551_v32 }
 0x123   :  { %v1607_v3 = vadd.f32 %v1583_v43, %v1569_v17  ;;  %v1096_v43 = vmax.f32 %v1084_v39, 0.0  ;;  %v1991_v17 = vperm.slane %v3549_v28, 0 }
 0x124   :  { %v1709_v12 = vmul.f32 %v1697_v7, %v3510_v59 }
 0x125   :  { %v1649_v26 = vmul.f32 %v1625_v36, %v1607_v3  ;;  %v1402_v36 = vmul.f32 %v1294_v6, %v175_v19  ;;  %v3576_v24 = vmin.f32 %v1096_v43, 1.0  ;;  %v1390_v3 = vadd.f32 %v1378_v53, %v1366_v4 }
 0x127   :  { %v1673_v27 = vmul.f32 %v1661_v25, %v1649_v26  ;;  %v1977_v25 = vunpack.c.l.bf16 %v3560_v35  ;;  %v3581_v26 = vld [vmem:[#allocation6 + $0xf0] sm:$0xff]  ;;  %v1120_v23 = vmul.f32 2.0, %v3576_v24  ;;  %v1414_v7 = vadd.f32 %v1402_v36, %v1390_v3 }
 0x129   :  { %v1685_v55 = vmul.f32 8.0, %v1673_v27  ;;  %v1464_v27 = vmul.f32 -5.55472, %v3576_v24  ;;  %v1156_v39 = vmul.f32 %v1120_v23, %v3535_v61  ;;  %v1426_v48 = vmax.f32 %v1414_v7, 0.0 }
 0x12a   :  { %v4498_v61 = vperm.slane %v3488_v9, 2 }
 0x12b   :  { %v1721_v16 = vmax.f32 %v1685_v55, 1e-06  ;;  %v2445_v3 = vadd.f32 -6.98316, %v1464_v27  ;;  %v1438_v7 = vmin.f32 %v1426_v48, 1.0 }
 0x139   :  { %v774_v56 = vpop.f32.mrf.mxu0  ;;  %v787_v44 = vpop.f32.mrf.mxu1 }
 0x13a   :  { %v775_v37 = vadd.f32 %v774_v56, %v3521_v52  ;;  %v1777_v56 = vperm.slane %v3540_v11, 0  ;;  %v788_v1 = vadd.f32 %v787_v44, %v3521_v52  ;;  %v2176_v44 = vunpack.c.l.bf16 %v3581_v26 }
 0x13c   :  { %v921_v22 = vmul.f32 1.442695, %v775_v37  ;;  %v3558_v37 = vld [vmem:[#allocation6 + $0x8] sm:$0xff]  ;;  %v923_v60 = vmul.f32 1.442695, %v788_v1 }
 0x13e   :  { %2483 = vpow2.f32 %v921_v22  ;;  %v3564_v22 = vld [vmem:[#allocation6 + $0x38] sm:$0xff] }
 0x13f   :  { %2485 = vrcp.f32 %v1721_v16  ;;  %v3579_v59 = vunpack.c.l.bf16 %v3564_v22  ;;  %v1180_v16 = vmul.f32 %v1120_v23, %v175_v19 }
 0x140   :  { %2487 = vpow2.f32 %v923_v60 }
 0x141   :  { %v776_v31 = vpop.f32.mrf.mxu0  ;;  %v789_v50 = vpop.f32.mrf.mxu1  ;;  %v1023_v41 = vmul.f32 %v4413_v15, %v3579_v59  ;;  %v1168_v15 = vsub.f32 %v1156_v39, %v998_v5  ;;  %v1192_v55 = vsub.f32 %v1180_v16, %v1048_v58 }
 0x142   :  { %v3571_v31 = vunpack.c.l.bf16 %v3558_v37 }
 0x143   :  { %v1318_v27 = vmul.f32 %v1294_v6, %v1192_v55  ;;  %v1626_v55 = vperm.slane %v3527_v13, 1 }
 0x144   :  { %v2484_v33 = vpop.eup %2483  ;;  %v985_v29 = vmul.f32 %v4412_v49, %v3571_v31 }
 0x145   :  { %v2432_v38 = vadd.f32 -1.0, %v2484_v33  ;;  %v3590_v33 = vunpack.c.l.bf16 %v3573_v42  ;;  %v2486_v4 = vpop.eup %2485 }
 0x146   :  { %v1745_v50 = vmul.f32 %v2486_v4, %v1709_v12  ;;  %v1268_v12 = vmul.f32 %v1244_v54, %v1168_v15 }
 0x147   :  { %v1801_v21 = vmul.f32 %v2432_v38, %v1777_v56  ;;  %v1132_v56 = vmul.f32 %v1120_v23, %v3532_v63  ;;  %v2015_v53 = vmul.f32 %v2432_v38, %v1991_v17  ;;  %v2214_v36 = vmul.f32 %v2432_v38, %v2190_v14 }
 0x148   :  { %v1035_v63 = vadd.f32 %v1023_v41, %v985_v29  ;;  %v1073_v19 = vmul.f32 %v4498_v61, %v3590_v33  ;;  %v2039_v23 = vmul.f32 %v1977_v25, %v1745_v50  ;;  %v2238_v17 = vmul.f32 %v2176_v44, %v1745_v50 }
 0x149   :  { %v3602_v43 = vmul.f32 0.31830987, %v1801_v21  ;;  %v1144_v49 = vsub.f32 %v1132_v56, %v960_v2  ;;  %v1825_v21 = vmul.f32 %v1763_v45, %v1745_v50  ;;  %v2027_v14 = vmul.f32 0.31830987, %v2015_v53 }
 0x14a   :  { %v1488_v2 = vmul.f32 %v2445_v3, %v3576_v24  ;;  %v2051_v4 = vrot.slane %v2039_v23, 4  ;;  %v2226_v5 = vmul.f32 0.31830987, %v2214_v36  ;;  %v2250_v58 = vrot.slane %v2238_v17, 4 }
 0x14b   :  { %v1230_v38 = vmul.f32 %v1206_v20, %v1144_v49  ;;  %v1837_v56 = vrot.slane %v1825_v21, 4  ;;  %v1546_v29 = vperm.slane %v3518_v57, 1  ;;  %v1085_v41 = vadd.f32 %v1073_v19, %v1035_v63 }
 0x14c   :  { %v2052_v16 = vadd.f32 %v2051_v4, %v2039_v23  ;;  %v2251_v45 = vadd.f32 %v2250_v58, %v2238_v17  ;;  %2489 = vpow2.f32 %v1488_v2  ;;  %v1584_v20 = vperm.slane %v3513_v40, 1  ;;  %v2488_v17 = vpop.eup %2487 }
 0x14d   :  { %v1280_v1 = vadd.f32 %v1268_v12, %v1230_v38  ;;  %v1838_v39 = vadd.f32 %v1837_v56, %v1825_v21  ;;  %v1097_v54 = vmax.f32 %v1085_v41, 0.0  ;;  %v1662_v53 = vmax.f32 %v1438_v7, 1e-06 }
 0x14e   :  { %v2053_v49 = vrot.slane %v2052_v16, 2  ;;  %v2252_v15 = vrot.slane %v2251_v45, 2  ;;  %v3618_v36 = vunpack.c.h.bf16 %v3558_v37  ;;  %v1207_v63 = vperm.slane %v3490_v10, 2 }
 0x14f   :  { %v1330_v25 = vadd.f32 %v1318_v27, %v1280_v1  ;;  %v1839_v6 = vrot.slane %v1838_v39, 2  ;;  %v3615_v48 = vmin.f32 %v1097_v54, 1.0  ;;  %v1245_v21 = vperm.slane %v3492_v8, 2 }
 0x150   :  { %v2054_v50 = vadd.f32 %v2053_v49, %v2052_v16  ;;  %v2253_v60 = vadd.f32 %v2252_v15, %v2251_v45  ;;  %v1295_v23 = vperm.slane %v3497_v18, 2  ;;  %v1367_v2 = vmul.f32 %v1207_v63, %v3571_v31 }
 0x151   :  { %v1342_v44 = vmax.f32 %v1330_v25, 0.0  ;;  %v1840_v3 = vadd.f32 %v1839_v6, %v1838_v39  ;;  %v1121_v19 = vmul.f32 2.0, %v3615_v48  ;;  %v1379_v16 = vmul.f32 %v1245_v21, %v3579_v59 }
 0x152   :  { %v2055_v12 = vrot.slane %v2054_v50, 1  ;;  %v2254_v27 = vrot.slane %v2253_v60, 1  ;;  %v2490_v37 = vpop.eup %2489  ;;  %v4499_v25 = vperm.slane %v3484_v51, 2  ;;  %v4500_v6 = vperm.slane %v3486_v0, 2 }
 0x153   :  { %v1354_v61 = vmin.f32 %v1342_v44, 1.0  ;;  %v1841_v38 = vrot.slane %v1840_v3, 1  ;;  %v1133_v4 = vmul.f32 %v1121_v19, %v3571_v31  ;;  %v1157_v58 = vmul.f32 %v1121_v19, %v3579_v59 }
 0x154   :  { %v1181_v1 = vmul.f32 %v1121_v19, %v3590_v33  ;;  %v2056_v41 = vadd.f32 %v2055_v12, %v2054_v50  ;;  %v2255_v39 = vadd.f32 %v2254_v27, %v2253_v60  ;;  %v1403_v12 = vmul.f32 %v1295_v23, %v3590_v33 }
 0x155   :  { %v1570_v56 = vmul.f32 %v1546_v29, %v1354_v61  ;;  %v1842_v7 = vadd.f32 %v1841_v38, %v1840_v3  ;;  %v1145_v54 = vsub.f32 %v1133_v4, %v4499_v25  ;;  %v1169_v49 = vsub.f32 %v1157_v58, %v4500_v6 }
 0x156   :  { %v4501_v29 = vperm.slane %v3488_v9, 2  ;;  %v2123_v44 = vadd.f32 %v2056_v41, %v2027_v14  ;;  %v3638_v19 = vadd.f32 %v2255_v39, %v2226_v5  ;;  %v1512_v3 = vmul.f32 0.96, %v2490_v37 }
 0x157   :  { %v1608_v45 = vadd.f32 %v1584_v20, %v1570_v56  ;;  %v3636_v31 = vadd.f32 %v1842_v7, %v3602_v43  ;;  %v1231_v60 = vmul.f32 %v1207_v63, %v1145_v54  ;;  %v1269_v59 = vmul.f32 %v1245_v21, %v1169_v49  ;;  %v800_v63 = vpop.f32.mrf.mxu2 }
 0x158   :  { %v1193_v15 = vsub.f32 %v1181_v1, %v4501_v29  ;;  %4502 = vst [vmem:[#allocation25_spill] sm:$0xff] %v3638_v19  ;;  %v1391_v38 = vadd.f32 %v1379_v16, %v1367_v2  ;;  %v1465_v27 = vmul.f32 -5.55472, %v3615_v48  ;;  %v3643_v56 = vunpack.c.h.bf16 %v3564_v22 }
 0x159   :  { %v1650_v50 = vmul.f32 %v1626_v55, %v1608_v45  ;;  %2147 = vst [vmem:[#allocation1] sm:$0xff] %v2123_v44  ;;  %v2433_v4 = vadd.f32 -1.0, %v2488_v17  ;;  %v1281_v58 = vadd.f32 %v1269_v59, %v1231_v60  ;;  %v3646_v14 = vunpack.c.h.bf16 %v3573_v42  ;;  %v3666_v60 = vld [vmem:[#allocation6 + $0x10] sm:$0xff] }
 0x15a   :  { %v1319_v20 = vmul.f32 %v1295_v23, %v1193_v15  ;;  %v1524_v5 = vadd.f32 0.04, %v1512_v3  ;;  %v1778_v55 = vperm.slane %v3540_v11, 1  ;;  %v4419_v21 = vperm.slane %v3484_v51, 3 }
 0x15b   :  { %v1674_v43 = vmul.f32 %v1662_v53, %v1650_v50  ;;  %v4418_v2 = vperm.slane %v3486_v0, 3  ;;  %v1415_v37 = vadd.f32 %v1403_v12, %v1391_v38  ;;  %v4417_v22 = vperm.slane %v3488_v9, 3 }
 0x15c   :  { %v1331_v23 = vadd.f32 %v1319_v20, %v1281_v58  ;;  %v1992_v17 = vperm.slane %v3549_v28, 1  ;;  %v2191_v53 = vperm.slane %v3554_v62, 1  ;;  %v801_v42 = vadd.f32 %v800_v63, %v3521_v52 }
 0x15d   :  { %v1686_v33 = vmul.f32 8.0, %v1674_v43  ;;  %v2446_v1 = vadd.f32 -6.98316, %v1465_v27  ;;  %v1427_v39 = vmax.f32 %v1415_v37, 0.0  ;;  %v1547_v16 = vperm.slane %v3518_v57, 2 }
 0x15e   :  { %v1343_v41 = vmax.f32 %v1331_v23, 0.0  ;;  %v1698_v45 = vmul.f32 %v1524_v5, %v1354_v61  ;;  %v1802_v25 = vmul.f32 %v2433_v4, %v1778_v55  ;;  %v986_v6 = vmul.f32 %v4419_v21, %v3618_v36 }
 0x15f   :  { %v1722_v7 = vmax.f32 %v1686_v33, 1e-06  ;;  %v1489_v54 = vmul.f32 %v2446_v1, %v3615_v48  ;;  %v1439_v29 = vmin.f32 %v1427_v39, 1.0  ;;  %v1585_v15 = vperm.slane %v3513_v40, 2  ;;  %v802_v58 = vpop.f32.mrf.mxu2  ;;  %v3678_v33 = vld [vmem:[#allocation6 + $0x98] sm:$0xff] }
 0x160   :  { %v3660_v49 = vmin.f32 %v1343_v41, 1.0  ;;  %v2016_v44 = vmul.f32 %v2433_v4, %v1992_v17  ;;  %v2215_v3 = vmul.f32 %v2433_v4, %v2191_v53  ;;  %v925_v50 = vmul.f32 1.442695, %v801_v42 }
 0x161   :  { %2491 = vrcp.f32 %v1722_v7  ;;  %v1024_v61 = vmul.f32 %v4418_v2, %v3643_v56  ;;  %v1627_v20 = vperm.slane %v3527_v13, 2  ;;  %v1074_v38 = vmul.f32 %v4417_v22, %v3646_v14 }
 0x162   :  { %2493 = vpow2.f32 %v1489_v54  ;;  %v1571_v59 = vmul.f32 %v1547_v16, %v3660_v49  ;;  %v1710_v12 = vmul.f32 %v1698_v45, %v3576_v24  ;;  %v1764_v27 = vunpack.c.h.bf16 %v3551_v32 }
 0x163   :  { %v3675_v4 = vmul.f32 0.31830987, %v1802_v25  ;;  %v1036_v43 = vadd.f32 %v1024_v61, %v986_v6  ;;  %v1978_v5 = vunpack.c.h.bf16 %v3560_v35  ;;  %v1663_v63 = vmax.f32 %v1439_v29, 1e-06  ;;  %v3700_v61 = vld [vmem:[#allocation6 + $0x40] sm:$0xff] }
 0x164   :  { %v1609_v55 = vadd.f32 %v1585_v15, %v1571_v59  ;;  %v3681_v23 = vunpack.c.l.bf16 %v3666_v60  ;;  %v3683_v37 = vmul.f32 0.31830987, %v2016_v44  ;;  %v2177_v17 = vunpack.c.h.bf16 %v3581_v26  ;;  %v813_v26 = vpop.f32.mrf.mxu3  ;;  %v3702_v59 = vld [vmem:[#allocation6 + $0x70] sm:$0xff] }
 0x165   :  { %v3686_v24 = vmul.f32 0.31830987, %v2215_v3  ;;  %2495 = vpow2.f32 %v925_v50  ;;  %v1086_v42 = vadd.f32 %v1074_v38, %v1036_v43  ;;  %v4416_v1 = vperm.slane %v3490_v10, 3  ;;  %v3716_v43 = vld [vmem:[#allocation6 + $0xc8] sm:$0xff] }
 0x166   :  { %v1651_v53 = vmul.f32 %v1627_v20, %v1609_v55  ;;  %v4415_v35 = vperm.slane %v3492_v8, 3  ;;  %v4414_v16 = vperm.slane %v3497_v18, 3 }
 0x167   :  { %v2492_v32 = vpop.eup %2491  ;;  %v1368_v54 = vmul.f32 %v4416_v1, %v3618_v36  ;;  %v1098_v38 = vmax.f32 %v1086_v42, 0.0 }
 0x168   :  { %v1746_v7 = vmul.f32 %v2492_v32, %v1710_v12  ;;  %v2494_v45 = vpop.eup %2493  ;;  %v1675_v25 = vmul.f32 %v1663_v63, %v1651_v53  ;;  %v1380_v6 = vmul.f32 %v4415_v35, %v3643_v56  ;;  %v3718_v12 = vld [vmem:[#allocation6 + $0xf8] sm:$0xff] }
 0x169   :  { %v1513_v50 = vmul.f32 0.96, %v2494_v45 }
 0x16a   :  { %v1826_v15 = vmul.f32 %v1764_v27, %v1746_v7  ;;  %v2040_v44 = vmul.f32 %v1978_v5, %v1746_v7  ;;  %v2239_v3 = vmul.f32 %v2177_v17, %v1746_v7  ;;  %v1687_v20 = vmul.f32 8.0, %v1675_v25 }
 0x16b   :  { %v2496_v58 = vpop.eup %2495  ;;  %v1525_v53 = vadd.f32 0.04, %v1513_v50  ;;  %v1404_v27 = vmul.f32 %v4414_v16, %v3646_v14  ;;  %v3710_v5 = vunpack.c.l.bf16 %v3700_v61  ;;  %v3713_v17 = vunpack.c.l.bf16 %v3702_v59 }
 0x16c   :  { %v1843_v55 = vrot.slane %v1826_v15, 4  ;;  %v2057_v63 = vrot.slane %v2040_v44, 4  ;;  %v2256_v32 = vrot.slane %v2239_v3, 4  ;;  %v1723_v29 = vmax.f32 %v1687_v20, 1e-06 }
 0x16d   :  { %v1699_v25 = vmul.f32 %v1525_v53, %v3660_v49  ;;  %v1993_v50 = vperm.slane %v3549_v28, 2  ;;  %v3721_v20 = vmin.f32 %v1098_v38, 1.0  ;;  %v1392_v39 = vadd.f32 %v1380_v6, %v1368_v54 }
 0x16e   :  { %v1844_v42 = vadd.f32 %v1843_v55, %v1826_v15  ;;  %v2058_v7 = vadd.f32 %v2057_v63, %v2040_v44  ;;  %v2257_v45 = vadd.f32 %v2256_v32, %v2239_v3  ;;  %2497 = vrcp.f32 %v1723_v29  ;;  %v815_v55 = vpop.f32.mrf.mxu3 }
 0x16f   :  { %v2434_v1 = vadd.f32 -1.0, %v2496_v58  ;;  %v1979_v15 = vunpack.c.l.bf16 %v3716_v43  ;;  %v2178_v44 = vunpack.c.l.bf16 %v3718_v12  ;;  %v1122_v49 = vmul.f32 2.0, %v3721_v20 }
 0x170   :  { %v1845_v41 = vrot.slane %v1844_v42, 2  ;;  %v2059_v16 = vrot.slane %v2058_v7, 2  ;;  %v2258_v35 = vrot.slane %v2257_v45, 2  ;;  %v1466_v3 = vmul.f32 -5.55472, %v3721_v20 }
 0x171   :  { %v1711_v38 = vmul.f32 %v1699_v25, %v3615_v48  ;;  %v814_v54 = vadd.f32 %v813_v26, %v3521_v52  ;;  %v1134_v6 = vmul.f32 %v1122_v49, %v3618_v36  ;;  %v1158_v58 = vmul.f32 %v1122_v49, %v3643_v56 }
 0x172   :  { %v1846_v29 = vadd.f32 %v1845_v41, %v1844_v42  ;;  %v2060_v63 = vadd.f32 %v2059_v16, %v2058_v7  ;;  %v2259_v32 = vadd.f32 %v2258_v35, %v2257_v45  ;;  %v1182_v53 = vmul.f32 %v1122_v49, %v3646_v14 }
 0x173   :  { %v1416_v34 = vadd.f32 %v1404_v27, %v1392_v39  ;;  %v4503_v55 = vperm.slane %v3484_v51, 3  ;;  %v4504_v35 = vperm.slane %v3486_v0, 3  ;;  %v4505_v48 = vperm.slane %v3488_v9, 3 }
 0x174   :  { %v1847_v22 = vrot.slane %v1846_v29, 1  ;;  %v2061_v2 = vrot.slane %v2060_v63, 1  ;;  %v2260_v21 = vrot.slane %v2259_v32, 1  ;;  %v2498_v19 = vpop.eup %2497  ;;  %v2447_v42 = vadd.f32 -6.98316, %v1466_v3 }
 0x175   :  { %v1146_v41 = vsub.f32 %v1134_v6, %v4503_v55  ;;  %v1170_v16 = vsub.f32 %v1158_v58, %v4504_v35  ;;  %v1194_v26 = vsub.f32 %v1182_v53, %v4505_v48  ;;  %v1747_v45 = vmul.f32 %v2498_v19, %v1711_v38 }
 0x176   :  { %v1848_v36 = vadd.f32 %v1847_v22, %v1846_v29  ;;  %v2062_v7 = vadd.f32 %v2061_v2, %v2060_v63  ;;  %v2261_v56 = vadd.f32 %v2260_v21, %v2259_v32  ;;  %v2192_v14 = vperm.slane %v3554_v62, 2 }
 0x177   :  { %v4506_v25 = vperm.slane %v3490_v10, 3  ;;  %v4507_v27 = vperm.slane %v3492_v8, 3  ;;  %v4508_v6 = vperm.slane %v3497_v18, 3  ;;  %v4510_v19 = vunpack.c.l.bf16 %v3678_v33 }
 0x178   :  { %v1910_v58 = vadd.f32 %v1848_v36, %v3675_v4  ;;  %v2124_v53 = vadd.f32 %v2062_v7, %v3683_v37  ;;  %v3748_v22 = vadd.f32 %v2261_v56, %v3686_v24  ;;  %v2041_v2 = vmul.f32 %v1979_v15, %v1747_v45 }
 0x179   :  { %v1232_v39 = vmul.f32 %v4506_v25, %v1146_v41  ;;  %v1270_v49 = vmul.f32 %v4507_v27, %v1170_v16  ;;  %v1320_v55 = vmul.f32 %v4508_v6, %v1194_v26  ;;  %v1827_v21 = vmul.f32 %v4510_v19, %v1747_v45  ;;  %v3759_v26 = vpop.f32.mrf.mxu0 }
 0x17a   :  { %4509 = vst [vmem:[#allocation19_spill] sm:$0xff] %v3748_v22  ;;  %v2240_v3 = vmul.f32 %v2178_v44, %v1747_v45  ;;  %v1490_v63 = vmul.f32 %v2447_v42, %v3721_v20  ;;  %v1933_v32 = vrot.slane %v1910_v58, 7  ;;  %v927_v41 = vmul.f32 1.442695, %v814_v54 }
 0x17b   :  { %v1282_v29 = vadd.f32 %v1270_v49, %v1232_v39  ;;  %2148 = vst [vmem:[#allocation1 + $0x9] sm:$0xff] %v2124_v53  ;;  %v1849_v38 = vrot.slane %v1827_v21, 4  ;;  %v1428_v35 = vmax.f32 %v1416_v34, 0.0  ;;  %v2063_v16 = vrot.slane %v2041_v2, 4 }
 0x17c   :  { %v2262_v4 = vrot.slane %v2240_v3, 4  ;;  %2499 = vpow2.f32 %v1490_v63  ;;  %v3755_v37 = vsel %vm1943_vm7, %v3636_v31, %v1933_v32  ;;  %v4511_v24 = vperm.slane %v3540_v11, 2 }
 0x17d   :  { %v1332_v48 = vadd.f32 %v1320_v55, %v1282_v29  ;;  %v1850_v44 = vadd.f32 %v1849_v38, %v1827_v21  ;;  %v963_v42 = vperm.slane %v3484_v51, 4  ;;  %v2017_v36 = vmul.f32 %v2434_v1, %v1993_v50 }
 0x17e   :  { %v1803_v15 = vmul.f32 %v2434_v1, %v4511_v24  ;;  %v2064_v7 = vadd.f32 %v2063_v16, %v2041_v2  ;;  %v2263_v54 = vadd.f32 %v2262_v4, %v2240_v3  ;;  %v2216_v45 = vmul.f32 %v2434_v1, %v2192_v14 }
 0x17f   :  { %v1344_v34 = vmax.f32 %v1332_v48, 0.0  ;;  %v1851_v56 = vrot.slane %v1850_v44, 2  ;;  %2501 = vpow2.f32 %v927_v41  ;;  %v1001_v25 = vperm.slane %v3486_v0, 4 }
 0x180   :  { %v2065_v39 = vrot.slane %v2064_v7, 2  ;;  %v2264_v31 = vrot.slane %v2263_v54, 2  ;;  %v1440_v49 = vmin.f32 %v1428_v35, 1.0  ;;  %v1815_v6 = vmul.f32 0.31830987, %v1803_v15 }
 0x181   :  { %v1356_v27 = vmin.f32 %v1344_v34, 1.0  ;;  %v1852_v55 = vadd.f32 %v1851_v56, %v1850_v44  ;;  %v987_v58 = vmul.f32 %v963_v42, %v3681_v23  ;;  %v1051_v50 = vperm.slane %v3488_v9, 4  ;;  %v828_v44 = vpop.f32.mrf.mxu0 }
 0x182   :  { %v2500_v53 = vpop.eup %2499  ;;  %v2029_v19 = vmul.f32 0.31830987, %v2017_v36  ;;  %v2066_v21 = vadd.f32 %v2065_v39, %v2064_v7  ;;  %v2265_v2 = vadd.f32 %v2264_v31, %v2263_v54  ;;  %v4512_v1 = vperm.slane %v3518_v57, 3 }
 0x183   :  { %v1853_v3 = vrot.slane %v1852_v55, 1  ;;  %v2228_v29 = vmul.f32 0.31830987, %v2216_v45  ;;  %v1514_v63 = vmul.f32 0.96, %v2500_v53  ;;  %v1025_v32 = vmul.f32 %v1001_v25, %v3710_v5 }
 0x184   :  { %v1572_v14 = vmul.f32 %v4512_v1, %v1356_v27  ;;  %v2067_v38 = vrot.slane %v2066_v21, 1  ;;  %v2266_v41 = vrot.slane %v2265_v2, 1  ;;  %v4513_v35 = vperm.slane %v3513_v40, 3 }
 0x185   :  { %v1664_v4 = vmax.f32 %v1440_v49, 1e-06  ;;  %v2502_v48 = vpop.eup %2501  ;;  %v1854_v24 = vadd.f32 %v1853_v3, %v1852_v55  ;;  %v1037_v15 = vadd.f32 %v1025_v32, %v987_v58  ;;  %v4514_v54 = vperm.slane %v3527_v13, 3 }
 0x186   :  { %v1610_v16 = vadd.f32 %v4513_v35, %v1572_v14  ;;  %v2068_v36 = vadd.f32 %v2067_v38, %v2066_v21  ;;  %v2267_v7 = vadd.f32 %v2266_v41, %v2265_v2  ;;  %v1075_v56 = vmul.f32 %v1051_v50, %v3713_v17 }
 0x187   :  { %v3779_v45 = vadd.f32 %v1854_v24, %v1815_v6  ;;  %v1526_v39 = vadd.f32 0.04, %v1514_v63  ;;  %v2435_v55 = vadd.f32 -1.0, %v2502_v48  ;;  %v1209_v58 = vperm.slane %v3490_v10, 4 }
 0x188   :  { %v1652_v34 = vmul.f32 %v4514_v54, %v1610_v16  ;;  %v2125_v31 = vadd.f32 %v2068_v36, %v2029_v19  ;;  %v3781_v53 = vadd.f32 %v2267_v7, %v2228_v29  ;;  %v1087_v1 = vadd.f32 %v1075_v56, %v1037_v15 }
 0x189   :  { %v1766_v2 = vunpack.c.h.bf16 %v3678_v33  ;;  %v1247_v3 = vperm.slane %v3492_v8, 4  ;;  %v1700_v32 = vmul.f32 %v1526_v39, %v1356_v27  ;;  %v1780_v6 = vperm.slane %v3540_v11, 3 }
 0x18a   :  { %4515 = vst [vmem:[#allocation20_spill] sm:$0xff] %v3781_v53  ;;  %v1676_v49 = vmul.f32 %v1664_v4, %v1652_v34  ;;  %v1099_v14 = vmax.f32 %v1087_v1, 0.0  ;;  %v1980_v63 = vunpack.c.h.bf16 %v3716_v43  ;;  %v1369_v19 = vmul.f32 %v1209_v58, %v3681_v23 }
 0x18b   :  { %2149 = vst [vmem:[#allocation1 + $0x12] sm:$0xff] %v2125_v31  ;;  %v1297_v41 = vperm.slane %v3497_v18, 4  ;;  %v1381_v35 = vmul.f32 %v1247_v3, %v3710_v5  ;;  %v1994_v16 = vperm.slane %v3549_v28, 3  ;;  %v2193_v33 = vperm.slane %v3554_v62, 3 }
 0x18c   :  { %v1688_v21 = vmul.f32 8.0, %v1676_v49  ;;  %v3789_v38 = vmin.f32 %v1099_v14, 1.0  ;;  %v3796_v4 = vunpack.c.h.bf16 %v3666_v60  ;;  %v964_v27 = vperm.slane %v3484_v51, 5 }
 0x18d   :  { %v1393_v48 = vadd.f32 %v1381_v35, %v1369_v19  ;;  %v1405_v24 = vmul.f32 %v1297_v41, %v3713_v17  ;;  %v827_v15 = vadd.f32 %v3759_v26, %v3521_v52  ;;  %v3805_v36 = vunpack.c.h.bf16 %v3700_v61 }
 0x18e   :  { %v1724_v29 = vmax.f32 %v1688_v21, 1e-06  ;;  %v1123_v43 = vmul.f32 2.0, %v3789_v38  ;;  %v1467_v44 = vmul.f32 -5.55472, %v3789_v38  ;;  %v1002_v7 = vperm.slane %v3486_v0, 5 }
 0x18f   :  { %v1712_v60 = vmul.f32 %v1700_v32, %v3721_v20  ;;  %v3813_v31 = vunpack.c.h.bf16 %v3702_v59  ;;  %v988_v26 = vmul.f32 %v964_v27, %v3796_v4  ;;  %v4420_v61 = vperm.slane %v3488_v9, 5 }
 0x190   :  { %2503 = vrcp.f32 %v1724_v29  ;;  %v1135_v54 = vmul.f32 %v1123_v43, %v3681_v23  ;;  %v1159_v34 = vmul.f32 %v1123_v43, %v3710_v5  ;;  %v1183_v56 = vmul.f32 %v1123_v43, %v3713_v17 }
 0x191   :  { %v2448_v39 = vadd.f32 -6.98316, %v1467_v44  ;;  %v1417_v17 = vadd.f32 %v1405_v24, %v1393_v48  ;;  %v1804_v20 = vmul.f32 %v2435_v55, %v1780_v6  ;;  %v2179_v59 = vunpack.c.h.bf16 %v3718_v12 }
 0x192   :  { %v1147_v49 = vsub.f32 %v1135_v54, %v963_v42  ;;  %v1171_v23 = vsub.f32 %v1159_v34, %v1001_v25  ;;  %v1195_v5 = vsub.f32 %v1183_v56, %v1051_v50  ;;  %v1026_v21 = vmul.f32 %v1002_v7, %v3805_v36 }
 0x193   :  { %v1491_v1 = vmul.f32 %v2448_v39, %v3789_v38  ;;  %v929_v32 = vmul.f32 1.442695, %v827_v15  ;;  %v2018_v25 = vmul.f32 %v2435_v55, %v1994_v16  ;;  %v2217_v44 = vmul.f32 %v2435_v55, %v2193_v33  ;;  %v3834_v39 = vpop.f32.mrf.mxu1 }
 0x194   :  { %v1233_v19 = vmul.f32 %v1209_v58, %v1147_v49  ;;  %v1271_v42 = vmul.f32 %v1247_v3, %v1171_v23  ;;  %v1321_v29 = vmul.f32 %v1297_v41, %v1195_v5  ;;  %v1038_v43 = vadd.f32 %v1026_v21, %v988_v26 }
 0x195   :  { %v1429_v48 = vmax.f32 %v1417_v17, 0.0  ;;  %v1076_v12 = vmul.f32 %v4420_v61, %v3813_v31  ;;  %2505 = vpow2.f32 %v1491_v1  ;;  %v1816_v34 = vmul.f32 0.31830987, %v1804_v20 }
 0x196   :  { %v2504_v14 = vpop.eup %2503  ;;  %v1283_v50 = vadd.f32 %v1271_v42, %v1233_v19  ;;  %2507 = vpow2.f32 %v929_v32  ;;  %v2030_v16 = vmul.f32 0.31830987, %v2018_v25  ;;  %v1549_v33 = vperm.slane %v3518_v57, 4 }
 0x197   :  { %v1748_v35 = vmul.f32 %v2504_v14, %v1712_v60  ;;  %v1088_v60 = vadd.f32 %v1076_v12, %v1038_v43  ;;  %v1441_v55 = vmin.f32 %v1429_v48, 1.0  ;;  %v1934_v23 = vrot.slane %v3779_v45, 6 }
 0x198   :  { %v1333_v15 = vadd.f32 %v1321_v29, %v1283_v50  ;;  %v1587_v17 = vperm.slane %v3513_v40, 4  ;;  %v1629_v20 = vperm.slane %v3527_v13, 4  ;;  %v1248_v25 = vperm.slane %v3492_v8, 5 }
 0x199   :  { %v1828_v6 = vmul.f32 %v1766_v2, %v1748_v35  ;;  %v2042_v24 = vmul.f32 %v1980_v63, %v1748_v35  ;;  %v2241_v54 = vmul.f32 %v2179_v59, %v1748_v35  ;;  %v2229_v2 = vmul.f32 0.31830987, %v2217_v44 }
 0x19a   :  { %v1345_v56 = vmax.f32 %v1333_v15, 0.0  ;;  %v1100_v32 = vmax.f32 %v1088_v60, 0.0  ;;  %v1665_v29 = vmax.f32 %v1441_v55, 1e-06  ;;  %v1210_v35 = vperm.slane %v3490_v10, 5 }
 0x19b   :  { %v1855_v58 = vrot.slane %v1828_v6, 4  ;;  %v2069_v3 = vrot.slane %v2042_v24, 4  ;;  %v2268_v41 = vrot.slane %v2241_v54, 4  ;;  %v2506_v59 = vpop.eup %2505  ;;  %v1298_v50 = vperm.slane %v3497_v18, 5 }
 0x19c   :  { %v1357_v5 = vmin.f32 %v1345_v56, 1.0  ;;  %v2508_v19 = vpop.eup %2507  ;;  %v1515_v48 = vmul.f32 0.96, %v2506_v59  ;;  %v1781_v56 = vperm.slane %v3540_v11, 4 }
 0x19d   :  { %v1856_v26 = vadd.f32 %v1855_v58, %v1828_v6  ;;  %v2070_v49 = vadd.f32 %v2069_v3, %v2042_v24  ;;  %v2269_v63 = vadd.f32 %v2268_v41, %v2241_v54  ;;  %v1370_v6 = vmul.f32 %v1210_v35, %v3796_v4 }
 0x19e   :  { %v1573_v42 = vmul.f32 %v1549_v33, %v1357_v5  ;;  %v1382_v24 = vmul.f32 %v1248_v25, %v3805_v36  ;;  %v3844_v3 = vmin.f32 %v1100_v32, 1.0  ;;  %v3846_v41 = vadd.f32 -1.0, %v2508_v19  ;;  %v841_v33 = vpop.f32.mrf.mxu1 }
 0x19f   :  { %v1857_v1 = vrot.slane %v1856_v26, 2  ;;  %v2071_v21 = vrot.slane %v2070_v49, 2  ;;  %v2270_v14 = vrot.slane %v2269_v63, 2  ;;  %v1406_v55 = vmul.f32 %v1298_v50, %v3813_v31 }
 0x1a0   :  { %v1611_v12 = vadd.f32 %v1587_v17, %v1573_v42  ;;  %v3850_v17 = vld [vmem:[#allocation6 + $0xa0] sm:$0xff]  ;;  %v1124_v59 = vmul.f32 2.0, %v3844_v3  ;;  %v1468_v32 = vmul.f32 -5.55472, %v3844_v3 }
 0x1a1   :  { %v1858_v43 = vadd.f32 %v1857_v1, %v1856_v26  ;;  %v2072_v45 = vadd.f32 %v2071_v21, %v2070_v49  ;;  %v2271_v44 = vadd.f32 %v2270_v14, %v2269_v63  ;;  %v1527_v1 = vadd.f32 0.04, %v1515_v48 }
 0x1a2   :  { %v1653_v60 = vmul.f32 %v1629_v20, %v1611_v12  ;;  %v1394_v14 = vadd.f32 %v1382_v24, %v1370_v6  ;;  %v1136_v12 = vmul.f32 %v1124_v59, %v3796_v4  ;;  %v3863_v6 = vld [vmem:[#allocation6 + $0xd0] sm:$0xff]  ;;  %v3865_v4 = vld [vmem:[#allocation6 + $0x100] sm:$0xff] }
 0x1a3   :  { %v1859_v54 = vrot.slane %v1858_v43, 1  ;;  %v2073_v15 = vrot.slane %v2072_v45, 1  ;;  %v2272_v58 = vrot.slane %v2271_v44, 1 }
 0x1a4   :  { %v1677_v21 = vmul.f32 %v1665_v29, %v1653_v60  ;;  %v1805_v29 = vmul.f32 %v3846_v41, %v1781_v56  ;;  %v1148_v48 = vsub.f32 %v1136_v12, %v964_v27  ;;  %v1418_v60 = vadd.f32 %v1406_v55, %v1394_v14  ;;  %v3873_v27 = vld [vmem:[#allocation6 + $0x18] sm:$0xff] }
 0x1a5   :  { %v1860_v26 = vadd.f32 %v1859_v54, %v1858_v43  ;;  %v2074_v49 = vadd.f32 %v2073_v15, %v2072_v45  ;;  %v2273_v63 = vadd.f32 %v2272_v58, %v2271_v44  ;;  %v1767_v43 = vunpack.c.l.bf16 %v3850_v17 }
 0x1a6   :  { %v1689_v61 = vmul.f32 8.0, %v1677_v21  ;;  %v1160_v45 = vmul.f32 %v1124_v59, %v3805_v36  ;;  %v1184_v44 = vmul.f32 %v1124_v59, %v3813_v31  ;;  %v4517_v36 = vperm.slane %v3488_v9, 5 }
 0x1a7   :  { %v1912_v19 = vadd.f32 %v1860_v26, %v1816_v34  ;;  %v2126_v42 = vadd.f32 %v2074_v49, %v2030_v16  ;;  %v3854_v20 = vadd.f32 %v2273_v63, %v2229_v2  ;;  %v2449_v34 = vadd.f32 -6.98316, %v1468_v32  ;;  %v3881_v26 = vld [vmem:[#allocation6 + $0x78] sm:$0xff] }
 0x1a8   :  { %v1701_v16 = vmul.f32 %v1527_v1, %v1357_v5  ;;  %v1725_v2 = vmax.f32 %v1689_v61, 1e-06  ;;  %v1172_v24 = vsub.f32 %v1160_v45, %v1002_v7  ;;  %v1196_v31 = vsub.f32 %v1184_v44, %v4517_v36  ;;  %v3875_v5 = vld [vmem:[#allocation6 + $0x48] sm:$0xff] }
 0x1a9   :  { %4516 = vst [vmem:[#allocation21_spill] sm:$0xff] %v3854_v20  ;;  %v1935_v54 = vrot.slane %v1912_v19, 5  ;;  %v1234_v58 = vmul.f32 %v1210_v35, %v1148_v48  ;;  %v1492_v56 = vmul.f32 %v2449_v34, %v3844_v3  ;;  %v1981_v49 = vunpack.c.l.bf16 %v3863_v6 }
 0x1aa   :  { %2150 = vst [vmem:[#allocation1 + $0x1b] sm:$0xff] %v2126_v42  ;;  %2509 = vrcp.f32 %v1725_v2  ;;  %v1272_v33 = vmul.f32 %v1248_v25, %v1172_v24  ;;  %v1322_v7 = vmul.f32 %v1298_v50, %v1196_v31  ;;  %v2180_v35 = vunpack.c.l.bf16 %v3865_v4 }
 0x1ab   :  { %v1946_v15 = vsel %vm1945_vm8, %v1934_v23, %v1935_v54  ;;  %v1995_v23 = vperm.slane %v3549_v28, 4  ;;  %2511 = vpow2.f32 %v1492_v56  ;;  %v2194_v55 = vperm.slane %v3554_v62, 4 }
 0x1ac   :  { %v3879_v61 = vsel %vm1947_vm9, %v3755_v37, %v1946_v15  ;;  %v1284_v63 = vadd.f32 %v1272_v33, %v1234_v58  ;;  %v3888_v59 = vunpack.c.l.bf16 %v3873_v27  ;;  %v3891_v37 = vunpack.c.l.bf16 %v3875_v5 }
 0x1ad   :  { %4518 = vst [vmem:[#allocation22_spill] sm:$0xff] %v3879_v61  ;;  %v1713_v25 = vmul.f32 %v1701_v16, %v3789_v38  ;;  %v3895_v50 = vunpack.c.l.bf16 %v3881_v26  ;;  %v4423_v1 = vperm.slane %v3484_v51, 6  ;;  %v4422_v21 = vperm.slane %v3486_v0, 6 }
 0x1ae   :  { %v3899_v14 = vmul.f32 0.31830987, %v1805_v29  ;;  %v1334_v32 = vadd.f32 %v1322_v7, %v1284_v63  ;;  %v1430_v19 = vmax.f32 %v1418_v60, 0.0  ;;  %v4421_v42 = vperm.slane %v3488_v9, 6 }
 0x1af   :  { %v840_v12 = vadd.f32 %v3834_v39, %v3521_v52  ;;  %v1550_v45 = vperm.slane %v3518_v57, 5  ;;  %v989_v38 = vmul.f32 %v4423_v1, %v3888_v59  ;;  %v1027_v44 = vmul.f32 %v4422_v21, %v3891_v37 }
 0x1b0   :  { %v2510_v54 = vpop.eup %2509  ;;  %v2019_v29 = vmul.f32 %v3846_v41, %v1995_v23  ;;  %v2218_v48 = vmul.f32 %v3846_v41, %v2194_v55  ;;  %v1346_v34 = vmax.f32 %v1334_v32, 0.0  ;;  %v1077_v39 = vmul.f32 %v4421_v42, %v3895_v50 }
 0x1b1   :  { %v2512_v16 = vpop.eup %2511  ;;  %v1749_v2 = vmul.f32 %v2510_v54, %v1713_v25  ;;  %v1588_v24 = vperm.slane %v3513_v40, 5  ;;  %v1630_v36 = vperm.slane %v3527_v13, 5  ;;  %v1039_v31 = vadd.f32 %v1027_v44, %v989_v38 }
 0x1b2   :  { %v1358_v15 = vmin.f32 %v1346_v34, 1.0  ;;  %v1442_v58 = vmin.f32 %v1430_v19, 1.0  ;;  %v1211_v60 = vperm.slane %v3490_v10, 6  ;;  %v1249_v56 = vperm.slane %v3492_v8, 6 }
 0x1b3   :  { %v1829_v33 = vmul.f32 %v1767_v43, %v1749_v2  ;;  %v2043_v41 = vmul.f32 %v1981_v49, %v1749_v2  ;;  %v2242_v7 = vmul.f32 %v2180_v35, %v1749_v2  ;;  %v1516_v23 = vmul.f32 0.96, %v2512_v16 }
 0x1b4   :  { %v1574_v55 = vmul.f32 %v1550_v45, %v1358_v15  ;;  %v1089_v63 = vadd.f32 %v1077_v39, %v1039_v31  ;;  %v1371_v32 = vmul.f32 %v1211_v60, %v3888_v59  ;;  %v1383_v25 = vmul.f32 %v1249_v56, %v3891_v37 }
 0x1b5   :  { %v1861_v54 = vrot.slane %v1829_v33, 4  ;;  %v2075_v42 = vrot.slane %v2043_v41, 4  ;;  %v2274_v21 = vrot.slane %v2242_v7, 4  ;;  %v931_v38 = vmul.f32 1.442695, %v840_v12  ;;  %v852_v12 = vpop.f32.mrf.mxu2 }
 0x1b6   :  { %v1612_v44 = vadd.f32 %v1588_v24, %v1574_v55  ;;  %v1666_v19 = vmax.f32 %v1442_v58, 1e-06  ;;  %v1101_v34 = vmax.f32 %v1089_v63, 0.0  ;;  %v1299_v1 = vperm.slane %v3497_v18, 6 }
 0x1b7   :  { %v1862_v20 = vadd.f32 %v1861_v54, %v1829_v33  ;;  %v2076_v43 = vadd.f32 %v2075_v42, %v2043_v41  ;;  %v2275_v49 = vadd.f32 %v2274_v21, %v2242_v7  ;;  %v1528_v35 = vadd.f32 0.04, %v1516_v23 }
 0x1b8   :  { %v1654_v16 = vmul.f32 %v1630_v36, %v1612_v44  ;;  %v3923_v45 = vmin.f32 %v1101_v34, 1.0  ;;  %v1395_v39 = vadd.f32 %v1383_v25, %v1371_v32  ;;  %v1407_v2 = vmul.f32 %v1299_v1, %v3895_v50 }
 0x1b9   :  { %v1863_v31 = vrot.slane %v1862_v20, 2  ;;  %v2031_v53 = vmul.f32 0.31830987, %v2019_v29  ;;  %v2077_v22 = vrot.slane %v2076_v43, 2  ;;  %v2276_v61 = vrot.slane %v2275_v49, 2 }
 0x1ba   :  { %v2230_v24 = vmul.f32 0.31830987, %v2218_v48  ;;  %2513 = vpow2.f32 %v931_v38  ;;  %v1678_v58 = vmul.f32 %v1666_v19, %v1654_v16  ;;  %v1125_v55 = vmul.f32 2.0, %v3923_v45 }
 0x1bb   :  { %v1864_v33 = vadd.f32 %v1863_v31, %v1862_v20  ;;  %v2078_v42 = vadd.f32 %v2077_v22, %v2076_v43  ;;  %v2277_v21 = vadd.f32 %v2276_v61, %v2275_v49  ;;  %v1702_v41 = vmul.f32 %v1528_v35, %v1358_v15 }
 0x1bc   :  { %v1690_v36 = vmul.f32 8.0, %v1678_v58  ;;  %v1137_v7 = vmul.f32 %v1125_v55, %v3888_v59  ;;  %v1161_v23 = vmul.f32 %v1125_v55, %v3891_v37  ;;  %v1419_v63 = vadd.f32 %v1407_v2, %v1395_v39 }
 0x1bd   :  { %v1865_v32 = vrot.slane %v1864_v33, 1  ;;  %v2079_v29 = vrot.slane %v2078_v42, 1  ;;  %v2278_v25 = vrot.slane %v2277_v21, 1  ;;  %v1185_v54 = vmul.f32 %v1125_v55, %v3895_v50  ;;  %v854_v31 = vpop.f32.mrf.mxu2 }
 0x1be   :  { %v1726_v48 = vmax.f32 %v1690_v36, 1e-06  ;;  %v4519_v38 = vperm.slane %v3484_v51, 6  ;;  %v4520_v20 = vperm.slane %v3486_v0, 6  ;;  %v1469_v61 = vmul.f32 -5.55472, %v3923_v45 }
 0x1bf   :  { %v1866_v15 = vadd.f32 %v1865_v32, %v1864_v33  ;;  %v2080_v19 = vadd.f32 %v2079_v29, %v2078_v42  ;;  %v2279_v59 = vadd.f32 %v2278_v25, %v2277_v21  ;;  %v4521_v37 = vperm.slane %v3488_v9, 6 }
 0x1c0   :  { %v1149_v44 = vsub.f32 %v1137_v7, %v4519_v38  ;;  %v1173_v22 = vsub.f32 %v1161_v23, %v4520_v20  ;;  %v2514_v43 = vpop.eup %2513  ;;  %2515 = vrcp.f32 %v1726_v48  ;;  %v2450_v55 = vadd.f32 -6.98316, %v1469_v61 }
 0x1c1   :  { %v1197_v34 = vsub.f32 %v1185_v54, %v4521_v37  ;;  %v3938_v50 = vadd.f32 %v1866_v15, %v3899_v14  ;;  %v2127_v16 = vadd.f32 %v2080_v19, %v2031_v53  ;;  %v3940_v39 = vadd.f32 %v2279_v59, %v2230_v24 }
 0x1c2   :  { %v1235_v49 = vmul.f32 %v1211_v60, %v1149_v44  ;;  %v1273_v35 = vmul.f32 %v1249_v56, %v1173_v22  ;;  %v2437_v33 = vadd.f32 -1.0, %v2514_v43  ;;  %v1714_v42 = vmul.f32 %v1702_v41, %v3844_v3 }
 0x1c3   :  { %4522 = vst [vmem:[#allocation32_spill] sm:$0xff] %v3940_v39  ;;  %v1323_v2 = vmul.f32 %v1299_v1, %v1197_v34  ;;  %v1768_v21 = vunpack.c.h.bf16 %v3850_v17  ;;  %v1431_v36 = vmax.f32 %v1419_v63, 0.0  ;;  %v1982_v60 = vunpack.c.h.bf16 %v3863_v6 }
 0x1c4   :  { %v1285_v58 = vadd.f32 %v1273_v35, %v1235_v49  ;;  %2151 = vst [vmem:[#allocation1 + $0x24] sm:$0xff] %v2127_v16  ;;  %v2181_v56 = vunpack.c.h.bf16 %v3865_v4  ;;  %v1493_v53 = vmul.f32 %v2450_v55, %v3923_v45  ;;  %v853_v24 = vadd.f32 %v852_v12, %v3521_v52 }
 0x1c5   :  { %v1551_v1 = vperm.slane %v3518_v57, 6  ;;  %v3950_v7 = vunpack.c.h.bf16 %v3873_v27  ;;  %v3953_v23 = vunpack.c.h.bf16 %v3875_v5  ;;  %v966_v6 = vperm.slane %v3484_v51, 7 }
 0x1c6   :  { %v1335_v14 = vadd.f32 %v1323_v2, %v1285_v58  ;;  %v2516_v3 = vpop.eup %2515  ;;  %2517 = vpow2.f32 %v1493_v53  ;;  %v1004_v4 = vperm.slane %v3486_v0, 7  ;;  %v1443_v63 = vmin.f32 %v1431_v36, 1.0 }
 0x1c7   :  { %v1750_v41 = vmul.f32 %v2516_v3, %v1714_v42  ;;  %v1589_v32 = vperm.slane %v3513_v40, 6  ;;  %v181_v12 = vunpack.c.h.bf16 %v3881_v26  ;;  %v990_v27 = vmul.f32 %v966_v6, %v3950_v7 }
 0x1c8   :  { %v1347_v17 = vmax.f32 %v1335_v14, 0.0  ;;  %v1028_v5 = vmul.f32 %v1004_v4, %v3953_v23  ;;  %v1054_v25 = vperm.slane %v3488_v9, 7  ;;  %v1996_v54 = vperm.slane %v3549_v28, 5  ;;  %v865_v14 = vpop.f32.mrf.mxu3 }
 0x1c9   :  { %v2044_v48 = vmul.f32 %v1982_v60, %v1750_v41  ;;  %v2195_v38 = vperm.slane %v3554_v62, 5  ;;  %v2243_v44 = vmul.f32 %v2181_v56, %v1750_v41  ;;  %v933_v20 = vmul.f32 1.442695, %v853_v24 }
 0x1ca   :  { %v1359_v29 = vmin.f32 %v1347_v17, 1.0  ;;  %v1631_v26 = vperm.slane %v3527_v13, 6  ;;  %v1040_v61 = vadd.f32 %v1028_v5, %v990_v27  ;;  %v1830_v15 = vmul.f32 %v1768_v21, %v1750_v41 }
 0x1cb   :  { %v2081_v19 = vrot.slane %v2044_v48, 4  ;;  %v2280_v59 = vrot.slane %v2243_v44, 4  ;;  %v1078_v37 = vmul.f32 %v1054_v25, %v181_v12  ;;  %v1782_v43 = vperm.slane %v3540_v11, 5 }
 0x1cc   :  { %v1575_v22 = vmul.f32 %v1551_v1, %v1359_v29  ;;  %v2518_v34 = vpop.eup %2517  ;;  %v1667_v35 = vmax.f32 %v1443_v63, 1e-06  ;;  %v2020_v16 = vmul.f32 %v2437_v33, %v1996_v54  ;;  %v2219_v55 = vmul.f32 %v2437_v33, %v2195_v38 }
 0x1cd   :  { %v2082_v2 = vadd.f32 %v2081_v19, %v2044_v48  ;;  %v2281_v31 = vadd.f32 %v2280_v59, %v2243_v44  ;;  %v1517_v58 = vmul.f32 0.96, %v2518_v34  ;;  %2519 = vpow2.f32 %v933_v20 }
 0x1ce   :  { %v1613_v49 = vadd.f32 %v1589_v32, %v1575_v22  ;;  %v1090_v36 = vadd.f32 %v1078_v37, %v1040_v61  ;;  %v1867_v60 = vrot.slane %v1830_v15, 4  ;;  %v1212_v53 = vperm.slane %v3490_v10, 7 }
 0x1cf   :  { %v2083_v21 = vrot.slane %v2082_v2, 2  ;;  %v2282_v56 = vrot.slane %v2281_v31, 2  ;;  %v1529_v24 = vadd.f32 0.04, %v1517_v58  ;;  %v1250_v17 = vperm.slane %v3492_v8, 7 }
 0x1d0   :  { %v1655_v42 = vmul.f32 %v1631_v26, %v1613_v49  ;;  %v1102_v3 = vmax.f32 %v1090_v36, 0.0  ;;  %v1806_v41 = vmul.f32 %v2437_v33, %v1782_v43  ;;  %v1372_v27 = vmul.f32 %v1212_v53, %v3950_v7  ;;  %v3986_v36 = vld [vmem:[#allocation6 + $0xd8] sm:$0xff] }
 0x1d1   :  { %v2084_v63 = vadd.f32 %v2083_v21, %v2082_v2  ;;  %v2283_v32 = vadd.f32 %v2282_v56, %v2281_v31  ;;  %v2032_v5 = vmul.f32 0.31830987, %v2020_v16  ;;  %v1384_v38 = vmul.f32 %v1250_v17, %v3953_v23 }
 0x1d2   :  { %v1679_v1 = vmul.f32 %v1667_v35, %v1655_v42  ;;  %v3975_v48 = vmin.f32 %v1102_v3, 1.0  ;;  %v2231_v20 = vmul.f32 0.31830987, %v2219_v55  ;;  %v1300_v26 = vperm.slane %v3497_v18, 7 }
 0x1d3   :  { %v2085_v44 = vrot.slane %v2084_v63, 1  ;;  %v2284_v22 = vrot.slane %v2283_v32, 1  ;;  %v2520_v61 = vpop.eup %2519  ;;  %v1868_v19 = vadd.f32 %v1867_v60, %v1830_v15  ;;  %v1703_v59 = vmul.f32 %v1529_v24, %v1359_v29  ;;  %v867_v15 = vpop.f32.mrf.mxu3  ;;  %v3988_v60 = vld [vmem:[#allocation6 + $0x108] sm:$0xff] }
 0x1d4   :  { %v1691_v54 = vmul.f32 8.0, %v1679_v1  ;;  %v1126_v33 = vmul.f32 2.0, %v3975_v48  ;;  %v1396_v49 = vadd.f32 %v1384_v38, %v1372_v27  ;;  %v1408_v35 = vmul.f32 %v1300_v26, %v181_v12  ;;  %v3998_v1 = vld [vmem:[#allocation6 + $0xa8] sm:$0xff] }
 0x1d5   :  { %v2086_v34 = vadd.f32 %v2085_v44, %v2084_v63  ;;  %v2285_v43 = vadd.f32 %v2284_v22, %v2283_v32  ;;  %v1783_v42 = vperm.slane %v3540_v11, 6  ;;  %v866_v29 = vadd.f32 %v865_v14, %v3521_v52 }
 0x1d6   :  { %v1727_v37 = vmax.f32 %v1691_v54, 1e-06  ;;  %v1138_v16 = vmul.f32 %v1126_v33, %v3950_v7  ;;  %v1162_v2 = vmul.f32 %v1126_v33, %v3953_v23  ;;  %v1186_v31 = vmul.f32 %v1126_v33, %v181_v12 }
 0x1d7   :  { %v2128_v58 = vadd.f32 %v2086_v34, %v2032_v5  ;;  %v3982_v55 = vadd.f32 %v2285_v43, %v2231_v20  ;;  %v1470_v12 = vmul.f32 -5.55472, %v3975_v48  ;;  %v1869_v56 = vrot.slane %v1868_v19, 2 }
 0x1d8   :  { %2521 = vrcp.f32 %v1727_v37  ;;  %v1150_v21 = vsub.f32 %v1138_v16, %v966_v6  ;;  %v1174_v7 = vsub.f32 %v1162_v2, %v1004_v4  ;;  %v1198_v23 = vsub.f32 %v1186_v31, %v1054_v25  ;;  %v4004_v25 = vld [vmem:[#allocation6 + $0x20] sm:$0xff] }
 0x1d9   :  { %4523 = vst [vmem:[#allocation35_spill] sm:$0xff] %v3982_v55  ;;  %v2438_v24 = vadd.f32 -1.0, %v2520_v61  ;;  %v1715_v14 = vmul.f32 %v1703_v59, %v3923_v45  ;;  %v1420_v3 = vadd.f32 %v1408_v35, %v1396_v49  ;;  %v2451_v6 = vadd.f32 -6.98316, %v1470_v12 }
 0x1da   :  { %2152 = vst [vmem:[#allocation1 + $0x2d] sm:$0xff] %v2128_v58  ;;  %v1236_v63 = vmul.f32 %v1212_v53, %v1150_v21  ;;  %v1274_v32 = vmul.f32 %v1250_v17, %v1174_v7  ;;  %v1324_v51 = vmul.f32 %v1300_v26, %v1198_v23  ;;  %v4000_v27 = vmul.f32 0.31830987, %v1806_v41  ;;  %v4009_v17 = vld [vmem:[#allocation6 + $0x50] sm:$0xff]  ;;  %v4021_v58 = vld [vmem:[#allocation6 + $0x80] sm:$0xff] }
 0x1db   :  { %v1983_v0 = vunpack.c.l.bf16 %v3986_v36  ;;  %v2182_v9 = vunpack.c.l.bf16 %v3988_v60  ;;  %v935_v4 = vmul.f32 1.442695, %v866_v29  ;;  %v1936_v54 = vrot.slane %v3938_v50, 4  ;;  %v4526_v50 = vld [vmem:[#allocation22_spill] sm:$0xff] }
 0x1dc   :  { %v1769_v45 = vunpack.c.l.bf16 %v3998_v1  ;;  %v1286_v38 = vadd.f32 %v1274_v32, %v1236_v63  ;;  %v1494_v53 = vmul.f32 %v2451_v6, %v3975_v48  ;;  %v1870_v44 = vadd.f32 %v1869_v56, %v1868_v19 }
 0x1dd   :  { %v1807_v20 = vmul.f32 %v2438_v24, %v1783_v42  ;;  %v1997_v22 = vperm.slane %v3549_v28, 6  ;;  %v1432_v61 = vmax.f32 %v1420_v3, 0.0  ;;  %v4013_v59 = vunpack.c.l.bf16 %v4004_v25 }
 0x1de   :  { %v2522_v5 = vpop.eup %2521  ;;  %v1336_v26 = vadd.f32 %v1324_v51, %v1286_v38  ;;  %2523 = vpow2.f32 %v1494_v53  ;;  %v4016_v34 = vunpack.c.l.bf16 %v4009_v17  ;;  %v2196_v43 = vperm.slane %v3554_v62, 6 }
 0x1df   :  { %v1751_v41 = vmul.f32 %v2522_v5, %v1715_v14  ;;  %2525 = vpow2.f32 %v935_v4  ;;  %v1552_v19 = vperm.slane %v3518_v57, 7  ;;  %v967_v35 = vperm.slane %v3405_v30, 0 }
 0x1e0   :  { %v1348_v49 = vmax.f32 %v1336_v26, 0.0  ;;  %v1871_v16 = vrot.slane %v1870_v44, 1  ;;  %v1005_v42 = vperm.slane %v3408_v46, 0  ;;  %v1444_v15 = vmin.f32 %v1432_v61, 1.0 }
 0x1e1   :  { %v2045_v37 = vmul.f32 %v1983_v0, %v1751_v41  ;;  %v2244_v33 = vmul.f32 %v2182_v9, %v1751_v41  ;;  %v1590_v21 = vperm.slane %v3513_v40, 7  ;;  %v991_v7 = vmul.f32 %v967_v35, %v4013_v59 }
 0x1e2   :  { %v1360_v29 = vmin.f32 %v1348_v49, 1.0  ;;  %v2021_v23 = vmul.f32 %v2438_v24, %v1997_v22  ;;  %v1029_v56 = vmul.f32 %v1005_v42, %v4016_v34  ;;  %v1632_v63 = vperm.slane %v3527_v13, 7 }
 0x1e3   :  { %v2087_v2 = vrot.slane %v2045_v37, 4  ;;  %v2286_v31 = vrot.slane %v2244_v33, 4  ;;  %v4033_v32 = vunpack.c.l.bf16 %v4021_v58  ;;  %v1055_v40 = vperm.slane %v3411_v47, 0 }
 0x1e4   :  { %v2524_v14 = vpop.eup %2523  ;;  %v1576_v3 = vmul.f32 %v1552_v19, %v1360_v29  ;;  %v1831_v6 = vmul.f32 %v1769_v45, %v1751_v41  ;;  %v2220_v9 = vmul.f32 %v2438_v24, %v2196_v43  ;;  %v1872_v5 = vadd.f32 %v1871_v16, %v1870_v44 }
 0x1e5   :  { %v2088_v12 = vadd.f32 %v2087_v2, %v2045_v37  ;;  %v2287_v57 = vadd.f32 %v2286_v31, %v2244_v33  ;;  %v2526_v51 = vpop.eup %2525  ;;  %v1668_v53 = vmax.f32 %v1444_v15, 1e-06  ;;  %v1041_v22 = vadd.f32 %v1029_v56, %v991_v7  ;;  %v4047_v15 = vld [vmem:[#allocation2 + $0x40] ss:$8 sm:$0xf] }
 0x1e6   :  { %v1614_v38 = vadd.f32 %v1590_v21, %v1576_v3  ;;  %v2033_v26 = vmul.f32 0.31830987, %v2021_v23  ;;  %v1518_v33 = vmul.f32 0.96, %v2524_v14  ;;  %v4036_v49 = vadd.f32 -1.0, %v2526_v51 }
 0x1e7   :  { %v2089_v0 = vrot.slane %v2088_v12, 2  ;;  %v2288_v4 = vrot.slane %v2287_v57, 2  ;;  %v1784_v19 = vperm.slane %v3540_v11, 7  ;;  %v1079_v45 = vmul.f32 %v1055_v40, %v4033_v32 }
 0x1e8   :  { %v1656_v13 = vmul.f32 %v1632_v63, %v1614_v38  ;;  %v1873_v41 = vrot.slane %v1831_v6, 4  ;;  %v2232_v43 = vmul.f32 0.31830987, %v2220_v9  ;;  %v4043_v16 = vadd.f32 %v1872_v5, %v4000_v27  ;;  %v4057_v63 = vpop.f32.mrf.mxu0 }
 0x1e9   :  { %v2090_v61 = vadd.f32 %v2089_v0, %v2088_v12  ;;  %v2289_v37 = vadd.f32 %v2288_v4, %v2287_v57  ;;  %v4045_v2 = vmul.f32 0.31830987, %v1807_v20  ;;  %v1091_v21 = vadd.f32 %v1079_v45, %v1041_v22  ;;  %v4050_v57 = vld [vmem:[#allocation2 + $0x41] ss:$8 sm:$0xf] }
 0x1ea   :  { %v1680_v31 = vmul.f32 %v1668_v53, %v1656_v13  ;;  %v1530_v11 = vadd.f32 0.04, %v1518_v33  ;;  %v1770_v12 = vunpack.c.h.bf16 %v3998_v1  ;;  %v1808_v14 = vmul.f32 %v4036_v49, %v1784_v19  ;;  %v4055_v20 = vld [vmem:[#allocation2 + $0x42] ss:$8 sm:$0xf] }
 0x1eb   :  { %v2091_v24 = vrot.slane %v2090_v61, 1  ;;  %v2290_v44 = vrot.slane %v2289_v37, 1  ;;  %v1984_v3 = vunpack.c.h.bf16 %v3986_v36  ;;  %v2183_v27 = vunpack.c.h.bf16 %v3988_v60  ;;  %v113_v4 = vld [vmem:[#allocation2 + $0x46] ss:$8 sm:$0xf] }
 0x1ec   :  { %v1692_v56 = vmul.f32 8.0, %v1680_v31  ;;  %v1874_v51 = vadd.f32 %v1873_v41, %v1831_v6  ;;  %v1213_v1 = vperm.slane %v4047_v15, 0  ;;  %v1998_v38 = vperm.slane %v3549_v28, 7 }
 0x1ed   :  { %v2092_v7 = vadd.f32 %v2091_v24, %v2090_v61  ;;  %v2291_v23 = vadd.f32 %v2290_v44, %v2289_v37  ;;  %v1103_v53 = vmax.f32 %v1091_v21, 0.0  ;;  %v1251_v22 = vperm.slane %v4050_v57, 0 }
 0x1ee   :  { %v1728_v5 = vmax.f32 %v1692_v56, 1e-06  ;;  %v1704_v36 = vmul.f32 %v1530_v11, %v1360_v29  ;;  %v1373_v60 = vmul.f32 %v1213_v1, %v4013_v59  ;;  %v1450_v61 = vmul.f32 %v3405_v30, %v4047_v15 }
 0x1ef   :  { %v2129_v0 = vadd.f32 %v2092_v7, %v2033_v26  ;;  %v4059_v9 = vadd.f32 %v2291_v23, %v2232_v43  ;;  %v1452_v6 = vmul.f32 %v3408_v46, %v4050_v57  ;;  %v4069_v26 = vmin.f32 %v1103_v53, 1.0 }
 0x1f0   :  { %2527 = vrcp.f32 %v1728_v5  ;;  %v1385_v37 = vmul.f32 %v1251_v22, %v4016_v34  ;;  %v1456_v28 = vmul.f32 %v3411_v47, %v4055_v20  ;;  %v1875_v33 = vrot.slane %v1874_v51, 2 }
 0x1f1   :  { %4524 = vst [vmem:[#allocation44_spill] sm:$0xff] %v4059_v9  ;;  %v1301_v13 = vperm.slane %v4055_v20, 0  ;;  %v1454_v29 = vadd.f32 %v1452_v6, %v1450_v61  ;;  %v1536_v19 = vadd.f32 1.0, %v113_v4  ;;  %v2022_v45 = vmul.f32 %v4036_v49, %v1998_v38  ;;  %v880_v4 = vpop.f32.mrf.mxu0 }
 0x1f2   :  { %2153 = vst [vmem:[#allocation1 + $0x36] sm:$0xff] %v2129_v0  ;;  %v2197_v41 = vperm.slane %v3554_v62, 7  ;;  %v1127_v24 = vmul.f32 2.0, %v4069_v26  ;;  %v1471_v43 = vmul.f32 -5.55472, %v4069_v26  ;;  %v1716_v44 = vmul.f32 %v1704_v36, %v3975_v48 }
 0x1f3   :  { %v1409_v31 = vmul.f32 %v1301_v13, %v4033_v32  ;;  %v1458_v21 = vadd.f32 %v1456_v28, %v1454_v29  ;;  %v1538_v7 = vmul.f32 %v1536_v19, %v1536_v19  ;;  %v1397_v0 = vadd.f32 %v1385_v37, %v1373_v60 }
 0x1f4   :  { %v1139_v23 = vmul.f32 %v1127_v24, %v4013_v59  ;;  %v1163_v11 = vmul.f32 %v1127_v24, %v4016_v34  ;;  %v1187_v56 = vmul.f32 %v1127_v24, %v4033_v32  ;;  %v1876_v5 = vadd.f32 %v1875_v33, %v1874_v51 }
 0x1f5   :  { %v1460_v62 = vmax.f32 %v1458_v21, 0.0  ;;  %v2452_v38 = vadd.f32 -6.98316, %v1471_v43  ;;  %v4084_v53 = vmul.f32 0.125, %v1538_v7  ;;  %v2221_v48 = vmul.f32 %v4036_v49, %v2197_v41 }
 0x1f6   :  { %v2528_v61 = vpop.eup %2527  ;;  %v1151_v36 = vsub.f32 %v1139_v23, %v967_v35  ;;  %v1175_v59 = vsub.f32 %v1163_v11, %v1005_v42  ;;  %v1199_v34 = vsub.f32 %v1187_v56, %v1055_v40  ;;  %v1421_v49 = vadd.f32 %v1409_v31, %v1397_v0 }
 0x1f7   :  { %v1752_v32 = vmul.f32 %v2528_v61, %v1716_v44  ;;  %v1462_v60 = vmin.f32 %v1460_v62, 1.0  ;;  %v1495_v51 = vmul.f32 %v2452_v38, %v4069_v26  ;;  %v4095_v6 = vsub.f32 1.0, %v4084_v53 }
 0x1f8   :  { %v1237_v37 = vmul.f32 %v1213_v1, %v1151_v36  ;;  %v1275_v28 = vmul.f32 %v1251_v22, %v1175_v59  ;;  %v1325_v33 = vmul.f32 %v1301_v13, %v1199_v34  ;;  %v1877_v29 = vrot.slane %v1876_v5, 1 }
 0x1f9   :  { %v1832_v19 = vmul.f32 %v1770_v12, %v1752_v32  ;;  %v2046_v35 = vmul.f32 %v1984_v3, %v1752_v32  ;;  %v2245_v41 = vmul.f32 %v2183_v27, %v1752_v32  ;;  %v1937_v42 = vrot.slane %v4043_v16, 3 }
 0x1fa   :  { %v1820_v24 = vmul.f32 0.31830987, %v1808_v14  ;;  %v1287_v43 = vadd.f32 %v1275_v28, %v1237_v37  ;;  %v1620_v40 = vmul.f32 %v4095_v6, %v1462_v60  ;;  %2529 = vpow2.f32 %v1495_v51 }
 0x1fb   :  { %v1879_v44 = vrot.slane %v1832_v19, 4  ;;  %v2093_v21 = vrot.slane %v2046_v35, 4  ;;  %v2292_v7 = vrot.slane %v2245_v41, 4  ;;  %v2034_v23 = vmul.f32 0.31830987, %v2022_v45 }
 0x1fc   :  { %v2233_v11 = vmul.f32 0.31830987, %v2221_v48  ;;  %v1337_v1 = vadd.f32 %v1325_v33, %v1287_v43  ;;  %v1433_v22 = vmax.f32 %v1421_v49, 0.0  ;;  %v1878_v13 = vadd.f32 %v1877_v29, %v1876_v5  ;;  %v4108_v5 = vpop.f32.mrf.mxu1 }
 0x1fd   :  { %v1880_v31 = vadd.f32 %v1879_v44, %v1832_v19  ;;  %v2094_v56 = vadd.f32 %v2093_v21, %v2046_v35  ;;  %v2293_v12 = vadd.f32 %v2292_v7, %v2245_v41  ;;  %v879_v3 = vadd.f32 %v4057_v63, %v3521_v52 }
 0x1fe   :  { %v1349_v27 = vmax.f32 %v1337_v1, 0.0  ;;  %v1553_v14 = vperm.slane %v4095_v6, 0  ;;  %v4103_v0 = vadd.f32 %v1620_v40, %v4084_v53  ;;  %v4106_v38 = vunpack.c.h.bf16 %v4004_v25 }
 0x1ff   :  { %v1881_v4 = vrot.slane %v1880_v31, 2  ;;  %v2095_v62 = vrot.slane %v2094_v56, 2  ;;  %v2294_v45 = vrot.slane %v2293_v12, 2  ;;  %v1445_v48 = vmin.f32 %v1433_v22, 1.0 }
 0x200   :  { %v1361_v61 = vmin.f32 %v1349_v27, 1.0  ;;  %v1591_v36 = vperm.slane %v4084_v53, 0  ;;  %v968_v63 = vperm.slane %v3405_v30, 1  ;;  %v2530_v59 = vpop.eup %2529  ;;  %v1915_v34 = vadd.f32 %v1878_v13, %v4045_v2 }
 0x201   :  { %v1882_v32 = vadd.f32 %v1881_v4, %v1880_v31  ;;  %v2096_v60 = vadd.f32 %v2095_v62, %v2094_v56  ;;  %v2295_v51 = vadd.f32 %v2294_v45, %v2293_v12  ;;  %v937_v37 = vmul.f32 1.442695, %v879_v3 }
 0x202   :  { %v1577_v28 = vmul.f32 %v1553_v14, %v1361_v61  ;;  %v1633_v33 = vperm.slane %v4103_v0, 0  ;;  %v4115_v25 = vunpack.c.h.bf16 %v4009_v17  ;;  %v4118_v35 = vunpack.c.h.bf16 %v4021_v58 }
 0x203   :  { %v1883_v49 = vrot.slane %v1882_v32, 1  ;;  %v2097_v29 = vrot.slane %v2096_v60, 1  ;;  %v2296_v19 = vrot.slane %v2295_v51, 1  ;;  %v1519_v41 = vmul.f32 0.96, %v2530_v59 }
 0x204   :  { %v1615_v43 = vadd.f32 %v1591_v36, %v1577_v28  ;;  %v1669_v40 = vmax.f32 %v1445_v48, 1e-06  ;;  %v992_v2 = vmul.f32 %v968_v63, %v4106_v38  ;;  %v1006_v1 = vperm.slane %v3408_v46, 1  ;;  %v893_v3 = vpop.f32.mrf.mxu1  ;;  %v4144_v28 = vld [vmem:[#allocation6 + $0xb0] sm:$0xff] }
 0x205   :  { %v1884_v44 = vadd.f32 %v1883_v49, %v1882_v32  ;;  %v2098_v21 = vadd.f32 %v2097_v29, %v2096_v60  ;;  %v2297_v7 = vadd.f32 %v2296_v19, %v2295_v51  ;;  %v1938_v17 = vrot.slane %v1915_v34, 2  ;;  %v4140_v34 = vld [vmem:[#allocation6 + $0x28] sm:$0xff]  ;;  %v4142_v32 = vld [vmem:[#allocation6 + $0x58] sm:$0xff] }
 0x206   :  { %2531 = vpow2.f32 %v937_v37  ;;  %v1657_v22 = vmul.f32 %v1633_v33, %v1615_v43  ;;  %v1056_v13 = vperm.slane %v3411_v47, 1  ;;  %v1030_v12 = vmul.f32 %v1006_v1, %v4115_v25  ;;  %v4149_v33 = vld [vmem:[#allocation6 + $0xe0] sm:$0xff]  ;;  %v4163_v43 = vld [vmem:[#allocation6 + $0x88] sm:$0xff] }
 0x207   :  { %v1916_v31 = vadd.f32 %v1884_v44, %v1820_v24  ;;  %v2130_v58 = vadd.f32 %v2098_v21, %v2034_v23  ;;  %v4125_v56 = vadd.f32 %v2297_v7, %v2233_v11  ;;  %v1531_v27 = vadd.f32 0.04, %v1519_v41 }
 0x208   :  { %v1681_v14 = vmul.f32 %v1669_v40, %v1657_v22  ;;  %v1080_v4 = vmul.f32 %v1056_v13, %v4118_v35  ;;  %v1042_v45 = vadd.f32 %v1030_v12, %v992_v2  ;;  %v1950_v24 = vsel %vm1949_vm10, %v1936_v54, %v1937_v42  ;;  %v4147_v42 = vld [vmem:[#allocation2 + $0x43] ss:$8 sm:$0xf]  ;;  %v4166_v2 = vld [vmem:[#allocation2 + $0x44] ss:$8 sm:$0xf] }
 0x209   :  { %4525 = vst [vmem:[#allocation36_spill] sm:$0xff] %v4125_v56  ;;  %v1939_v62 = vrot.slane %v1916_v31, 1  ;;  %v1214_v36 = vperm.slane %v4047_v15, 1  ;;  %v4426_v59 = vperm.slane %v4050_v57, 1  ;;  %v1705_v37 = vmul.f32 %v1531_v27, %v1361_v61  ;;  %v4176_v27 = vld [vmem:[#allocation6 + $0x110] sm:$0xff] }
 0x20a   :  { %2154 = vst [vmem:[#allocation1 + $0x3f] sm:$0xff] %v2130_v58  ;;  %v1693_v23 = vmul.f32 8.0, %v1681_v14  ;;  %v1092_v48 = vadd.f32 %v1080_v4, %v1042_v45  ;;  %v4158_v61 = vunpack.c.l.bf16 %v4140_v34  ;;  %v4161_v41 = vunpack.c.l.bf16 %v4142_v32 }
 0x20b   :  { %v1952_v11 = vsel %vm1951_vm11, %v1938_v17, %v1939_v62  ;;  %v1374_v29 = vmul.f32 %v1214_v36, %v4106_v38  ;;  %v1386_v19 = vmul.f32 %v4426_v59, %v4115_v25  ;;  %v4425_v40 = vperm.slane %v3405_v30, 2 }
 0x20c   :  { %v2532_v60 = vpop.eup %2531  ;;  %v1954_v51 = vsel %vm1953_vm12, %v1950_v24, %v1952_v11  ;;  %v1729_v16 = vmax.f32 %v1693_v23, 1e-06  ;;  %v1104_v49 = vmax.f32 %v1092_v48, 0.0  ;;  %v1771_v44 = vunpack.c.l.bf16 %v4144_v28  ;;  %v4191_v48 = vld [vmem:[#allocation2 + $0x45] ss:$8 sm:$0xf] }
 0x20d   :  { %v1956_v54 = vsel %vm1955_vm13, %v4526_v50, %v1954_v51  ;;  %v1302_v7 = vperm.slane %v4055_v20, 1  ;;  %v4424_v17 = vperm.slane %v3408_v46, 2  ;;  %v2440_v31 = vadd.f32 -1.0, %v2532_v60 }
 0x20e   :  { %1962 = vst [vmem:[#allocation9] ss:$8 sm:$0xf] %v1956_v54  ;;  %2533 = vrcp.f32 %v1729_v16  ;;  %v4169_v21 = vmin.f32 %v1104_v49, 1.0  ;;  %v1717_v58 = vmul.f32 %v1705_v37, %v4069_v26  ;;  %v1785_v12 = vperm.slane %v4147_v42, 0 }
 0x20f   :  { %1963 = vst [vmem:[#allocation9] ss:$8 sm:$0xf0] %v1956_v54  ;;  %v1985_v3 = vunpack.c.l.bf16 %v4149_v33  ;;  %v1398_v4 = vadd.f32 %v1386_v19, %v1374_v29  ;;  %v1410_v62 = vmul.f32 %v1302_v7, %v4118_v35  ;;  %v4182_v24 = vunpack.c.l.bf16 %v4163_v43 }
 0x210   :  { %v1128_v14 = vmul.f32 2.0, %v4169_v21  ;;  %v1472_v45 = vmul.f32 -5.55472, %v4169_v21  ;;  %v993_v26 = vmul.f32 %v4425_v40, %v4158_v61  ;;  %v1031_v23 = vmul.f32 %v4424_v17, %v4161_v41 }
 0x211   :  { %v2156_v22 = vld [vmem:[#allocation1 + $0x1] ss:$9 sm:$0xff]  ;;  %v4427_v11 = vperm.slane %v3411_v47, 2  ;;  %v2184_v60 = vunpack.c.l.bf16 %v4176_v27  ;;  %v1809_v54 = vmul.f32 %v2440_v31, %v1785_v12  ;;  %v1999_v49 = vperm.slane %v4166_v2, 0 }
 0x212   :  { %2165 = vst [vmem:[#allocation9 + $0x1] ss:$8 sm:$0xf] %v2156_v22  ;;  %v1140_v51 = vmul.f32 %v1128_v14, %v4106_v38  ;;  %v1164_v37 = vmul.f32 %v1128_v14, %v4115_v25  ;;  %v1188_v16 = vmul.f32 %v1128_v14, %v4118_v35  ;;  %v2453_v29 = vadd.f32 -6.98316, %v1472_v45 }
 0x213   :  { %2166 = vst [vmem:[#allocation9 + $0x1] ss:$8 sm:$0xf0] %v2156_v22  ;;  %v2198_v38 = vperm.slane %v4191_v48, 0  ;;  %v1422_v25 = vadd.f32 %v1410_v62, %v1398_v4  ;;  %v1043_v59 = vadd.f32 %v1031_v23, %v993_v26  ;;  %v1081_v35 = vmul.f32 %v4427_v11, %v4182_v24 }
 0x214   :  { %v2534_v50 = vpop.eup %2533  ;;  %v1152_v22 = vsub.f32 %v1140_v51, %v968_v63  ;;  %v1176_v17 = vsub.f32 %v1164_v37, %v1006_v1  ;;  %v1200_v40 = vsub.f32 %v1188_v16, %v1056_v13  ;;  %v2023_v45 = vmul.f32 %v2440_v31, %v1999_v49 }
 0x215   :  { %v1753_v19 = vmul.f32 %v2534_v50, %v1717_v58  ;;  %v4527_v1 = vperm.slane %v4050_v57, 1  ;;  %v1496_v13 = vmul.f32 %v2453_v29, %v4169_v21  ;;  %v1821_v16 = vmul.f32 0.31830987, %v1809_v54 }
 0x216   :  { %v1238_v63 = vmul.f32 %v1214_v36, %v1152_v22  ;;  %v1326_v37 = vmul.f32 %v1302_v7, %v1200_v40  ;;  %v2222_v23 = vmul.f32 %v2440_v31, %v2198_v38  ;;  %v1093_v50 = vadd.f32 %v1081_v35, %v1043_v59 }
 0x217   :  { %v1833_v12 = vmul.f32 %v1771_v44, %v1753_v19  ;;  %v2047_v14 = vmul.f32 %v1985_v3, %v1753_v19  ;;  %v2246_v58 = vmul.f32 %v2184_v60, %v1753_v19  ;;  %v1276_v51 = vmul.f32 %v4527_v1, %v1176_v17  ;;  %v4215_v60 = vpop.f32.mrf.mxu2 }
 0x218   :  { %v892_v44 = vadd.f32 %v4108_v5, %v3521_v52  ;;  %v1434_v22 = vmax.f32 %v1422_v25, 0.0  ;;  %v2035_v17 = vmul.f32 0.31830987, %v2023_v45  ;;  %2535 = vpow2.f32 %v1496_v13 }
 0x219   :  { %v1885_v4 = vrot.slane %v1833_v12, 4  ;;  %v2099_v62 = vrot.slane %v2047_v14, 4  ;;  %v2298_v26 = vrot.slane %v2246_v58, 4  ;;  %v1288_v3 = vadd.f32 %v1276_v51, %v1238_v63 }
 0x21a   :  { %v1105_v7 = vmax.f32 %v1093_v50, 0.0  ;;  %v1554_v31 = vperm.slane %v4095_v6, 1  ;;  %v1215_v5 = vperm.slane %v4047_v15, 2  ;;  %v1253_v59 = vperm.slane %v4050_v57, 2 }
 0x21b   :  { %v1886_v36 = vadd.f32 %v1885_v4, %v1833_v12  ;;  %v2100_v49 = vadd.f32 %v2099_v62, %v2047_v14  ;;  %v2299_v19 = vadd.f32 %v2298_v26, %v2246_v58  ;;  %v1338_v40 = vadd.f32 %v1326_v37, %v1288_v3 }
 0x21c   :  { %v4218_v11 = vmin.f32 %v1105_v7, 1.0  ;;  %v1446_v25 = vmin.f32 %v1434_v22, 1.0  ;;  %v1592_v63 = vperm.slane %v4084_v53, 1  ;;  %v1375_v45 = vmul.f32 %v1215_v5, %v4158_v61 }
 0x21d   :  { %v1887_v54 = vrot.slane %v1886_v36, 2  ;;  %v2101_v29 = vrot.slane %v2100_v49, 2  ;;  %v2300_v1 = vrot.slane %v2299_v19, 2  ;;  %v1350_v38 = vmax.f32 %v1338_v40, 0.0 }
 0x21e   :  { %v1387_v51 = vmul.f32 %v1253_v59, %v4161_v41  ;;  %v2234_v4 = vmul.f32 0.31830987, %v2222_v23  ;;  %v2536_v26 = vpop.eup %2535  ;;  %v1634_v50 = vperm.slane %v4103_v0, 1  ;;  %v4528_v39 = vperm.slane %v3405_v30, 2 }
 0x21f   :  { %v1888_v35 = vadd.f32 %v1887_v54, %v1886_v36  ;;  %v2102_v12 = vadd.f32 %v2101_v29, %v2100_v49  ;;  %v2301_v14 = vadd.f32 %v2300_v1, %v2299_v19  ;;  %v1362_v58 = vmin.f32 %v1350_v38, 1.0  ;;  %v906_v19 = vpop.f32.mrf.mxu2 }
 0x220   :  { %v1129_v36 = vmul.f32 2.0, %v4218_v11  ;;  %v1303_v49 = vperm.slane %v4055_v20, 2  ;;  %v1670_v54 = vmax.f32 %v1446_v25, 1e-06  ;;  %v1399_v38 = vadd.f32 %v1387_v51, %v1375_v45 }
 0x221   :  { %v1889_v37 = vrot.slane %v1888_v35, 1  ;;  %v2103_v13 = vrot.slane %v2102_v12, 1  ;;  %v2302_v62 = vrot.slane %v2301_v14, 1  ;;  %v1578_v3 = vmul.f32 %v1554_v31, %v1362_v58 }
 0x222   :  { %v1141_v1 = vmul.f32 %v1129_v36, %v4158_v61  ;;  %v1411_v23 = vmul.f32 %v1303_v49, %v4182_v24  ;;  %v1520_v55 = vmul.f32 0.96, %v2536_v26  ;;  %v1473_v61 = vmul.f32 -5.55472, %v4218_v11 }
 0x223   :  { %v1890_v22 = vadd.f32 %v1889_v37, %v1888_v35  ;;  %v2104_v40 = vadd.f32 %v2103_v13, %v2102_v12  ;;  %v2303_v7 = vadd.f32 %v2302_v62, %v2301_v14  ;;  %v1616_v29 = vadd.f32 %v1592_v63, %v1578_v3 }
 0x224   :  { %v1153_v19 = vsub.f32 %v1141_v1, %v4528_v39  ;;  %v1165_v35 = vmul.f32 %v1129_v36, %v4161_v41  ;;  %v1189_v12 = vmul.f32 %v1129_v36, %v4182_v24  ;;  %v939_v14 = vmul.f32 1.442695, %v892_v44 }
 0x225   :  { %v4230_v56 = vadd.f32 %v1890_v22, %v1821_v16  ;;  %v2131_v31 = vadd.f32 %v2104_v40, %v2035_v17  ;;  %v4232_v9 = vadd.f32 %v2303_v7, %v2234_v4  ;;  %v1658_v18 = vmul.f32 %v1634_v50, %v1616_v29 }
 0x226   :  { %v4529_v16 = vperm.slane %v3408_v46, 2  ;;  %v4530_v17 = vperm.slane %v3411_v47, 2  ;;  %v1239_v51 = vmul.f32 %v1215_v5, %v1153_v19  ;;  %v1532_v37 = vadd.f32 0.04, %v1520_v55 }
 0x227   :  { %2157 = vst [vmem:[#allocation1] sm:$0xff] %v2131_v31  ;;  %v1682_v25 = vmul.f32 %v1670_v54, %v1658_v18  ;;  %v1423_v13 = vadd.f32 %v1411_v23, %v1399_v38  ;;  %v2454_v4 = vadd.f32 -6.98316, %v1473_v61  ;;  %v149_v24 = vunpack.c.h.bf16 %v4140_v34 }
 0x228   :  { %v1177_v63 = vsub.f32 %v1165_v35, %v4529_v16  ;;  %v1201_v45 = vsub.f32 %v1189_v12, %v4530_v17  ;;  %2537 = vpow2.f32 %v939_v14  ;;  %v167_v18 = vunpack.c.h.bf16 %v4142_v32 }
 0x229   :  { %v1694_v39 = vmul.f32 8.0, %v1682_v25  ;;  %v1497_v44 = vmul.f32 %v2454_v4, %v4218_v11  ;;  %v4247_v26 = vunpack.c.h.bf16 %v4163_v43  ;;  %v970_v5 = vperm.slane %v3405_v30, 3 }
 0x22a   :  { %v1277_v62 = vmul.f32 %v1253_v59, %v1177_v63  ;;  %v1327_v41 = vmul.f32 %v1303_v49, %v1201_v45  ;;  %v1008_v55 = vperm.slane %v3408_v46, 3  ;;  %v1706_v36 = vmul.f32 %v1532_v37, %v1362_v58 }
 0x22b   :  { %v1730_v3 = vmax.f32 %v1694_v39, 1e-06  ;;  %v1435_v22 = vmax.f32 %v1423_v13, 0.0  ;;  %2539 = vpow2.f32 %v1497_v44  ;;  %v1058_v59 = vperm.slane %v3411_v47, 3 }
 0x22c   :  { %v1289_v50 = vadd.f32 %v1277_v62, %v1239_v51  ;;  %v994_v49 = vmul.f32 %v970_v5, %v149_v24  ;;  %v1032_v40 = vmul.f32 %v1008_v55, %v167_v18  ;;  %v1555_v7 = vperm.slane %v4095_v6, 2 }
 0x22d   :  { %2541 = vrcp.f32 %v1730_v3  ;;  %v1082_v32 = vmul.f32 %v1058_v59, %v4247_v26  ;;  %v1718_v46 = vmul.f32 %v1706_v36, %v4169_v21  ;;  %v1447_v29 = vmin.f32 %v1435_v22, 1.0 }
 0x22e   :  { %v1339_v34 = vadd.f32 %v1327_v41, %v1289_v50  ;;  %v1044_v54 = vadd.f32 %v1032_v40, %v994_v49  ;;  %v2538_v30 = vpop.eup %2537  ;;  %v1593_v1 = vperm.slane %v4084_v53, 2  ;;  %v1986_v31 = vunpack.c.h.bf16 %v4149_v33  ;;  %v4276_v50 = vpop.f32.mrf.mxu3 }
 0x22f   :  { %v2185_v19 = vunpack.c.h.bf16 %v4176_v27  ;;  %v1216_v35 = vperm.slane %v4047_v15, 3  ;;  %v1254_v12 = vperm.slane %v4050_v57, 3  ;;  %v905_v61 = vadd.f32 %v4215_v60, %v3521_v52 }
 0x230   :  { %v1351_v43 = vmax.f32 %v1339_v34, 0.0  ;;  %v1094_v38 = vadd.f32 %v1082_v32, %v1044_v54  ;;  %v1635_v21 = vperm.slane %v4103_v0, 2  ;;  %v4265_v63 = vadd.f32 -1.0, %v2538_v30 }
 0x231   :  { %v2540_v23 = vpop.eup %2539  ;;  %v1376_v45 = vmul.f32 %v1216_v35, %v149_v24  ;;  %v1388_v33 = vmul.f32 %v1254_v12, %v167_v18  ;;  %v2000_v27 = vperm.slane %v4166_v2, 1  ;;  %v1671_v37 = vmax.f32 %v1447_v29, 1e-06 }
 0x232   :  { %v1363_v58 = vmin.f32 %v1351_v43, 1.0  ;;  %v1106_v16 = vmax.f32 %v1094_v38, 0.0  ;;  %v1521_v39 = vmul.f32 0.96, %v2540_v23  ;;  %v1304_v62 = vperm.slane %v4055_v20, 3 }
 0x233   :  { %v2542_v14 = vpop.eup %2541  ;;  %v2199_v41 = vperm.slane %v4191_v48, 1  ;;  %v941_v44 = vmul.f32 1.442695, %v905_v61  ;;  %v1400_v49 = vadd.f32 %v1388_v33, %v1376_v45  ;;  %v2024_v32 = vmul.f32 %v4265_v63, %v2000_v27 }
 0x234   :  { %v1579_v25 = vmul.f32 %v1555_v7, %v1363_v58  ;;  %v4267_v17 = vmul.f32 %v2542_v14, %v1718_v46  ;;  %v4270_v13 = vmin.f32 %v1106_v16, 1.0  ;;  %v1412_v40 = vmul.f32 %v1304_v62, %v4247_v26 }
 0x235   :  { %v1533_v29 = vadd.f32 0.04, %v1521_v39  ;;  %v2223_v61 = vmul.f32 %v4265_v63, %v2199_v41  ;;  %2543 = vpow2.f32 %v941_v44 }
 0x236   :  { %v1617_v51 = vadd.f32 %v1593_v1, %v1579_v25  ;;  %v2048_v4 = vmul.f32 %v1986_v31, %v4267_v17  ;;  %v2247_v60 = vmul.f32 %v2185_v19, %v4267_v17  ;;  %v1130_v36 = vmul.f32 2.0, %v4270_v13 }
 0x237   :  { %v1474_v1 = vmul.f32 -5.55472, %v4270_v13  ;;  %v2235_v39 = vmul.f32 0.31830987, %v2223_v61 }
 0x238   :  { %v1659_v3 = vmul.f32 %v1635_v21, %v1617_v51  ;;  %v2105_v22 = vrot.slane %v2048_v4, 4  ;;  %v2304_v34 = vrot.slane %v2247_v60, 4  ;;  %v1142_v7 = vmul.f32 %v1130_v36, %v149_v24 }
 0x239   :  { %v1166_v54 = vmul.f32 %v1130_v36, %v167_v18  ;;  %v1190_v19 = vmul.f32 %v1130_v36, %v4247_v26  ;;  %v1424_v21 = vadd.f32 %v1412_v40, %v1400_v49  ;;  %v1707_v51 = vmul.f32 %v1533_v29, %v1363_v58  ;;  %v919_v26 = vpop.f32.mrf.mxu3  ;;  %v4290_v58 = vld [vmem:[#allocation6 + $0xb8] sm:$0xff] }
 0x23a   :  { %v1683_v43 = vmul.f32 %v1671_v37, %v1659_v3  ;;  %v2106_v30 = vadd.f32 %v2105_v22, %v2048_v4  ;;  %v2305_v46 = vadd.f32 %v2304_v34, %v2247_v60  ;;  %v1154_v23 = vsub.f32 %v1142_v7, %v970_v5  ;;  %v4286_v3 = vld [vmem:[#allocation6 + $0xe8] sm:$0xff] }
 0x23b   :  { %v1178_v31 = vsub.f32 %v1166_v54, %v1008_v55  ;;  %v1202_v24 = vsub.f32 %v1190_v19, %v1058_v59  ;;  %v2455_v37 = vadd.f32 -6.98316, %v1474_v1  ;;  %v2036_v4 = vmul.f32 0.31830987, %v2024_v32  ;;  %v2544_v34 = vpop.eup %2543 }
 0x23c   :  { %v1695_v38 = vmul.f32 8.0, %v1683_v43  ;;  %v2107_v14 = vrot.slane %v2106_v30, 2  ;;  %v2306_v25 = vrot.slane %v2305_v46, 2  ;;  %v1240_v18 = vmul.f32 %v1216_v35, %v1154_v23 }
 0x23d   :  { %v1278_v45 = vmul.f32 %v1254_v12, %v1178_v31  ;;  %v1328_v55 = vmul.f32 %v1304_v62, %v1202_v24  ;;  %v1436_v47 = vmax.f32 %v1424_v21, 0.0  ;;  %v1498_v59 = vmul.f32 %v2455_v37, %v4270_v13 }
 0x23e   :  { %v1731_v16 = vmax.f32 %v1695_v38, 1e-06  ;;  %v2108_v33 = vadd.f32 %v2107_v14, %v2106_v30  ;;  %v2307_v27 = vadd.f32 %v2306_v25, %v2305_v46  ;;  %v1719_v44 = vmul.f32 %v1707_v51, %v4218_v11 }
 0x23f   :  { %v1290_v5 = vadd.f32 %v1278_v45, %v1240_v18  ;;  %v1556_v62 = vperm.slane %v4095_v6, 3  ;;  %v1987_v32 = vunpack.c.l.bf16 %v4286_v3  ;;  %v1772_v7 = vunpack.c.h.bf16 %v4144_v28 }
 0x240   :  { %2545 = vrcp.f32 %v1731_v16  ;;  %v2109_v60 = vrot.slane %v2108_v33, 1  ;;  %v2308_v41 = vrot.slane %v2307_v27, 1  ;;  %v1448_v30 = vmin.f32 %v1436_v47, 1.0 }
 0x241   :  { %v1340_v36 = vadd.f32 %v1328_v55, %v1290_v5  ;;  %2547 = vpow2.f32 %v1498_v59  ;;  %v1594_v46 = vperm.slane %v4084_v53, 3  ;;  %v1773_v29 = vunpack.c.l.bf16 %v4290_v58 }
 0x242   :  { %v2110_v35 = vadd.f32 %v2109_v60, %v2108_v33  ;;  %v2309_v12 = vadd.f32 %v2308_v41, %v2307_v27  ;;  %v1636_v6 = vperm.slane %v4103_v0, 3  ;;  %v1834_v31 = vmul.f32 %v1772_v7, %v4267_v17 }
 0x243   :  { %v1352_v22 = vmax.f32 %v1340_v36, 0.0  ;;  %v4304_v19 = vadd.f32 -1.0, %v2544_v34  ;;  %v1672_v14 = vmax.f32 %v1448_v30, 1e-06  ;;  %v2001_v53 = vperm.slane %v4166_v2, 2 }
 0x244   :  { %v2132_v49 = vadd.f32 %v2110_v35, %v2036_v4  ;;  %v4293_v40 = vadd.f32 %v2309_v12, %v2235_v39  ;;  %v918_v0 = vadd.f32 %v4276_v50, %v3521_v52  ;;  %v1891_v18 = vrot.slane %v1834_v31, 4 }
 0x245   :  { %v1364_v54 = vmin.f32 %v1352_v22, 1.0  ;;  %v2025_v17 = vmul.f32 %v4304_v19, %v2001_v53  ;;  %v1786_v12 = vperm.slane %v4147_v42, 1  ;;  %v1988_v22 = vunpack.c.h.bf16 %v4286_v3 }
 0x246   :  { %v2546_v43 = vpop.eup %2545  ;;  %2158 = vst [vmem:[#allocation1 + $0x9] sm:$0xff] %v2132_v49  ;;  %v943_v37 = vmul.f32 1.442695, %v918_v0  ;;  %v1892_v26 = vadd.f32 %v1891_v18, %v1834_v31  ;;  %v1787_v49 = vperm.slane %v4147_v42, 2  ;;  %v2175_v31 = vld [vmem:[#allocation6 + $0x118] sm:$0xff] }
 0x247   :  { %v4298_v11 = vmul.f32 %v2546_v43, %v1719_v44  ;;  %v1580_v1 = vmul.f32 %v1556_v62, %v1364_v54  ;;  %v2548_v23 = vpop.eup %2547  ;;  %v2037_v39 = vmul.f32 0.31830987, %v2025_v17  ;;  %v1774_v44 = vunpack.c.h.bf16 %v4290_v58 }
 0x248   :  { %v1522_v21 = vmul.f32 0.96, %v2548_v23  ;;  %v1893_v52 = vrot.slane %v1892_v26, 2  ;;  %v1788_v58 = vperm.slane %v4147_v42, 3  ;;  %v2186_v18 = vunpack.c.l.bf16 %v2175_v31 }
 0x249   :  { %v2049_v38 = vmul.f32 %v1987_v32, %v4298_v11  ;;  %v1618_v28 = vadd.f32 %v1594_v46, %v1580_v1  ;;  %v1835_v61 = vmul.f32 %v1773_v29, %v4298_v11 }
 0x24a   :  { %v1534_v51 = vadd.f32 0.04, %v1522_v21  ;;  %v1894_v34 = vadd.f32 %v1893_v52, %v1892_v26 }
 0x24b   :  { %v2111_v25 = vrot.slane %v2049_v38, 4  ;;  %v1660_v16 = vmul.f32 %v1636_v6, %v1618_v28  ;;  %v1897_v33 = vrot.slane %v1835_v61, 4 }
 0x24c   :  { %v1708_v36 = vmul.f32 %v1534_v51, %v1364_v54  ;;  %v1810_v54 = vmul.f32 %v4265_v63, %v1786_v12  ;;  %v1895_v29 = vrot.slane %v1894_v34, 1 }
 0x24d   :  { %v2112_v24 = vadd.f32 %v2111_v25, %v2049_v38  ;;  %v1684_v45 = vmul.f32 %v1672_v14, %v1660_v16  ;;  %v1898_v60 = vadd.f32 %v1897_v33, %v1835_v61  ;;  %v2002_v38 = vperm.slane %v4166_v2, 3 }
 0x24e   :  { %v1720_v35 = vmul.f32 %v1708_v36, %v4270_v13  ;;  %v1811_v13 = vmul.f32 %v4304_v19, %v1787_v49  ;;  %v1822_v61 = vmul.f32 0.31830987, %v1810_v54  ;;  %v1896_v53 = vadd.f32 %v1895_v29, %v1894_v34 }
 0x24f   :  { %v2113_v27 = vrot.slane %v2112_v24, 2  ;;  %v1696_v5 = vmul.f32 8.0, %v1684_v45  ;;  %v1899_v50 = vrot.slane %v1898_v60, 2  ;;  %v2187_v33 = vunpack.c.h.bf16 %v2175_v31 }
 0x250   :  { %v1823_v63 = vmul.f32 0.31830987, %v1811_v13  ;;  %v1918_v17 = vadd.f32 %v1896_v53, %v1822_v61  ;;  %v4533_v13 = vld [vmem:[#allocation25_spill] sm:$0xff]  ;;  %v4537_v53 = vld [vmem:[#allocation32_spill] sm:$0xff] }
 0x251   :  { %v2114_v55 = vadd.f32 %v2113_v27, %v2112_v24  ;;  %v1732_v4 = vmax.f32 %v1696_v5, 1e-06  ;;  %v1900_v43 = vadd.f32 %v1899_v50, %v1898_v60 }
 0x253   :  { %v2115_v41 = vrot.slane %v2114_v55, 1  ;;  %2549 = vrcp.f32 %v1732_v4  ;;  %v1901_v6 = vrot.slane %v1900_v43, 1  ;;  %v1964_v4 = vlaneseq }
 0x254   :  { %2551 = vpow2.f32 %v943_v37  ;;  %v2248_v37 = vmul.f32 %v2186_v18, %v4298_v11  ;;  %v2380_v11 = vmul.f32 0.02, %v4050_v57 }
 0x255   :  { %v2116_v47 = vadd.f32 %v2115_v41, %v2114_v55  ;;  %v1902_v21 = vadd.f32 %v1901_v6, %v1900_v43  ;;  %v1940_v41 = vrot.slane %v1918_v17, 7  ;;  %vm4325_vm14 = vcmp.lt.s32.totalorder %v1964_v4, 512  ;;  %v4534_v6 = vld [vmem:[#allocation19_spill] sm:$0xff]  ;;  %v4544_v17 = vld [vmem:[#allocation17_spill] sm:$0xff] }
 0x256   :  { %v2310_v50 = vrot.slane %v2248_v37, 4 }
 0x257   :  { %v2133_v59 = vadd.f32 %v2116_v47, %v2037_v39  ;;  %v1919_v27 = vadd.f32 %v1902_v21, %v1823_v63  ;;  %v4538_v63 = vld [vmem:[#allocation18_spill] sm:$0xff]  ;;  %v4539_v21 = vld [vmem:[#allocation41_spill] sm:$0xff] }
 0x258   :  { %v2311_v29 = vadd.f32 %v2310_v50, %v2248_v37 }
 0x259   :  { %2159 = vst [vmem:[#allocation1 + $0x12] sm:$0xff] %v2133_v59  ;;  %v2550_v62 = vpop.eup %2549  ;;  %v1941_v36 = vrot.slane %v1919_v27, 6 }
 0x25a   :  { %v2552_v32 = vpop.eup %2551  ;;  %v1756_v7 = vmul.f32 %v2550_v62, %v1720_v35  ;;  %v1957_v62 = vsel %vm1943_vm7, %v4230_v56, %v1940_v41 }
 0x25b   :  { %v4318_v1 = vadd.f32 -1.0, %v2552_v32  ;;  %v2553_v32 = vld [vmem:[#allocation2 + $0x47] ss:$8 sm:$0xf] }
 0x25c   :  { %v1836_v30 = vmul.f32 %v1774_v44, %v1756_v7  ;;  %v2050_v46 = vmul.f32 %v1988_v22, %v1756_v7  ;;  %v2249_v39 = vmul.f32 %v2187_v33, %v1756_v7  ;;  %v2370_v44 = vmul.f32 0.02, %v4047_v15  ;;  %v2554_v7 = vld [vmem:[#allocation2 + $0xa0] ss:$8 sm:$0xf] }
 0x25d   :  { %v1812_v25 = vmul.f32 %v4318_v1, %v1788_v58  ;;  %v2026_v24 = vmul.f32 %v4318_v1, %v2002_v38  ;;  %v2390_v22 = vmul.f32 0.02, %v4055_v20  ;;  %v2382_v54 = vadd.f32 %v2554_v7, %v2380_v11 }
 0x25e   :  { %v1903_v3 = vrot.slane %v1836_v30, 4  ;;  %v2117_v23 = vrot.slane %v2050_v46, 4  ;;  %v2316_v12 = vrot.slane %v2249_v39, 4  ;;  %v2372_v43 = vadd.f32 %v2553_v32, %v2370_v44 }
 0x25f   :  { %v1824_v2 = vmul.f32 0.31830987, %v1812_v25  ;;  %v2038_v5 = vmul.f32 0.31830987, %v2026_v24  ;;  %v2312_v20 = vrot.slane %v2311_v29, 2  ;;  %v4541_v24 = vld [vmem:[#allocation44_spill] sm:$0xff] }
 0x260   :  { %v1904_v28 = vadd.f32 %v1903_v3, %v1836_v30  ;;  %v2118_v14 = vadd.f32 %v2117_v23, %v2050_v46  ;;  %v2555_v30 = vld [vmem:[#allocation2 + $0xa1] ss:$8 sm:$0xf]  ;;  %v2317_v15 = vadd.f32 %v2316_v12, %v2249_v39  ;;  %2377 = vst.msk [vmem:[#allocation9 + $0x43] ss:$8 sm:$0xf] %vm4325_vm14, %v2372_v43 }
 0x261   :  { %v2392_v46 = vadd.f32 %v2555_v30, %v2390_v22  ;;  %2387 = vst.msk [vmem:[#allocation9 + $0x44] ss:$8 sm:$0xf] %vm4325_vm14, %v2382_v54  ;;  %v2369_v58 = vmul.f32 0.02, %v3490_v10  ;;  %v4535_v3 = vld [vmem:[#allocation20_spill] sm:$0xff]  ;;  %v2313_v31 = vadd.f32 %v2312_v20, %v2311_v29 }
 0x262   :  { %v1905_v16 = vrot.slane %v1904_v28, 2  ;;  %v2119_v0 = vrot.slane %v2118_v14, 2  ;;  %v2318_v56 = vrot.slane %v2317_v15, 2  ;;  %v2379_v38 = vmul.f32 0.02, %v3492_v8 }
 0x263   :  { %2397 = vst.msk [vmem:[#allocation9 + $0x45] ss:$8 sm:$0xf] %vm4325_vm14, %v2392_v46  ;;  %v2200_v23 = vperm.slane %v4191_v48, 2  ;;  %v2371_v25 = vadd.f32 %v2369_v58, %v4538_v63  ;;  %v2389_v10 = vmul.f32 0.02, %v4539_v21 }
 0x264   :  { %v1906_v42 = vadd.f32 %v1905_v16, %v1904_v28  ;;  %v2120_v45 = vadd.f32 %v2119_v0, %v2118_v14  ;;  %v4536_v28 = vld [vmem:[#allocation21_spill] sm:$0xff]  ;;  %v2201_v14 = vperm.slane %v4191_v48, 3  ;;  %v2319_v61 = vadd.f32 %v2318_v56, %v2317_v15  ;;  %v4540_v16 = vld [vmem:[#allocation35_spill] sm:$0xff]  ;;  %v4542_v0 = vld [vmem:[#allocation16_spill] sm:$0xff] }
 0x265   :  { %v2381_v8 = vadd.f32 %v2379_v38, %v4542_v0  ;;  %v2224_v18 = vmul.f32 %v4304_v19, %v2200_v23  ;;  %2374 = vst [vmem:[#allocation9 + $0x3] ss:$8 sm:$0xf] %v2371_v25 }
 0x266   :  { %v1907_v51 = vrot.slane %v1906_v42, 1  ;;  %v2121_v55 = vrot.slane %v2120_v45, 1  ;;  %v2225_v48 = vmul.f32 %v4318_v1, %v2201_v14  ;;  %v2320_v33 = vrot.slane %v2319_v61, 1  ;;  %2375 = vst [vmem:[#allocation9 + $0x3] ss:$8 sm:$0xf0] %v2371_v25 }
 0x267   :  { %2384 = vst [vmem:[#allocation9 + $0x4] ss:$8 sm:$0xf] %v2381_v8  ;;  %v2236_v27 = vmul.f32 0.31830987, %v2224_v18 }
 0x268   :  { %v1908_v26 = vadd.f32 %v1907_v51, %v1906_v42  ;;  %v2122_v60 = vadd.f32 %v2121_v55, %v2120_v45  ;;  %v2314_v42 = vrot.slane %v2313_v31, 1  ;;  %v4543_v45 = vld [vmem:[#allocation36_spill] sm:$0xff]  ;;  %2385 = vst [vmem:[#allocation9 + $0x4] ss:$8 sm:$0xf0] %v2381_v8  ;;  %v2321_v55 = vadd.f32 %v2320_v33, %v2319_v61 }
 0x26a   :  { %v1920_v47 = vadd.f32 %v1908_v26, %v1824_v2  ;;  %v2134_v52 = vadd.f32 %v2122_v60, %v2038_v5  ;;  %v2391_v2 = vadd.f32 %v2389_v10, %v4544_v17  ;;  %v2315_v51 = vadd.f32 %v2314_v42, %v2313_v31 }
 0x26b   :  { %v2237_v5 = vmul.f32 0.31830987, %v2225_v48 }
 0x26c   :  { %v1942_v59 = vrot.slane %v1920_v47, 5  ;;  %2160 = vst [vmem:[#allocation1 + $0x1b] sm:$0xff] %v2134_v52  ;;  %v2332_v19 = vadd.f32 %v2315_v51, %v2236_v27 }
 0x26d   :  { %2394 = vst [vmem:[#allocation9 + $0x5] ss:$8 sm:$0xf] %v2391_v2  ;;  %v2333_v26 = vadd.f32 %v2321_v55, %v2237_v5 }
 0x26e   :  { %v1958_v34 = vsel %vm1945_vm8, %v1941_v36, %v1942_v59  ;;  %2395 = vst [vmem:[#allocation9 + $0x5] ss:$8 sm:$0xf0] %v2391_v2 }
 0x26f   :  { %v1959_v49 = vsel %vm1947_vm9, %v1957_v62, %v1958_v34 }
 0x270   :  { %1969 = vst.msk [vmem:[#allocation9 + $0x40] ss:$8 sm:$0xf] %vm4325_vm14, %v1959_v49 }
 0x273   :  { %v2161_v57 = vld [vmem:[#allocation1 + $0x1] ss:$9 sm:$0xff] }
 0x274   :  { %2168 = vst.msk [vmem:[#allocation9 + $0x41] ss:$8 sm:$0xf] %vm4325_vm14, %v2161_v57 }
 0x275   :  { %2346 = vst [vmem:[#allocation1] sm:$0xff] %v4533_v13 }
 0x276   :  { %2347 = vst [vmem:[#allocation1 + $0x9] sm:$0xff] %v4534_v6 }
 0x277   :  { %2348 = vst [vmem:[#allocation1 + $0x12] sm:$0xff] %v4535_v3 }
 0x278   :  { %2349 = vst [vmem:[#allocation1 + $0x1b] sm:$0xff] %v4536_v28 }
 0x279   :  { %2350 = vst [vmem:[#allocation1 + $0x24] sm:$0xff] %v4537_v53 }
 0x27a   :  { %2351 = vst [vmem:[#allocation1 + $0x2d] sm:$0xff] %v4540_v16 }
 0x27b   :  { %2352 = vst [vmem:[#allocation1 + $0x36] sm:$0xff] %v4541_v24 }
 0x27c   :  { %2353 = vst [vmem:[#allocation1 + $0x3f] sm:$0xff] %v4543_v45 }
 0x283   :  { %v2355_v37 = vld [vmem:[#allocation1 + $0x2] ss:$9 sm:$0xff] }
 0x284   :  { %2356 = vst [vmem:[#allocation1] sm:$0xff] %v4232_v9 }
 0x285   :  { %2357 = vst [vmem:[#allocation1 + $0x9] sm:$0xff] %v4293_v40 }
 0x286   :  { %2358 = vst [vmem:[#allocation1 + $0x12] sm:$0xff] %v2332_v19 }
 0x287   :  { %2359 = vst [vmem:[#allocation1 + $0x1b] sm:$0xff] %v2333_v26 }
 0x288   :  { %2364 = vst [vmem:[#allocation9 + $0x2] ss:$8 sm:$0xf] %v2355_v37 }
 0x289   :  { %2365 = vst [vmem:[#allocation9 + $0x2] ss:$8 sm:$0xf0] %v2355_v37 }
 0x28e   :  { %v2360_v1 = vld [vmem:[#allocation1 + $0x2] ss:$9 sm:$0xff] }
 0x28f   :  { %2367 = vst.msk [vmem:[#allocation9 + $0x42] ss:$8 sm:$0xf] %vm4325_vm14, %v2360_v1 }
 0x290   :  { %2409 = dma.vmem_to_hbm [thread:$0]  %s2405_s13, 1536, %s2407_s0, [#allocation4]  }
 0x291   :  { %2646 = dma.done.wait [#allocation4], 1536  }
 0x292   :  { %2647 = vsyncadd [#allocation4], 4294965760 }
 0x293   :  { %2414 = vsyncpa [#allocation3], 1 }
 0x294   :  { %2415 = vsyncpa [#allocation7], 1 }
 0x295   :  { %2416 = vsyncpa [#allocation4], 1 }
 0x296   :  { %2417 = vsyncpa [#allocation5], 1 }

</bundles_post_ra>
